<compile_context>
chip_gen: v7x
topology: tpu7x:2x2x1
jax: 0.10.0
libtpu: 0.0.40
codegen_flags: <defaults>
</compile_context>

<pallas_src>
from functools import partial

import jax
import jax.numpy as jnp
from jax import lax
from jax.experimental import pallas as pl
from jax.experimental.pallas import tpu as pltpu


def _ilog2(v):
    assert v > 0 and (v & (v - 1)) == 0, v
    return v.bit_length() - 1


# ----------------------------------------------------------------------------
# In-kernel helpers (pure value math on channel-major (C, N*h*w) blocks)
# ----------------------------------------------------------------------------
def _shift_flat(a, off):
    """result[:, s] = a[:, s + off] (cyclic along the flat lane/spatial axis).

    Out-of-image positions are masked by the caller, so cyclic wrap is
    harmless.  For 128-aligned lane widths this is a cheap XLU lane rotation;
    at the 4x4 level (S = 32) it is folded into a 0/1 selection matmul.
    """
    s_n = a.shape[-1]
    if off == 0:
        return a
    if s_n % 128 == 0:
        return pltpu.roll(a, shift=(-off) % s_n, axis=1)
    s_in = lax.broadcasted_iota(jnp.int32, (s_n, s_n), 0)
    s_out = lax.broadcasted_iota(jnp.int32, (s_n, s_n), 1)
    sel = jnp.where(s_in == s_out + off, 1.0, 0.0)
    return jnp.dot(a, sel, preferred_element_type=jnp.float32)


def _conv(a, w_flat, b_col, h, w, *, k, relu):
    """'same' KxK conv + bias (+ReLU) on a (Cin, N*h*w) block.

    One MXU matmul with all K*K taps stacked on the contraction dim:
        out (Cout, S) = w_flat (Cout, K*K*Cin) @ im2col (K*K*Cin, S)
    """
    cin, s_n = a.shape
    pad = (k - 1) // 2
    if k == 1:
        im2col = a
    else:
        s_idx = lax.broadcasted_iota(jnp.int32, (cin, s_n), 1)
        xc = s_idx & (w - 1)                        # x within a row
        yc = (s_idx >> _ilog2(w)) & (h - 1)         # y within an image
        taps = []
        for ky in range(k):
            for kx in range(k):
                dy, dx = ky - pad, kx - pad
                t = _shift_flat(a, dy * w + dx)
                conds = []
                if dx > 0:
                    conds.append(xc < w - dx)
                elif dx < 0:
                    conds.append(xc >= -dx)
                if dy > 0:
                    conds.append(yc < h - dy)
                elif dy < 0:
                    conds.append(yc >= -dy)
                if conds:
                    valid = conds[0]
                    for c in conds[1:]:
                        valid = valid & c
                    t = jnp.where(valid, t, 0.0)    # zero-pad outside the image
                taps.append(t)
        im2col = jnp.concatenate(taps, axis=0)      # (K*K*Cin, S), sublane concat
    out = jnp.dot(w_flat, im2col, preferred_element_type=jnp.float32) + b_col
    return jnp.maximum(out, 0.0) if relu else out


def _maxpool2(a, h, w):
    """2x2 / stride-2 max pool on a (C, N*h*w) block -> (C, N*h*w/4)."""
    _, s_n = a.shape
    # Forward 2x2 max at every position; only even/even anchors are gathered
    # below, and for those all three shifts stay inside the same image.
    m = jnp.maximum(jnp.maximum(a, _shift_flat(a, 1)),
                    jnp.maximum(_shift_flat(a, w), _shift_flat(a, w + 1)))
    hp, wp = h // 2, w // 2
    s_out_n = s_n // 4
    s_in = lax.broadcasted_iota(jnp.int32, (s_n, s_out_n), 0)
    s_out = lax.broadcasted_iota(jnp.int32, (s_n, s_out_n), 1)
    img = s_out >> _ilog2(hp * wp)
    rem = s_out & (hp * wp - 1)
    yp = rem >> _ilog2(wp)
    xp = rem & (wp - 1)
    src = (img << _ilog2(h * w)) + (yp << (_ilog2(w) + 1)) + (xp << 1)
    sel = jnp.where(s_in == src, 1.0, 0.0)          # 0/1 anchor-gather matrix
    return jnp.dot(m, sel, preferred_element_type=jnp.float32)


def _upsample2(a, h, w):
    """Nearest-neighbour 2x upsample on a (C, N*h*w) block -> (C, 4*N*h*w)."""
    _, s_n = a.shape
    ho, wo = 2 * h, 2 * w
    s_out_n = s_n * 4
    s_in = lax.broadcasted_iota(jnp.int32, (s_n, s_out_n), 0)
    s_out = lax.broadcasted_iota(jnp.int32, (s_n, s_out_n), 1)
    img = s_out >> _ilog2(ho * wo)
    rem = s_out & (ho * wo - 1)
    yo = rem >> _ilog2(wo)
    xo = rem & (wo - 1)
    src = (img << _ilog2(h * w)) + ((yo >> 1) << _ilog2(w)) + (xo >> 1)
    sel = jnp.where(s_in == src, 1.0, 0.0)          # 0/1 expansion matrix
    return jnp.dot(a, sel, preferred_element_type=jnp.float32)


# ----------------------------------------------------------------------------
# The fused kernel: whole CAESimpleConv forward, VMEM-resident
# ----------------------------------------------------------------------------
def _cae_kernel(x_ref,
                w1_ref, b1_ref, w2_ref, b2_ref, w3_ref, b3_ref,
                w4_ref, b4_ref, w5_ref, b5_ref, w6_ref, b6_ref,
                z_ref, lat_ref, *, h, w):
    a = x_ref[...]                                                         # (1, N*h*w)
    a = _conv(a, w1_ref[...], b1_ref[...], h, w, k=3, relu=True)           # enblock1
    a = _maxpool2(a, h, w)
    a = _conv(a, w2_ref[...], b2_ref[...], h // 2, w // 2, k=3, relu=True)  # enblock2
    a = _maxpool2(a, h // 2, w // 2)
    lat = _conv(a, w3_ref[...], b3_ref[...], h // 4, w // 4, k=3, relu=True)  # center
    lat_ref[...] = lat

    z = _upsample2(lat, h // 4, w // 4)
    z = _conv(z, w4_ref[...], b4_ref[...], h // 2, w // 2, k=3, relu=True)  # deblock1
    z = _upsample2(z, h // 2, w // 2)
    z = _conv(z, w5_ref[...], b5_ref[...], h, w, k=3, relu=True)            # deblock2
    z = _conv(z, w6_ref[...], b6_ref[...], h, w, k=1, relu=False)           # outc
    z_ref[...] = z                                                          # lane-dense (1, N*h*w)


# ----------------------------------------------------------------------------
# Host-side wrapper
# ----------------------------------------------------------------------------
def _flatten_conv(w, b):
    k, _, ci, co = w.shape
    # (K,K,Cin,Cout) -> (Cout, K*K*Cin), ordered to match the in-kernel tap stacking.
    return w.transpose(3, 0, 1, 2).reshape(co, k * k * ci), b.reshape(co, 1)


@jax.jit
def cae_simple_conv(params, x_nchw):
    """CAESimpleConv.forward: (N,1,H,W) NCHW -> (z (N,1,H,W), latent (N,32,H/4,W/4))."""
    n, cin, h, w = x_nchw.shape
    assert cin == 1 and h % 4 == 0 and w % 4 == 0
    assert (h & (h - 1)) == 0 and (w & (w - 1)) == 0, "H, W must be powers of two"
    s0 = n * h * w
    x_flat = x_nchw.transpose(1, 0, 2, 3).reshape(cin, s0)   # channel-major (C, N*H*W)

    flat = []
    for name in ("enblock1", "enblock2", "center", "deblock1", "deblock2", "outc"):
        flat += list(_flatten_conv(*params[name]))

    c_lat = params["center"][0].shape[-1]
    s_lat = n * (h // 4) * (w // 4)
    vmem = pl.BlockSpec(memory_space=pltpu.MemorySpace.VMEM)

    z_flat, lat_flat = pl.pallas_call(
        partial(_cae_kernel, h=h, w=w),
        out_shape=(jax.ShapeDtypeStruct((1, s0), jnp.float32),
                   jax.ShapeDtypeStruct((c_lat, s_lat), jnp.float32)),
        in_specs=[vmem] * (1 + len(flat)),
        out_specs=(vmem, vmem),
    )(x_flat, *flat)

    z = z_flat.reshape(1, n, h, w).transpose(1, 0, 2, 3)
    latent = lat_flat.reshape(c_lat, n, h // 4, w // 4).transpose(1, 0, 2, 3)
    return z, latent


# ----------------------------------------------------------------------------
# Parameters (deterministic, synthetic)
# ----------------------------------------------------------------------------
def conv_params(key, k, cin, cout):
    kw, kb = jax.random.split(key)
    fan_in = k * k * cin
    w = jax.random.normal(kw, (k, k, cin, cout), jnp.float32) * (2.0 / fan_in) ** 0.5
    b = jax.random.normal(kb, (cout,), jnp.float32) * 0.01
    return w, b


def init_params(key):
    keys = jax.random.split(key, 6)
    return {
        "enblock1": conv_params(keys[0], 3, 1, 8),
        "enblock2": conv_params(keys[1], 3, 8, 16),
        "center":   conv_params(keys[2], 3, 16, 32),
        "deblock1": conv_params(keys[3], 3, 32, 16),
        "deblock2": conv_params(keys[4], 3, 16, 8),
        "outc":     conv_params(keys[5], 1, 8, 1),
    }


# ----------------------------------------------------------------------------
# Pure-JAX reference (for correctness check of the fused kernel)
# ----------------------------------------------------------------------------
def _conv_ref(x, w, b, *, relu):
    k = w.shape[0]
    pad = (k - 1) // 2
    y = lax.conv_general_dilated(
        x, w, window_strides=(1, 1), padding=[(pad, pad), (pad, pad)],
        dimension_numbers=("NHWC", "HWIO", "NHWC")) + b
    return jnp.maximum(y, 0.0) if relu else y


def _maxpool2_ref(x):
    n, h, w, c = x.shape
    return jnp.max(x.reshape(n, h // 2, 2, w // 2, 2, c), axis=(2, 4))


def _upsample2_ref(x):
    return jnp.repeat(jnp.repeat(x, 2, axis=1), 2, axis=2)


def cae_ref(params, x_nchw):
    x = jnp.transpose(x_nchw, (0, 2, 3, 1))
    x = _conv_ref(x, *params["enblock1"], relu=True)
    x = _conv_ref(_maxpool2_ref(x), *params["enblock2"], relu=True)
    latent = _conv_ref(_maxpool2_ref(x), *params["center"], relu=True)
    z = _conv_ref(_upsample2_ref(latent), *params["deblock1"], relu=True)
    z = _conv_ref(_upsample2_ref(z), *params["deblock2"], relu=True)
    z = _conv_ref(z, *params["outc"], relu=False)
    return jnp.transpose(z, (0, 3, 1, 2)), jnp.transpose(latent, (0, 3, 1, 2))


if __name__ == "__main__":
    x = jax.random.normal(jax.random.PRNGKey(0), (2, 1, 16, 16), jnp.float32)  # NCHW
    params = init_params(jax.random.PRNGKey(1))

    z, latent = cae_simple_conv(params, x)
    jax.block_until_ready((z, latent))

    assert z.shape == (2, 1, 16, 16), z.shape
    assert latent.shape == (2, 32, 4, 4), latent.shape

    z_ref, latent_ref = cae_ref(params, x)
    assert jnp.allclose(z, z_ref, atol=1e-3, rtol=1e-3), \
        float(jnp.max(jnp.abs(z - z_ref)))
    assert jnp.allclose(latent, latent_ref, atol=1e-3, rtol=1e-3), \
        float(jnp.max(jnp.abs(latent - latent_ref)))

    print("KERNEL_OK")
</pallas_src>

<mosaic_0001>
module attributes {stable_mosaic.version = 11 : i64} {
  func.func @_cae_kernel(%arg0: memref<1x512xf32, #tpu.memory_space<vmem>>, %arg1: memref<8x9xf32, #tpu.memory_space<vmem>>, %arg2: memref<8x1xf32, #tpu.memory_space<vmem>>, %arg3: memref<16x72xf32, #tpu.memory_space<vmem>>, %arg4: memref<16x1xf32, #tpu.memory_space<vmem>>, %arg5: memref<32x144xf32, #tpu.memory_space<vmem>>, %arg6: memref<32x1xf32, #tpu.memory_space<vmem>>, %arg7: memref<16x288xf32, #tpu.memory_space<vmem>>, %arg8: memref<16x1xf32, #tpu.memory_space<vmem>>, %arg9: memref<8x144xf32, #tpu.memory_space<vmem>>, %arg10: memref<8x1xf32, #tpu.memory_space<vmem>>, %arg11: memref<1x8xf32, #tpu.memory_space<vmem>>, %arg12: memref<1x1xf32, #tpu.memory_space<vmem>>, %arg13: memref<1x512xf32, #tpu.memory_space<vmem>>, %arg14: memref<32x32xf32, #tpu.memory_space<vmem>>) attributes {dimension_semantics = [], scalar_prefetch = 0 : i64, scratch_operands = 0 : i64, tpu.core_type = #tpu.core_type<tc>} {
    %c0 = arith.constant 0 : index
    %c0_0 = arith.constant 0 : index
    %0 = vector.load %arg0[%c0, %c0_0] : memref<1x512xf32, #tpu.memory_space<vmem>>, vector<1x512xf32>
    %c0_1 = arith.constant 0 : index
    %c0_2 = arith.constant 0 : index
    %1 = vector.load %arg1[%c0_1, %c0_2] : memref<8x9xf32, #tpu.memory_space<vmem>>, vector<8x9xf32>
    %c0_3 = arith.constant 0 : index
    %c0_4 = arith.constant 0 : index
    %2 = vector.load %arg2[%c0_3, %c0_4] : memref<8x1xf32, #tpu.memory_space<vmem>>, vector<8x1xf32>
    %3 = tpu.iota {dimensions = array<i32: 1>} : vector<1x512xi32>
    %c15_i32 = arith.constant 15 : i32
    %4 = vector.broadcast %c15_i32 : i32 to vector<1x512xi32>
    %5 = arith.andi %3, %4 : vector<1x512xi32>
    %c4_i32 = arith.constant 4 : i32
    %6 = vector.broadcast %c4_i32 : i32 to vector<1x512xi32>
    %7 = arith.shrsi %3, %6 : vector<1x512xi32>
    %c15_i32_5 = arith.constant 15 : i32
    %8 = vector.broadcast %c15_i32_5 : i32 to vector<1x512xi32>
    %9 = arith.andi %7, %8 : vector<1x512xi32>
    %c17_i32 = arith.constant 17 : i32
    %10 = tpu.dynamic_rotate %0 by %c17_i32 dim 1 : vector<1x512xf32>, i32 -> vector<1x512xf32>
    %c1_i32 = arith.constant 1 : i32
    %11 = vector.broadcast %c1_i32 : i32 to vector<1x512xi32>
    %12 = arith.cmpi sge, %5, %11 : vector<1x512xi32>
    %c1_i32_6 = arith.constant 1 : i32
    %13 = vector.broadcast %c1_i32_6 : i32 to vector<1x512xi32>
    %14 = arith.cmpi sge, %9, %13 : vector<1x512xi32>
    %15 = arith.andi %12, %14 : vector<1x512xi1>
    %cst = arith.constant 0.000000e+00 : f32
    %16 = vector.broadcast %cst : f32 to vector<1x512xf32>
    %17 = arith.select %15, %10, %16 : vector<1x512xi1>, vector<1x512xf32>
    %c16_i32 = arith.constant 16 : i32
    %18 = tpu.dynamic_rotate %0 by %c16_i32 dim 1 : vector<1x512xf32>, i32 -> vector<1x512xf32>
    %c1_i32_7 = arith.constant 1 : i32
    %19 = vector.broadcast %c1_i32_7 : i32 to vector<1x512xi32>
    %20 = arith.cmpi sge, %9, %19 : vector<1x512xi32>
    %cst_8 = arith.constant 0.000000e+00 : f32
    %21 = vector.broadcast %cst_8 : f32 to vector<1x512xf32>
    %22 = arith.select %20, %18, %21 : vector<1x512xi1>, vector<1x512xf32>
    %c15_i32_9 = arith.constant 15 : i32
    %23 = tpu.dynamic_rotate %0 by %c15_i32_9 dim 1 : vector<1x512xf32>, i32 -> vector<1x512xf32>
    %c15_i32_10 = arith.constant 15 : i32
    %24 = vector.broadcast %c15_i32_10 : i32 to vector<1x512xi32>
    %25 = arith.cmpi slt, %5, %24 : vector<1x512xi32>
    %c1_i32_11 = arith.constant 1 : i32
    %26 = vector.broadcast %c1_i32_11 : i32 to vector<1x512xi32>
    %27 = arith.cmpi sge, %9, %26 : vector<1x512xi32>
    %28 = arith.andi %25, %27 : vector<1x512xi1>
    %cst_12 = arith.constant 0.000000e+00 : f32
    %29 = vector.broadcast %cst_12 : f32 to vector<1x512xf32>
    %30 = arith.select %28, %23, %29 : vector<1x512xi1>, vector<1x512xf32>
    %c1_i32_13 = arith.constant 1 : i32
    %31 = tpu.dynamic_rotate %0 by %c1_i32_13 dim 1 : vector<1x512xf32>, i32 -> vector<1x512xf32>
    %c1_i32_14 = arith.constant 1 : i32
    %32 = vector.broadcast %c1_i32_14 : i32 to vector<1x512xi32>
    %33 = arith.cmpi sge, %5, %32 : vector<1x512xi32>
    %cst_15 = arith.constant 0.000000e+00 : f32
    %34 = vector.broadcast %cst_15 : f32 to vector<1x512xf32>
    %35 = arith.select %33, %31, %34 : vector<1x512xi1>, vector<1x512xf32>
    %c511_i32 = arith.constant 511 : i32
    %36 = tpu.dynamic_rotate %0 by %c511_i32 dim 1 : vector<1x512xf32>, i32 -> vector<1x512xf32>
    %c15_i32_16 = arith.constant 15 : i32
    %37 = vector.broadcast %c15_i32_16 : i32 to vector<1x512xi32>
    %38 = arith.cmpi slt, %5, %37 : vector<1x512xi32>
    %cst_17 = arith.constant 0.000000e+00 : f32
    %39 = vector.broadcast %cst_17 : f32 to vector<1x512xf32>
    %40 = arith.select %38, %36, %39 : vector<1x512xi1>, vector<1x512xf32>
    %c497_i32 = arith.constant 497 : i32
    %41 = tpu.dynamic_rotate %0 by %c497_i32 dim 1 : vector<1x512xf32>, i32 -> vector<1x512xf32>
    %c1_i32_18 = arith.constant 1 : i32
    %42 = vector.broadcast %c1_i32_18 : i32 to vector<1x512xi32>
    %43 = arith.cmpi sge, %5, %42 : vector<1x512xi32>
    %c15_i32_19 = arith.constant 15 : i32
    %44 = vector.broadcast %c15_i32_19 : i32 to vector<1x512xi32>
    %45 = arith.cmpi slt, %9, %44 : vector<1x512xi32>
    %46 = arith.andi %43, %45 : vector<1x512xi1>
    %cst_20 = arith.constant 0.000000e+00 : f32
    %47 = vector.broadcast %cst_20 : f32 to vector<1x512xf32>
    %48 = arith.select %46, %41, %47 : vector<1x512xi1>, vector<1x512xf32>
    %c496_i32 = arith.constant 496 : i32
    %49 = tpu.dynamic_rotate %0 by %c496_i32 dim 1 : vector<1x512xf32>, i32 -> vector<1x512xf32>
    %c15_i32_21 = arith.constant 15 : i32
    %50 = vector.broadcast %c15_i32_21 : i32 to vector<1x512xi32>
    %51 = arith.cmpi slt, %9, %50 : vector<1x512xi32>
    %cst_22 = arith.constant 0.000000e+00 : f32
    %52 = vector.broadcast %cst_22 : f32 to vector<1x512xf32>
    %53 = arith.select %51, %49, %52 : vector<1x512xi1>, vector<1x512xf32>
    %c495_i32 = arith.constant 495 : i32
    %54 = tpu.dynamic_rotate %0 by %c495_i32 dim 1 : vector<1x512xf32>, i32 -> vector<1x512xf32>
    %c15_i32_23 = arith.constant 15 : i32
    %55 = vector.broadcast %c15_i32_23 : i32 to vector<1x512xi32>
    %56 = arith.cmpi slt, %5, %55 : vector<1x512xi32>
    %c15_i32_24 = arith.constant 15 : i32
    %57 = vector.broadcast %c15_i32_24 : i32 to vector<1x512xi32>
    %58 = arith.cmpi slt, %9, %57 : vector<1x512xi32>
    %59 = arith.andi %56, %58 : vector<1x512xi1>
    %cst_25 = arith.constant 0.000000e+00 : f32
    %60 = vector.broadcast %cst_25 : f32 to vector<1x512xf32>
    %61 = arith.select %59, %54, %60 : vector<1x512xi1>, vector<1x512xf32>
    %62 = tpu.concatenate %17, %22, %30, %35, %0, %40, %48, %53, %61 in 0 : vector<1x512xf32>, vector<1x512xf32>, vector<1x512xf32>, vector<1x512xf32>, vector<1x512xf32>, vector<1x512xf32>, vector<1x512xf32>, vector<1x512xf32>, vector<1x512xf32> -> vector<9x512xf32>
    %cst_26 = arith.constant dense<0.000000e+00> : vector<8x512xf32>
    %63 = tpu.matmul %1, %62, %cst_26 {dimension_numbers = #tpu.dot_dimension_numbers<[1], [0], [0], [1], [0, 0, 1, 1], [], []>} : vector<8x9xf32>, vector<9x512xf32>, vector<8x512xf32> -> vector<8x512xf32>
    %64 = vector.broadcast %2 : vector<8x1xf32> to vector<8x512xf32>
    %65 = arith.addf %63, %64 : vector<8x512xf32>
    %cst_27 = arith.constant 0.000000e+00 : f32
    %66 = vector.broadcast %cst_27 : f32 to vector<8x512xf32>
    %67 = arith.maximumf %65, %66 : vector<8x512xf32>
    %c511_i32_28 = arith.constant 511 : i32
    %68 = tpu.dynamic_rotate %67 by %c511_i32_28 dim 1 : vector<8x512xf32>, i32 -> vector<8x512xf32>
    %69 = arith.maximumf %67, %68 : vector<8x512xf32>
    %c496_i32_29 = arith.constant 496 : i32
    %70 = tpu.dynamic_rotate %67 by %c496_i32_29 dim 1 : vector<8x512xf32>, i32 -> vector<8x512xf32>
    %c495_i32_30 = arith.constant 495 : i32
    %71 = tpu.dynamic_rotate %67 by %c495_i32_30 dim 1 : vector<8x512xf32>, i32 -> vector<8x512xf32>
    %72 = arith.maximumf %70, %71 : vector<8x512xf32>
    %73 = arith.maximumf %69, %72 : vector<8x512xf32>
    %74 = tpu.iota {dimensions = array<i32: 0>} : vector<512x128xi32>
    %75 = tpu.iota {dimensions = array<i32: 1>} : vector<512x128xi32>
    %c6_i32 = arith.constant 6 : i32
    %76 = vector.broadcast %c6_i32 : i32 to vector<512x128xi32>
    %77 = arith.shrsi %75, %76 : vector<512x128xi32>
    %c63_i32 = arith.constant 63 : i32
    %78 = vector.broadcast %c63_i32 : i32 to vector<512x128xi32>
    %79 = arith.andi %75, %78 : vector<512x128xi32>
    %c3_i32 = arith.constant 3 : i32
    %80 = vector.broadcast %c3_i32 : i32 to vector<512x128xi32>
    %81 = arith.shrsi %79, %80 : vector<512x128xi32>
    %c7_i32 = arith.constant 7 : i32
    %82 = vector.broadcast %c7_i32 : i32 to vector<512x128xi32>
    %83 = arith.andi %79, %82 : vector<512x128xi32>
    %c8_i32 = arith.constant 8 : i32
    %84 = vector.broadcast %c8_i32 : i32 to vector<512x128xi32>
    %85 = arith.shli %77, %84 : vector<512x128xi32>
    %c5_i32 = arith.constant 5 : i32
    %86 = vector.broadcast %c5_i32 : i32 to vector<512x128xi32>
    %87 = arith.shli %81, %86 : vector<512x128xi32>
    %88 = arith.addi %85, %87 : vector<512x128xi32>
    %c1_i32_31 = arith.constant 1 : i32
    %89 = vector.broadcast %c1_i32_31 : i32 to vector<512x128xi32>
    %90 = arith.shli %83, %89 : vector<512x128xi32>
    %91 = arith.addi %88, %90 : vector<512x128xi32>
    %92 = arith.cmpi eq, %74, %91 : vector<512x128xi32>
    %cst_32 = arith.constant 1.000000e+00 : f32
    %cst_33 = arith.constant 0.000000e+00 : f32
    %93 = vector.broadcast %cst_32 : f32 to vector<512x128xf32>
    %94 = vector.broadcast %cst_33 : f32 to vector<512x128xf32>
    %95 = arith.select %92, %93, %94 : vector<512x128xi1>, vector<512x128xf32>
    %cst_34 = arith.constant dense<0.000000e+00> : vector<8x128xf32>
    %96 = tpu.matmul %73, %95, %cst_34 {dimension_numbers = #tpu.dot_dimension_numbers<[1], [0], [0], [1], [0, 0, 1, 1], [], []>} : vector<8x512xf32>, vector<512x128xf32>, vector<8x128xf32> -> vector<8x128xf32>
    %c0_35 = arith.constant 0 : index
    %c0_36 = arith.constant 0 : index
    %97 = vector.load %arg3[%c0_35, %c0_36] : memref<16x72xf32, #tpu.memory_space<vmem>>, vector<16x72xf32>
    %c0_37 = arith.constant 0 : index
    %c0_38 = arith.constant 0 : index
    %98 = vector.load %arg4[%c0_37, %c0_38] : memref<16x1xf32, #tpu.memory_space<vmem>>, vector<16x1xf32>
    %99 = tpu.iota {dimensions = array<i32: 1>} : vector<8x128xi32>
    %c7_i32_39 = arith.constant 7 : i32
    %100 = vector.broadcast %c7_i32_39 : i32 to vector<8x128xi32>
    %101 = arith.andi %99, %100 : vector<8x128xi32>
    %c3_i32_40 = arith.constant 3 : i32
    %102 = vector.broadcast %c3_i32_40 : i32 to vector<8x128xi32>
    %103 = arith.shrsi %99, %102 : vector<8x128xi32>
    %c7_i32_41 = arith.constant 7 : i32
    %104 = vector.broadcast %c7_i32_41 : i32 to vector<8x128xi32>
    %105 = arith.andi %103, %104 : vector<8x128xi32>
    %c9_i32 = arith.constant 9 : i32
    %106 = tpu.dynamic_rotate %96 by %c9_i32 dim 1 : vector<8x128xf32>, i32 -> vector<8x128xf32>
    %c1_i32_42 = arith.constant 1 : i32
    %107 = vector.broadcast %c1_i32_42 : i32 to vector<8x128xi32>
    %108 = arith.cmpi sge, %101, %107 : vector<8x128xi32>
    %c1_i32_43 = arith.constant 1 : i32
    %109 = vector.broadcast %c1_i32_43 : i32 to vector<8x128xi32>
    %110 = arith.cmpi sge, %105, %109 : vector<8x128xi32>
    %111 = arith.andi %108, %110 : vector<8x128xi1>
    %cst_44 = arith.constant 0.000000e+00 : f32
    %112 = vector.broadcast %cst_44 : f32 to vector<8x128xf32>
    %113 = arith.select %111, %106, %112 : vector<8x128xi1>, vector<8x128xf32>
    %c8_i32_45 = arith.constant 8 : i32
    %114 = tpu.dynamic_rotate %96 by %c8_i32_45 dim 1 : vector<8x128xf32>, i32 -> vector<8x128xf32>
    %c1_i32_46 = arith.constant 1 : i32
    %115 = vector.broadcast %c1_i32_46 : i32 to vector<8x128xi32>
    %116 = arith.cmpi sge, %105, %115 : vector<8x128xi32>
    %cst_47 = arith.constant 0.000000e+00 : f32
    %117 = vector.broadcast %cst_47 : f32 to vector<8x128xf32>
    %118 = arith.select %116, %114, %117 : vector<8x128xi1>, vector<8x128xf32>
    %c7_i32_48 = arith.constant 7 : i32
    %119 = tpu.dynamic_rotate %96 by %c7_i32_48 dim 1 : vector<8x128xf32>, i32 -> vector<8x128xf32>
    %c7_i32_49 = arith.constant 7 : i32
    %120 = vector.broadcast %c7_i32_49 : i32 to vector<8x128xi32>
    %121 = arith.cmpi slt, %101, %120 : vector<8x128xi32>
    %c1_i32_50 = arith.constant 1 : i32
    %122 = vector.broadcast %c1_i32_50 : i32 to vector<8x128xi32>
    %123 = arith.cmpi sge, %105, %122 : vector<8x128xi32>
    %124 = arith.andi %121, %123 : vector<8x128xi1>
    %cst_51 = arith.constant 0.000000e+00 : f32
    %125 = vector.broadcast %cst_51 : f32 to vector<8x128xf32>
    %126 = arith.select %124, %119, %125 : vector<8x128xi1>, vector<8x128xf32>
    %c1_i32_52 = arith.constant 1 : i32
    %127 = tpu.dynamic_rotate %96 by %c1_i32_52 dim 1 : vector<8x128xf32>, i32 -> vector<8x128xf32>
    %c1_i32_53 = arith.constant 1 : i32
    %128 = vector.broadcast %c1_i32_53 : i32 to vector<8x128xi32>
    %129 = arith.cmpi sge, %101, %128 : vector<8x128xi32>
    %cst_54 = arith.constant 0.000000e+00 : f32
    %130 = vector.broadcast %cst_54 : f32 to vector<8x128xf32>
    %131 = arith.select %129, %127, %130 : vector<8x128xi1>, vector<8x128xf32>
    %c127_i32 = arith.constant 127 : i32
    %132 = tpu.dynamic_rotate %96 by %c127_i32 dim 1 : vector<8x128xf32>, i32 -> vector<8x128xf32>
    %c7_i32_55 = arith.constant 7 : i32
    %133 = vector.broadcast %c7_i32_55 : i32 to vector<8x128xi32>
    %134 = arith.cmpi slt, %101, %133 : vector<8x128xi32>
    %cst_56 = arith.constant 0.000000e+00 : f32
    %135 = vector.broadcast %cst_56 : f32 to vector<8x128xf32>
    %136 = arith.select %134, %132, %135 : vector<8x128xi1>, vector<8x128xf32>
    %c121_i32 = arith.constant 121 : i32
    %137 = tpu.dynamic_rotate %96 by %c121_i32 dim 1 : vector<8x128xf32>, i32 -> vector<8x128xf32>
    %c1_i32_57 = arith.constant 1 : i32
    %138 = vector.broadcast %c1_i32_57 : i32 to vector<8x128xi32>
    %139 = arith.cmpi sge, %101, %138 : vector<8x128xi32>
    %c7_i32_58 = arith.constant 7 : i32
    %140 = vector.broadcast %c7_i32_58 : i32 to vector<8x128xi32>
    %141 = arith.cmpi slt, %105, %140 : vector<8x128xi32>
    %142 = arith.andi %139, %141 : vector<8x128xi1>
    %cst_59 = arith.constant 0.000000e+00 : f32
    %143 = vector.broadcast %cst_59 : f32 to vector<8x128xf32>
    %144 = arith.select %142, %137, %143 : vector<8x128xi1>, vector<8x128xf32>
    %c120_i32 = arith.constant 120 : i32
    %145 = tpu.dynamic_rotate %96 by %c120_i32 dim 1 : vector<8x128xf32>, i32 -> vector<8x128xf32>
    %c7_i32_60 = arith.constant 7 : i32
    %146 = vector.broadcast %c7_i32_60 : i32 to vector<8x128xi32>
    %147 = arith.cmpi slt, %105, %146 : vector<8x128xi32>
    %cst_61 = arith.constant 0.000000e+00 : f32
    %148 = vector.broadcast %cst_61 : f32 to vector<8x128xf32>
    %149 = arith.select %147, %145, %148 : vector<8x128xi1>, vector<8x128xf32>
    %c119_i32 = arith.constant 119 : i32
    %150 = tpu.dynamic_rotate %96 by %c119_i32 dim 1 : vector<8x128xf32>, i32 -> vector<8x128xf32>
    %c7_i32_62 = arith.constant 7 : i32
    %151 = vector.broadcast %c7_i32_62 : i32 to vector<8x128xi32>
    %152 = arith.cmpi slt, %101, %151 : vector<8x128xi32>
    %c7_i32_63 = arith.constant 7 : i32
    %153 = vector.broadcast %c7_i32_63 : i32 to vector<8x128xi32>
    %154 = arith.cmpi slt, %105, %153 : vector<8x128xi32>
    %155 = arith.andi %152, %154 : vector<8x128xi1>
    %cst_64 = arith.constant 0.000000e+00 : f32
    %156 = vector.broadcast %cst_64 : f32 to vector<8x128xf32>
    %157 = arith.select %155, %150, %156 : vector<8x128xi1>, vector<8x128xf32>
    %158 = tpu.concatenate %113, %118, %126, %131, %96, %136, %144, %149, %157 in 0 : vector<8x128xf32>, vector<8x128xf32>, vector<8x128xf32>, vector<8x128xf32>, vector<8x128xf32>, vector<8x128xf32>, vector<8x128xf32>, vector<8x128xf32>, vector<8x128xf32> -> vector<72x128xf32>
    %cst_65 = arith.constant dense<0.000000e+00> : vector<16x128xf32>
    %159 = tpu.matmul %97, %158, %cst_65 {dimension_numbers = #tpu.dot_dimension_numbers<[1], [0], [0], [1], [0, 0, 1, 1], [], []>} : vector<16x72xf32>, vector<72x128xf32>, vector<16x128xf32> -> vector<16x128xf32>
    %160 = vector.broadcast %98 : vector<16x1xf32> to vector<16x128xf32>
    %161 = arith.addf %159, %160 : vector<16x128xf32>
    %cst_66 = arith.constant 0.000000e+00 : f32
    %162 = vector.broadcast %cst_66 : f32 to vector<16x128xf32>
    %163 = arith.maximumf %161, %162 : vector<16x128xf32>
    %c127_i32_67 = arith.constant 127 : i32
    %164 = tpu.dynamic_rotate %163 by %c127_i32_67 dim 1 : vector<16x128xf32>, i32 -> vector<16x128xf32>
    %165 = arith.maximumf %163, %164 : vector<16x128xf32>
    %c120_i32_68 = arith.constant 120 : i32
    %166 = tpu.dynamic_rotate %163 by %c120_i32_68 dim 1 : vector<16x128xf32>, i32 -> vector<16x128xf32>
    %c119_i32_69 = arith.constant 119 : i32
    %167 = tpu.dynamic_rotate %163 by %c119_i32_69 dim 1 : vector<16x128xf32>, i32 -> vector<16x128xf32>
    %168 = arith.maximumf %166, %167 : vector<16x128xf32>
    %169 = arith.maximumf %165, %168 : vector<16x128xf32>
    %170 = tpu.iota {dimensions = array<i32: 0>} : vector<128x32xi32>
    %171 = tpu.iota {dimensions = array<i32: 1>} : vector<128x32xi32>
    %c4_i32_70 = arith.constant 4 : i32
    %172 = vector.broadcast %c4_i32_70 : i32 to vector<128x32xi32>
    %173 = arith.shrsi %171, %172 : vector<128x32xi32>
    %c15_i32_71 = arith.constant 15 : i32
    %174 = vector.broadcast %c15_i32_71 : i32 to vector<128x32xi32>
    %175 = arith.andi %171, %174 : vector<128x32xi32>
    %c2_i32 = arith.constant 2 : i32
    %176 = vector.broadcast %c2_i32 : i32 to vector<128x32xi32>
    %177 = arith.shrsi %175, %176 : vector<128x32xi32>
    %c3_i32_72 = arith.constant 3 : i32
    %178 = vector.broadcast %c3_i32_72 : i32 to vector<128x32xi32>
    %179 = arith.andi %175, %178 : vector<128x32xi32>
    %c6_i32_73 = arith.constant 6 : i32
    %180 = vector.broadcast %c6_i32_73 : i32 to vector<128x32xi32>
    %181 = arith.shli %173, %180 : vector<128x32xi32>
    %c4_i32_74 = arith.constant 4 : i32
    %182 = vector.broadcast %c4_i32_74 : i32 to vector<128x32xi32>
    %183 = arith.shli %177, %182 : vector<128x32xi32>
    %184 = arith.addi %181, %183 : vector<128x32xi32>
    %c1_i32_75 = arith.constant 1 : i32
    %185 = vector.broadcast %c1_i32_75 : i32 to vector<128x32xi32>
    %186 = arith.shli %179, %185 : vector<128x32xi32>
    %187 = arith.addi %184, %186 : vector<128x32xi32>
    %188 = arith.cmpi eq, %170, %187 : vector<128x32xi32>
    %cst_76 = arith.constant 1.000000e+00 : f32
    %cst_77 = arith.constant 0.000000e+00 : f32
    %189 = vector.broadcast %cst_76 : f32 to vector<128x32xf32>
    %190 = vector.broadcast %cst_77 : f32 to vector<128x32xf32>
    %191 = arith.select %188, %189, %190 : vector<128x32xi1>, vector<128x32xf32>
    %cst_78 = arith.constant dense<0.000000e+00> : vector<16x32xf32>
    %192 = tpu.matmul %169, %191, %cst_78 {dimension_numbers = #tpu.dot_dimension_numbers<[1], [0], [0], [1], [0, 0, 1, 1], [], []>} : vector<16x128xf32>, vector<128x32xf32>, vector<16x32xf32> -> vector<16x32xf32>
    %c0_79 = arith.constant 0 : index
    %c0_80 = arith.constant 0 : index
    %193 = vector.load %arg5[%c0_79, %c0_80] : memref<32x144xf32, #tpu.memory_space<vmem>>, vector<32x144xf32>
    %c0_81 = arith.constant 0 : index
    %c0_82 = arith.constant 0 : index
    %194 = vector.load %arg6[%c0_81, %c0_82] : memref<32x1xf32, #tpu.memory_space<vmem>>, vector<32x1xf32>
    %195 = tpu.iota {dimensions = array<i32: 1>} : vector<16x32xi32>
    %c3_i32_83 = arith.constant 3 : i32
    %196 = vector.broadcast %c3_i32_83 : i32 to vector<16x32xi32>
    %197 = arith.andi %195, %196 : vector<16x32xi32>
    %c2_i32_84 = arith.constant 2 : i32
    %198 = vector.broadcast %c2_i32_84 : i32 to vector<16x32xi32>
    %199 = arith.shrsi %195, %198 : vector<16x32xi32>
    %c3_i32_85 = arith.constant 3 : i32
    %200 = vector.broadcast %c3_i32_85 : i32 to vector<16x32xi32>
    %201 = arith.andi %199, %200 : vector<16x32xi32>
    %202 = tpu.iota {dimensions = array<i32: 0>} : vector<32x32xi32>
    %203 = tpu.iota {dimensions = array<i32: 1>} : vector<32x32xi32>
    %c-5_i32 = arith.constant -5 : i32
    %204 = vector.broadcast %c-5_i32 : i32 to vector<32x32xi32>
    %205 = arith.addi %203, %204 : vector<32x32xi32>
    %206 = arith.cmpi eq, %202, %205 : vector<32x32xi32>
    %cst_86 = arith.constant 1.000000e+00 : f32
    %cst_87 = arith.constant 0.000000e+00 : f32
    %207 = vector.broadcast %cst_86 : f32 to vector<32x32xf32>
    %208 = vector.broadcast %cst_87 : f32 to vector<32x32xf32>
    %209 = arith.select %206, %207, %208 : vector<32x32xi1>, vector<32x32xf32>
    %cst_88 = arith.constant dense<0.000000e+00> : vector<16x32xf32>
    %210 = tpu.matmul %192, %209, %cst_88 {dimension_numbers = #tpu.dot_dimension_numbers<[1], [0], [0], [1], [0, 0, 1, 1], [], []>} : vector<16x32xf32>, vector<32x32xf32>, vector<16x32xf32> -> vector<16x32xf32>
    %c1_i32_89 = arith.constant 1 : i32
    %211 = vector.broadcast %c1_i32_89 : i32 to vector<16x32xi32>
    %212 = arith.cmpi sge, %197, %211 : vector<16x32xi32>
    %c1_i32_90 = arith.constant 1 : i32
    %213 = vector.broadcast %c1_i32_90 : i32 to vector<16x32xi32>
    %214 = arith.cmpi sge, %201, %213 : vector<16x32xi32>
    %215 = arith.andi %212, %214 : vector<16x32xi1>
    %cst_91 = arith.constant 0.000000e+00 : f32
    %216 = vector.broadcast %cst_91 : f32 to vector<16x32xf32>
    %217 = arith.select %215, %210, %216 : vector<16x32xi1>, vector<16x32xf32>
    %218 = tpu.iota {dimensions = array<i32: 0>} : vector<32x32xi32>
    %219 = tpu.iota {dimensions = array<i32: 1>} : vector<32x32xi32>
    %c-4_i32 = arith.constant -4 : i32
    %220 = vector.broadcast %c-4_i32 : i32 to vector<32x32xi32>
    %221 = arith.addi %219, %220 : vector<32x32xi32>
    %222 = arith.cmpi eq, %218, %221 : vector<32x32xi32>
    %cst_92 = arith.constant 1.000000e+00 : f32
    %cst_93 = arith.constant 0.000000e+00 : f32
    %223 = vector.broadcast %cst_92 : f32 to vector<32x32xf32>
    %224 = vector.broadcast %cst_93 : f32 to vector<32x32xf32>
    %225 = arith.select %222, %223, %224 : vector<32x32xi1>, vector<32x32xf32>
    %cst_94 = arith.constant dense<0.000000e+00> : vector<16x32xf32>
    %226 = tpu.matmul %192, %225, %cst_94 {dimension_numbers = #tpu.dot_dimension_numbers<[1], [0], [0], [1], [0, 0, 1, 1], [], []>} : vector<16x32xf32>, vector<32x32xf32>, vector<16x32xf32> -> vector<16x32xf32>
    %c1_i32_95 = arith.constant 1 : i32
    %227 = vector.broadcast %c1_i32_95 : i32 to vector<16x32xi32>
    %228 = arith.cmpi sge, %201, %227 : vector<16x32xi32>
    %cst_96 = arith.constant 0.000000e+00 : f32
    %229 = vector.broadcast %cst_96 : f32 to vector<16x32xf32>
    %230 = arith.select %228, %226, %229 : vector<16x32xi1>, vector<16x32xf32>
    %231 = tpu.iota {dimensions = array<i32: 0>} : vector<32x32xi32>
    %232 = tpu.iota {dimensions = array<i32: 1>} : vector<32x32xi32>
    %c-3_i32 = arith.constant -3 : i32
    %233 = vector.broadcast %c-3_i32 : i32 to vector<32x32xi32>
    %234 = arith.addi %232, %233 : vector<32x32xi32>
    %235 = arith.cmpi eq, %231, %234 : vector<32x32xi32>
    %cst_97 = arith.constant 1.000000e+00 : f32
    %cst_98 = arith.constant 0.000000e+00 : f32
    %236 = vector.broadcast %cst_97 : f32 to vector<32x32xf32>
    %237 = vector.broadcast %cst_98 : f32 to vector<32x32xf32>
    %238 = arith.select %235, %236, %237 : vector<32x32xi1>, vector<32x32xf32>
    %cst_99 = arith.constant dense<0.000000e+00> : vector<16x32xf32>
    %239 = tpu.matmul %192, %238, %cst_99 {dimension_numbers = #tpu.dot_dimension_numbers<[1], [0], [0], [1], [0, 0, 1, 1], [], []>} : vector<16x32xf32>, vector<32x32xf32>, vector<16x32xf32> -> vector<16x32xf32>
    %c3_i32_100 = arith.constant 3 : i32
    %240 = vector.broadcast %c3_i32_100 : i32 to vector<16x32xi32>
    %241 = arith.cmpi slt, %197, %240 : vector<16x32xi32>
    %c1_i32_101 = arith.constant 1 : i32
    %242 = vector.broadcast %c1_i32_101 : i32 to vector<16x32xi32>
    %243 = arith.cmpi sge, %201, %242 : vector<16x32xi32>
    %244 = arith.andi %241, %243 : vector<16x32xi1>
    %cst_102 = arith.constant 0.000000e+00 : f32
    %245 = vector.broadcast %cst_102 : f32 to vector<16x32xf32>
    %246 = arith.select %244, %239, %245 : vector<16x32xi1>, vector<16x32xf32>
    %247 = tpu.iota {dimensions = array<i32: 0>} : vector<32x32xi32>
    %248 = tpu.iota {dimensions = array<i32: 1>} : vector<32x32xi32>
    %c-1_i32 = arith.constant -1 : i32
    %249 = vector.broadcast %c-1_i32 : i32 to vector<32x32xi32>
    %250 = arith.addi %248, %249 : vector<32x32xi32>
    %251 = arith.cmpi eq, %247, %250 : vector<32x32xi32>
    %cst_103 = arith.constant 1.000000e+00 : f32
    %cst_104 = arith.constant 0.000000e+00 : f32
    %252 = vector.broadcast %cst_103 : f32 to vector<32x32xf32>
    %253 = vector.broadcast %cst_104 : f32 to vector<32x32xf32>
    %254 = arith.select %251, %252, %253 : vector<32x32xi1>, vector<32x32xf32>
    %cst_105 = arith.constant dense<0.000000e+00> : vector<16x32xf32>
    %255 = tpu.matmul %192, %254, %cst_105 {dimension_numbers = #tpu.dot_dimension_numbers<[1], [0], [0], [1], [0, 0, 1, 1], [], []>} : vector<16x32xf32>, vector<32x32xf32>, vector<16x32xf32> -> vector<16x32xf32>
    %c1_i32_106 = arith.constant 1 : i32
    %256 = vector.broadcast %c1_i32_106 : i32 to vector<16x32xi32>
    %257 = arith.cmpi sge, %197, %256 : vector<16x32xi32>
    %cst_107 = arith.constant 0.000000e+00 : f32
    %258 = vector.broadcast %cst_107 : f32 to vector<16x32xf32>
    %259 = arith.select %257, %255, %258 : vector<16x32xi1>, vector<16x32xf32>
    %260 = tpu.iota {dimensions = array<i32: 0>} : vector<32x32xi32>
    %261 = tpu.iota {dimensions = array<i32: 1>} : vector<32x32xi32>
    %c1_i32_108 = arith.constant 1 : i32
    %262 = vector.broadcast %c1_i32_108 : i32 to vector<32x32xi32>
    %263 = arith.addi %261, %262 : vector<32x32xi32>
    %264 = arith.cmpi eq, %260, %263 : vector<32x32xi32>
    %cst_109 = arith.constant 1.000000e+00 : f32
    %cst_110 = arith.constant 0.000000e+00 : f32
    %265 = vector.broadcast %cst_109 : f32 to vector<32x32xf32>
    %266 = vector.broadcast %cst_110 : f32 to vector<32x32xf32>
    %267 = arith.select %264, %265, %266 : vector<32x32xi1>, vector<32x32xf32>
    %cst_111 = arith.constant dense<0.000000e+00> : vector<16x32xf32>
    %268 = tpu.matmul %192, %267, %cst_111 {dimension_numbers = #tpu.dot_dimension_numbers<[1], [0], [0], [1], [0, 0, 1, 1], [], []>} : vector<16x32xf32>, vector<32x32xf32>, vector<16x32xf32> -> vector<16x32xf32>
    %c3_i32_112 = arith.constant 3 : i32
    %269 = vector.broadcast %c3_i32_112 : i32 to vector<16x32xi32>
    %270 = arith.cmpi slt, %197, %269 : vector<16x32xi32>
    %cst_113 = arith.constant 0.000000e+00 : f32
    %271 = vector.broadcast %cst_113 : f32 to vector<16x32xf32>
    %272 = arith.select %270, %268, %271 : vector<16x32xi1>, vector<16x32xf32>
    %273 = tpu.iota {dimensions = array<i32: 0>} : vector<32x32xi32>
    %274 = tpu.iota {dimensions = array<i32: 1>} : vector<32x32xi32>
    %c3_i32_114 = arith.constant 3 : i32
    %275 = vector.broadcast %c3_i32_114 : i32 to vector<32x32xi32>
    %276 = arith.addi %274, %275 : vector<32x32xi32>
    %277 = arith.cmpi eq, %273, %276 : vector<32x32xi32>
    %cst_115 = arith.constant 1.000000e+00 : f32
    %cst_116 = arith.constant 0.000000e+00 : f32
    %278 = vector.broadcast %cst_115 : f32 to vector<32x32xf32>
    %279 = vector.broadcast %cst_116 : f32 to vector<32x32xf32>
    %280 = arith.select %277, %278, %279 : vector<32x32xi1>, vector<32x32xf32>
    %cst_117 = arith.constant dense<0.000000e+00> : vector<16x32xf32>
    %281 = tpu.matmul %192, %280, %cst_117 {dimension_numbers = #tpu.dot_dimension_numbers<[1], [0], [0], [1], [0, 0, 1, 1], [], []>} : vector<16x32xf32>, vector<32x32xf32>, vector<16x32xf32> -> vector<16x32xf32>
    %c1_i32_118 = arith.constant 1 : i32
    %282 = vector.broadcast %c1_i32_118 : i32 to vector<16x32xi32>
    %283 = arith.cmpi sge, %197, %282 : vector<16x32xi32>
    %c3_i32_119 = arith.constant 3 : i32
    %284 = vector.broadcast %c3_i32_119 : i32 to vector<16x32xi32>
    %285 = arith.cmpi slt, %201, %284 : vector<16x32xi32>
    %286 = arith.andi %283, %285 : vector<16x32xi1>
    %cst_120 = arith.constant 0.000000e+00 : f32
    %287 = vector.broadcast %cst_120 : f32 to vector<16x32xf32>
    %288 = arith.select %286, %281, %287 : vector<16x32xi1>, vector<16x32xf32>
    %289 = tpu.iota {dimensions = array<i32: 0>} : vector<32x32xi32>
    %290 = tpu.iota {dimensions = array<i32: 1>} : vector<32x32xi32>
    %c4_i32_121 = arith.constant 4 : i32
    %291 = vector.broadcast %c4_i32_121 : i32 to vector<32x32xi32>
    %292 = arith.addi %290, %291 : vector<32x32xi32>
    %293 = arith.cmpi eq, %289, %292 : vector<32x32xi32>
    %cst_122 = arith.constant 1.000000e+00 : f32
    %cst_123 = arith.constant 0.000000e+00 : f32
    %294 = vector.broadcast %cst_122 : f32 to vector<32x32xf32>
    %295 = vector.broadcast %cst_123 : f32 to vector<32x32xf32>
    %296 = arith.select %293, %294, %295 : vector<32x32xi1>, vector<32x32xf32>
    %cst_124 = arith.constant dense<0.000000e+00> : vector<16x32xf32>
    %297 = tpu.matmul %192, %296, %cst_124 {dimension_numbers = #tpu.dot_dimension_numbers<[1], [0], [0], [1], [0, 0, 1, 1], [], []>} : vector<16x32xf32>, vector<32x32xf32>, vector<16x32xf32> -> vector<16x32xf32>
    %c3_i32_125 = arith.constant 3 : i32
    %298 = vector.broadcast %c3_i32_125 : i32 to vector<16x32xi32>
    %299 = arith.cmpi slt, %201, %298 : vector<16x32xi32>
    %cst_126 = arith.constant 0.000000e+00 : f32
    %300 = vector.broadcast %cst_126 : f32 to vector<16x32xf32>
    %301 = arith.select %299, %297, %300 : vector<16x32xi1>, vector<16x32xf32>
    %302 = tpu.iota {dimensions = array<i32: 0>} : vector<32x32xi32>
    %303 = tpu.iota {dimensions = array<i32: 1>} : vector<32x32xi32>
    %c5_i32_127 = arith.constant 5 : i32
    %304 = vector.broadcast %c5_i32_127 : i32 to vector<32x32xi32>
    %305 = arith.addi %303, %304 : vector<32x32xi32>
    %306 = arith.cmpi eq, %302, %305 : vector<32x32xi32>
    %cst_128 = arith.constant 1.000000e+00 : f32
    %cst_129 = arith.constant 0.000000e+00 : f32
    %307 = vector.broadcast %cst_128 : f32 to vector<32x32xf32>
    %308 = vector.broadcast %cst_129 : f32 to vector<32x32xf32>
    %309 = arith.select %306, %307, %308 : vector<32x32xi1>, vector<32x32xf32>
    %cst_130 = arith.constant dense<0.000000e+00> : vector<16x32xf32>
    %310 = tpu.matmul %192, %309, %cst_130 {dimension_numbers = #tpu.dot_dimension_numbers<[1], [0], [0], [1], [0, 0, 1, 1], [], []>} : vector<16x32xf32>, vector<32x32xf32>, vector<16x32xf32> -> vector<16x32xf32>
    %c3_i32_131 = arith.constant 3 : i32
    %311 = vector.broadcast %c3_i32_131 : i32 to vector<16x32xi32>
    %312 = arith.cmpi slt, %197, %311 : vector<16x32xi32>
    %c3_i32_132 = arith.constant 3 : i32
    %313 = vector.broadcast %c3_i32_132 : i32 to vector<16x32xi32>
    %314 = arith.cmpi slt, %201, %313 : vector<16x32xi32>
    %315 = arith.andi %312, %314 : vector<16x32xi1>
    %cst_133 = arith.constant 0.000000e+00 : f32
    %316 = vector.broadcast %cst_133 : f32 to vector<16x32xf32>
    %317 = arith.select %315, %310, %316 : vector<16x32xi1>, vector<16x32xf32>
    %318 = tpu.concatenate %217, %230, %246, %259, %192, %272, %288, %301, %317 in 0 : vector<16x32xf32>, vector<16x32xf32>, vector<16x32xf32>, vector<16x32xf32>, vector<16x32xf32>, vector<16x32xf32>, vector<16x32xf32>, vector<16x32xf32>, vector<16x32xf32> -> vector<144x32xf32>
    %cst_134 = arith.constant dense<0.000000e+00> : vector<32x32xf32>
    %319 = tpu.matmul %193, %318, %cst_134 {dimension_numbers = #tpu.dot_dimension_numbers<[1], [0], [0], [1], [0, 0, 1, 1], [], []>} : vector<32x144xf32>, vector<144x32xf32>, vector<32x32xf32> -> vector<32x32xf32>
    %320 = vector.broadcast %194 : vector<32x1xf32> to vector<32x32xf32>
    %321 = arith.addf %319, %320 : vector<32x32xf32>
    %cst_135 = arith.constant 0.000000e+00 : f32
    %322 = vector.broadcast %cst_135 : f32 to vector<32x32xf32>
    %323 = arith.maximumf %321, %322 : vector<32x32xf32>
    %c0_136 = arith.constant 0 : index
    %c0_137 = arith.constant 0 : index
    %324 = vector.load %arg14[%c0_136, %c0_137] : memref<32x32xf32, #tpu.memory_space<vmem>>, vector<32x32xf32>
    tpu.vector_store %arg14[%c0_136, %c0_137], %323 {strides = array<i32>} : memref<32x32xf32, #tpu.memory_space<vmem>>, vector<32x32xf32>,
    %325 = tpu.iota {dimensions = array<i32: 0>} : vector<32x128xi32>
    %326 = tpu.iota {dimensions = array<i32: 1>} : vector<32x128xi32>
    %c6_i32_138 = arith.constant 6 : i32
    %327 = vector.broadcast %c6_i32_138 : i32 to vector<32x128xi32>
    %328 = arith.shrsi %326, %327 : vector<32x128xi32>
    %c63_i32_139 = arith.constant 63 : i32
    %329 = vector.broadcast %c63_i32_139 : i32 to vector<32x128xi32>
    %330 = arith.andi %326, %329 : vector<32x128xi32>
    %c3_i32_140 = arith.constant 3 : i32
    %331 = vector.broadcast %c3_i32_140 : i32 to vector<32x128xi32>
    %332 = arith.shrsi %330, %331 : vector<32x128xi32>
    %c7_i32_141 = arith.constant 7 : i32
    %333 = vector.broadcast %c7_i32_141 : i32 to vector<32x128xi32>
    %334 = arith.andi %330, %333 : vector<32x128xi32>
    %c4_i32_142 = arith.constant 4 : i32
    %335 = vector.broadcast %c4_i32_142 : i32 to vector<32x128xi32>
    %336 = arith.shli %328, %335 : vector<32x128xi32>
    %c1_i32_143 = arith.constant 1 : i32
    %337 = vector.broadcast %c1_i32_143 : i32 to vector<32x128xi32>
    %338 = arith.shrsi %332, %337 : vector<32x128xi32>
    %c2_i32_144 = arith.constant 2 : i32
    %339 = vector.broadcast %c2_i32_144 : i32 to vector<32x128xi32>
    %340 = arith.shli %338, %339 : vector<32x128xi32>
    %341 = arith.addi %336, %340 : vector<32x128xi32>
    %c1_i32_145 = arith.constant 1 : i32
    %342 = vector.broadcast %c1_i32_145 : i32 to vector<32x128xi32>
    %343 = arith.shrsi %334, %342 : vector<32x128xi32>
    %344 = arith.addi %341, %343 : vector<32x128xi32>
    %345 = arith.cmpi eq, %325, %344 : vector<32x128xi32>
    %cst_146 = arith.constant 1.000000e+00 : f32
    %cst_147 = arith.constant 0.000000e+00 : f32
    %346 = vector.broadcast %cst_146 : f32 to vector<32x128xf32>
    %347 = vector.broadcast %cst_147 : f32 to vector<32x128xf32>
    %348 = arith.select %345, %346, %347 : vector<32x128xi1>, vector<32x128xf32>
    %cst_148 = arith.constant dense<0.000000e+00> : vector<32x128xf32>
    %349 = tpu.matmul %323, %348, %cst_148 {dimension_numbers = #tpu.dot_dimension_numbers<[1], [0], [0], [1], [0, 0, 1, 1], [], []>} : vector<32x32xf32>, vector<32x128xf32>, vector<32x128xf32> -> vector<32x128xf32>
    %c0_149 = arith.constant 0 : index
    %c0_150 = arith.constant 0 : index
    %350 = vector.load %arg7[%c0_149, %c0_150] : memref<16x288xf32, #tpu.memory_space<vmem>>, vector<16x288xf32>
    %c0_151 = arith.constant 0 : index
    %c0_152 = arith.constant 0 : index
    %351 = vector.load %arg8[%c0_151, %c0_152] : memref<16x1xf32, #tpu.memory_space<vmem>>, vector<16x1xf32>
    %352 = tpu.iota {dimensions = array<i32: 1>} : vector<32x128xi32>
    %c7_i32_153 = arith.constant 7 : i32
    %353 = vector.broadcast %c7_i32_153 : i32 to vector<32x128xi32>
    %354 = arith.andi %352, %353 : vector<32x128xi32>
    %c3_i32_154 = arith.constant 3 : i32
    %355 = vector.broadcast %c3_i32_154 : i32 to vector<32x128xi32>
    %356 = arith.shrsi %352, %355 : vector<32x128xi32>
    %c7_i32_155 = arith.constant 7 : i32
    %357 = vector.broadcast %c7_i32_155 : i32 to vector<32x128xi32>
    %358 = arith.andi %356, %357 : vector<32x128xi32>
    %c9_i32_156 = arith.constant 9 : i32
    %359 = tpu.dynamic_rotate %349 by %c9_i32_156 dim 1 : vector<32x128xf32>, i32 -> vector<32x128xf32>
    %c1_i32_157 = arith.constant 1 : i32
    %360 = vector.broadcast %c1_i32_157 : i32 to vector<32x128xi32>
    %361 = arith.cmpi sge, %354, %360 : vector<32x128xi32>
    %c1_i32_158 = arith.constant 1 : i32
    %362 = vector.broadcast %c1_i32_158 : i32 to vector<32x128xi32>
    %363 = arith.cmpi sge, %358, %362 : vector<32x128xi32>
    %364 = arith.andi %361, %363 : vector<32x128xi1>
    %cst_159 = arith.constant 0.000000e+00 : f32
    %365 = vector.broadcast %cst_159 : f32 to vector<32x128xf32>
    %366 = arith.select %364, %359, %365 : vector<32x128xi1>, vector<32x128xf32>
    %c8_i32_160 = arith.constant 8 : i32
    %367 = tpu.dynamic_rotate %349 by %c8_i32_160 dim 1 : vector<32x128xf32>, i32 -> vector<32x128xf32>
    %c1_i32_161 = arith.constant 1 : i32
    %368 = vector.broadcast %c1_i32_161 : i32 to vector<32x128xi32>
    %369 = arith.cmpi sge, %358, %368 : vector<32x128xi32>
    %cst_162 = arith.constant 0.000000e+00 : f32
    %370 = vector.broadcast %cst_162 : f32 to vector<32x128xf32>
    %371 = arith.select %369, %367, %370 : vector<32x128xi1>, vector<32x128xf32>
    %c7_i32_163 = arith.constant 7 : i32
    %372 = tpu.dynamic_rotate %349 by %c7_i32_163 dim 1 : vector<32x128xf32>, i32 -> vector<32x128xf32>
    %c7_i32_164 = arith.constant 7 : i32
    %373 = vector.broadcast %c7_i32_164 : i32 to vector<32x128xi32>
    %374 = arith.cmpi slt, %354, %373 : vector<32x128xi32>
    %c1_i32_165 = arith.constant 1 : i32
    %375 = vector.broadcast %c1_i32_165 : i32 to vector<32x128xi32>
    %376 = arith.cmpi sge, %358, %375 : vector<32x128xi32>
    %377 = arith.andi %374, %376 : vector<32x128xi1>
    %cst_166 = arith.constant 0.000000e+00 : f32
    %378 = vector.broadcast %cst_166 : f32 to vector<32x128xf32>
    %379 = arith.select %377, %372, %378 : vector<32x128xi1>, vector<32x128xf32>
    %c1_i32_167 = arith.constant 1 : i32
    %380 = tpu.dynamic_rotate %349 by %c1_i32_167 dim 1 : vector<32x128xf32>, i32 -> vector<32x128xf32>
    %c1_i32_168 = arith.constant 1 : i32
    %381 = vector.broadcast %c1_i32_168 : i32 to vector<32x128xi32>
    %382 = arith.cmpi sge, %354, %381 : vector<32x128xi32>
    %cst_169 = arith.constant 0.000000e+00 : f32
    %383 = vector.broadcast %cst_169 : f32 to vector<32x128xf32>
    %384 = arith.select %382, %380, %383 : vector<32x128xi1>, vector<32x128xf32>
    %c127_i32_170 = arith.constant 127 : i32
    %385 = tpu.dynamic_rotate %349 by %c127_i32_170 dim 1 : vector<32x128xf32>, i32 -> vector<32x128xf32>
    %c7_i32_171 = arith.constant 7 : i32
    %386 = vector.broadcast %c7_i32_171 : i32 to vector<32x128xi32>
    %387 = arith.cmpi slt, %354, %386 : vector<32x128xi32>
    %cst_172 = arith.constant 0.000000e+00 : f32
    %388 = vector.broadcast %cst_172 : f32 to vector<32x128xf32>
    %389 = arith.select %387, %385, %388 : vector<32x128xi1>, vector<32x128xf32>
    %c121_i32_173 = arith.constant 121 : i32
    %390 = tpu.dynamic_rotate %349 by %c121_i32_173 dim 1 : vector<32x128xf32>, i32 -> vector<32x128xf32>
    %c1_i32_174 = arith.constant 1 : i32
    %391 = vector.broadcast %c1_i32_174 : i32 to vector<32x128xi32>
    %392 = arith.cmpi sge, %354, %391 : vector<32x128xi32>
    %c7_i32_175 = arith.constant 7 : i32
    %393 = vector.broadcast %c7_i32_175 : i32 to vector<32x128xi32>
    %394 = arith.cmpi slt, %358, %393 : vector<32x128xi32>
    %395 = arith.andi %392, %394 : vector<32x128xi1>
    %cst_176 = arith.constant 0.000000e+00 : f32
    %396 = vector.broadcast %cst_176 : f32 to vector<32x128xf32>
    %397 = arith.select %395, %390, %396 : vector<32x128xi1>, vector<32x128xf32>
    %c120_i32_177 = arith.constant 120 : i32
    %398 = tpu.dynamic_rotate %349 by %c120_i32_177 dim 1 : vector<32x128xf32>, i32 -> vector<32x128xf32>
    %c7_i32_178 = arith.constant 7 : i32
    %399 = vector.broadcast %c7_i32_178 : i32 to vector<32x128xi32>
    %400 = arith.cmpi slt, %358, %399 : vector<32x128xi32>
    %cst_179 = arith.constant 0.000000e+00 : f32
    %401 = vector.broadcast %cst_179 : f32 to vector<32x128xf32>
    %402 = arith.select %400, %398, %401 : vector<32x128xi1>, vector<32x128xf32>
    %c119_i32_180 = arith.constant 119 : i32
    %403 = tpu.dynamic_rotate %349 by %c119_i32_180 dim 1 : vector<32x128xf32>, i32 -> vector<32x128xf32>
    %c7_i32_181 = arith.constant 7 : i32
    %404 = vector.broadcast %c7_i32_181 : i32 to vector<32x128xi32>
    %405 = arith.cmpi slt, %354, %404 : vector<32x128xi32>
    %c7_i32_182 = arith.constant 7 : i32
    %406 = vector.broadcast %c7_i32_182 : i32 to vector<32x128xi32>
    %407 = arith.cmpi slt, %358, %406 : vector<32x128xi32>
    %408 = arith.andi %405, %407 : vector<32x128xi1>
    %cst_183 = arith.constant 0.000000e+00 : f32
    %409 = vector.broadcast %cst_183 : f32 to vector<32x128xf32>
    %410 = arith.select %408, %403, %409 : vector<32x128xi1>, vector<32x128xf32>
    %411 = tpu.concatenate %366, %371, %379, %384, %349, %389, %397, %402, %410 in 0 : vector<32x128xf32>, vector<32x128xf32>, vector<32x128xf32>, vector<32x128xf32>, vector<32x128xf32>, vector<32x128xf32>, vector<32x128xf32>, vector<32x128xf32>, vector<32x128xf32> -> vector<288x128xf32>
    %cst_184 = arith.constant dense<0.000000e+00> : vector<16x128xf32>
    %412 = tpu.matmul %350, %411, %cst_184 {dimension_numbers = #tpu.dot_dimension_numbers<[1], [0], [0], [1], [0, 0, 1, 1], [], []>} : vector<16x288xf32>, vector<288x128xf32>, vector<16x128xf32> -> vector<16x128xf32>
    %413 = vector.broadcast %351 : vector<16x1xf32> to vector<16x128xf32>
    %414 = arith.addf %412, %413 : vector<16x128xf32>
    %cst_185 = arith.constant 0.000000e+00 : f32
    %415 = vector.broadcast %cst_185 : f32 to vector<16x128xf32>
    %416 = arith.maximumf %414, %415 : vector<16x128xf32>
    %417 = tpu.iota {dimensions = array<i32: 0>} : vector<128x512xi32>
    %418 = tpu.iota {dimensions = array<i32: 1>} : vector<128x512xi32>
    %c8_i32_186 = arith.constant 8 : i32
    %419 = vector.broadcast %c8_i32_186 : i32 to vector<128x512xi32>
    %420 = arith.shrsi %418, %419 : vector<128x512xi32>
    %c255_i32 = arith.constant 255 : i32
    %421 = vector.broadcast %c255_i32 : i32 to vector<128x512xi32>
    %422 = arith.andi %418, %421 : vector<128x512xi32>
    %c4_i32_187 = arith.constant 4 : i32
    %423 = vector.broadcast %c4_i32_187 : i32 to vector<128x512xi32>
    %424 = arith.shrsi %422, %423 : vector<128x512xi32>
    %c15_i32_188 = arith.constant 15 : i32
    %425 = vector.broadcast %c15_i32_188 : i32 to vector<128x512xi32>
    %426 = arith.andi %422, %425 : vector<128x512xi32>
    %c6_i32_189 = arith.constant 6 : i32
    %427 = vector.broadcast %c6_i32_189 : i32 to vector<128x512xi32>
    %428 = arith.shli %420, %427 : vector<128x512xi32>
    %c1_i32_190 = arith.constant 1 : i32
    %429 = vector.broadcast %c1_i32_190 : i32 to vector<128x512xi32>
    %430 = arith.shrsi %424, %429 : vector<128x512xi32>
    %c3_i32_191 = arith.constant 3 : i32
    %431 = vector.broadcast %c3_i32_191 : i32 to vector<128x512xi32>
    %432 = arith.shli %430, %431 : vector<128x512xi32>
    %433 = arith.addi %428, %432 : vector<128x512xi32>
    %c1_i32_192 = arith.constant 1 : i32
    %434 = vector.broadcast %c1_i32_192 : i32 to vector<128x512xi32>
    %435 = arith.shrsi %426, %434 : vector<128x512xi32>
    %436 = arith.addi %433, %435 : vector<128x512xi32>
    %437 = arith.cmpi eq, %417, %436 : vector<128x512xi32>
    %cst_193 = arith.constant 1.000000e+00 : f32
    %cst_194 = arith.constant 0.000000e+00 : f32
    %438 = vector.broadcast %cst_193 : f32 to vector<128x512xf32>
    %439 = vector.broadcast %cst_194 : f32 to vector<128x512xf32>
    %440 = arith.select %437, %438, %439 : vector<128x512xi1>, vector<128x512xf32>
    %cst_195 = arith.constant dense<0.000000e+00> : vector<16x512xf32>
    %441 = tpu.matmul %416, %440, %cst_195 {dimension_numbers = #tpu.dot_dimension_numbers<[1], [0], [0], [1], [0, 0, 1, 1], [], []>} : vector<16x128xf32>, vector<128x512xf32>, vector<16x512xf32> -> vector<16x512xf32>
    %c0_196 = arith.constant 0 : index
    %c0_197 = arith.constant 0 : index
    %442 = vector.load %arg9[%c0_196, %c0_197] : memref<8x144xf32, #tpu.memory_space<vmem>>, vector<8x144xf32>
    %c0_198 = arith.constant 0 : index
    %c0_199 = arith.constant 0 : index
    %443 = vector.load %arg10[%c0_198, %c0_199] : memref<8x1xf32, #tpu.memory_space<vmem>>, vector<8x1xf32>
    %444 = tpu.iota {dimensions = array<i32: 1>} : vector<16x512xi32>
    %c15_i32_200 = arith.constant 15 : i32
    %445 = vector.broadcast %c15_i32_200 : i32 to vector<16x512xi32>
    %446 = arith.andi %444, %445 : vector<16x512xi32>
    %c4_i32_201 = arith.constant 4 : i32
    %447 = vector.broadcast %c4_i32_201 : i32 to vector<16x512xi32>
    %448 = arith.shrsi %444, %447 : vector<16x512xi32>
    %c15_i32_202 = arith.constant 15 : i32
    %449 = vector.broadcast %c15_i32_202 : i32 to vector<16x512xi32>
    %450 = arith.andi %448, %449 : vector<16x512xi32>
    %c17_i32_203 = arith.constant 17 : i32
    %451 = tpu.dynamic_rotate %441 by %c17_i32_203 dim 1 : vector<16x512xf32>, i32 -> vector<16x512xf32>
    %c1_i32_204 = arith.constant 1 : i32
    %452 = vector.broadcast %c1_i32_204 : i32 to vector<16x512xi32>
    %453 = arith.cmpi sge, %446, %452 : vector<16x512xi32>
    %c1_i32_205 = arith.constant 1 : i32
    %454 = vector.broadcast %c1_i32_205 : i32 to vector<16x512xi32>
    %455 = arith.cmpi sge, %450, %454 : vector<16x512xi32>
    %456 = arith.andi %453, %455 : vector<16x512xi1>
    %cst_206 = arith.constant 0.000000e+00 : f32
    %457 = vector.broadcast %cst_206 : f32 to vector<16x512xf32>
    %458 = arith.select %456, %451, %457 : vector<16x512xi1>, vector<16x512xf32>
    %c16_i32_207 = arith.constant 16 : i32
    %459 = tpu.dynamic_rotate %441 by %c16_i32_207 dim 1 : vector<16x512xf32>, i32 -> vector<16x512xf32>
    %c1_i32_208 = arith.constant 1 : i32
    %460 = vector.broadcast %c1_i32_208 : i32 to vector<16x512xi32>
    %461 = arith.cmpi sge, %450, %460 : vector<16x512xi32>
    %cst_209 = arith.constant 0.000000e+00 : f32
    %462 = vector.broadcast %cst_209 : f32 to vector<16x512xf32>
    %463 = arith.select %461, %459, %462 : vector<16x512xi1>, vector<16x512xf32>
    %c15_i32_210 = arith.constant 15 : i32
    %464 = tpu.dynamic_rotate %441 by %c15_i32_210 dim 1 : vector<16x512xf32>, i32 -> vector<16x512xf32>
    %c15_i32_211 = arith.constant 15 : i32
    %465 = vector.broadcast %c15_i32_211 : i32 to vector<16x512xi32>
    %466 = arith.cmpi slt, %446, %465 : vector<16x512xi32>
    %c1_i32_212 = arith.constant 1 : i32
    %467 = vector.broadcast %c1_i32_212 : i32 to vector<16x512xi32>
    %468 = arith.cmpi sge, %450, %467 : vector<16x512xi32>
    %469 = arith.andi %466, %468 : vector<16x512xi1>
    %cst_213 = arith.constant 0.000000e+00 : f32
    %470 = vector.broadcast %cst_213 : f32 to vector<16x512xf32>
    %471 = arith.select %469, %464, %470 : vector<16x512xi1>, vector<16x512xf32>
    %c1_i32_214 = arith.constant 1 : i32
    %472 = tpu.dynamic_rotate %441 by %c1_i32_214 dim 1 : vector<16x512xf32>, i32 -> vector<16x512xf32>
    %c1_i32_215 = arith.constant 1 : i32
    %473 = vector.broadcast %c1_i32_215 : i32 to vector<16x512xi32>
    %474 = arith.cmpi sge, %446, %473 : vector<16x512xi32>
    %cst_216 = arith.constant 0.000000e+00 : f32
    %475 = vector.broadcast %cst_216 : f32 to vector<16x512xf32>
    %476 = arith.select %474, %472, %475 : vector<16x512xi1>, vector<16x512xf32>
    %c511_i32_217 = arith.constant 511 : i32
    %477 = tpu.dynamic_rotate %441 by %c511_i32_217 dim 1 : vector<16x512xf32>, i32 -> vector<16x512xf32>
    %c15_i32_218 = arith.constant 15 : i32
    %478 = vector.broadcast %c15_i32_218 : i32 to vector<16x512xi32>
    %479 = arith.cmpi slt, %446, %478 : vector<16x512xi32>
    %cst_219 = arith.constant 0.000000e+00 : f32
    %480 = vector.broadcast %cst_219 : f32 to vector<16x512xf32>
    %481 = arith.select %479, %477, %480 : vector<16x512xi1>, vector<16x512xf32>
    %c497_i32_220 = arith.constant 497 : i32
    %482 = tpu.dynamic_rotate %441 by %c497_i32_220 dim 1 : vector<16x512xf32>, i32 -> vector<16x512xf32>
    %c1_i32_221 = arith.constant 1 : i32
    %483 = vector.broadcast %c1_i32_221 : i32 to vector<16x512xi32>
    %484 = arith.cmpi sge, %446, %483 : vector<16x512xi32>
    %c15_i32_222 = arith.constant 15 : i32
    %485 = vector.broadcast %c15_i32_222 : i32 to vector<16x512xi32>
    %486 = arith.cmpi slt, %450, %485 : vector<16x512xi32>
    %487 = arith.andi %484, %486 : vector<16x512xi1>
    %cst_223 = arith.constant 0.000000e+00 : f32
    %488 = vector.broadcast %cst_223 : f32 to vector<16x512xf32>
    %489 = arith.select %487, %482, %488 : vector<16x512xi1>, vector<16x512xf32>
    %c496_i32_224 = arith.constant 496 : i32
    %490 = tpu.dynamic_rotate %441 by %c496_i32_224 dim 1 : vector<16x512xf32>, i32 -> vector<16x512xf32>
    %c15_i32_225 = arith.constant 15 : i32
    %491 = vector.broadcast %c15_i32_225 : i32 to vector<16x512xi32>
    %492 = arith.cmpi slt, %450, %491 : vector<16x512xi32>
    %cst_226 = arith.constant 0.000000e+00 : f32
    %493 = vector.broadcast %cst_226 : f32 to vector<16x512xf32>
    %494 = arith.select %492, %490, %493 : vector<16x512xi1>, vector<16x512xf32>
    %c495_i32_227 = arith.constant 495 : i32
    %495 = tpu.dynamic_rotate %441 by %c495_i32_227 dim 1 : vector<16x512xf32>, i32 -> vector<16x512xf32>
    %c15_i32_228 = arith.constant 15 : i32
    %496 = vector.broadcast %c15_i32_228 : i32 to vector<16x512xi32>
    %497 = arith.cmpi slt, %446, %496 : vector<16x512xi32>
    %c15_i32_229 = arith.constant 15 : i32
    %498 = vector.broadcast %c15_i32_229 : i32 to vector<16x512xi32>
    %499 = arith.cmpi slt, %450, %498 : vector<16x512xi32>
    %500 = arith.andi %497, %499 : vector<16x512xi1>
    %cst_230 = arith.constant 0.000000e+00 : f32
    %501 = vector.broadcast %cst_230 : f32 to vector<16x512xf32>
    %502 = arith.select %500, %495, %501 : vector<16x512xi1>, vector<16x512xf32>
    %503 = tpu.concatenate %458, %463, %471, %476, %441, %481, %489, %494, %502 in 0 : vector<16x512xf32>, vector<16x512xf32>, vector<16x512xf32>, vector<16x512xf32>, vector<16x512xf32>, vector<16x512xf32>, vector<16x512xf32>, vector<16x512xf32>, vector<16x512xf32> -> vector<144x512xf32>
    %cst_231 = arith.constant dense<0.000000e+00> : vector<8x512xf32>
    %504 = tpu.matmul %442, %503, %cst_231 {dimension_numbers = #tpu.dot_dimension_numbers<[1], [0], [0], [1], [0, 0, 1, 1], [], []>} : vector<8x144xf32>, vector<144x512xf32>, vector<8x512xf32> -> vector<8x512xf32>
    %505 = vector.broadcast %443 : vector<8x1xf32> to vector<8x512xf32>
    %506 = arith.addf %504, %505 : vector<8x512xf32>
    %cst_232 = arith.constant 0.000000e+00 : f32
    %507 = vector.broadcast %cst_232 : f32 to vector<8x512xf32>
    %508 = arith.maximumf %506, %507 : vector<8x512xf32>
    %c0_233 = arith.constant 0 : index
    %c0_234 = arith.constant 0 : index
    %509 = vector.load %arg11[%c0_233, %c0_234] : memref<1x8xf32, #tpu.memory_space<vmem>>, vector<1x8xf32>
    %c0_235 = arith.constant 0 : index
    %c0_236 = arith.constant 0 : index
    %510 = vector.load %arg12[%c0_235, %c0_236] : memref<1x1xf32, #tpu.memory_space<vmem>>, vector<1x1xf32>
    %cst_237 = arith.constant dense<0.000000e+00> : vector<1x512xf32>
    %511 = tpu.matmul %509, %508, %cst_237 {dimension_numbers = #tpu.dot_dimension_numbers<[1], [0], [0], [1], [0, 0, 1, 1], [], []>} : vector<1x8xf32>, vector<8x512xf32>, vector<1x512xf32> -> vector<1x512xf32>
    %512 = vector.broadcast %510 : vector<1x1xf32> to vector<1x512xf32>
    %513 = arith.addf %511, %512 : vector<1x512xf32>
    %c0_238 = arith.constant 0 : index
    %c0_239 = arith.constant 0 : index
    %514 = vector.load %arg13[%c0_238, %c0_239] : memref<1x512xf32, #tpu.memory_space<vmem>>, vector<1x512xf32>
    tpu.vector_store %arg13[%c0_238, %c0_239], %513 {strides = array<i32>} : memref<1x512xf32, #tpu.memory_space<vmem>>, vector<1x512xf32>,
    return
  }
}

</mosaic_0001>

<bundles_post_ra>
// kernel: cae_simple_conv.1
= control target key start
LH: loop header
LB: loop body
LE: loop exit
PB: predicated region body
PF: predicated region fallthrough
CT: control target
= control target key end

     0   :  { %v7127_v0 = vlaneseq  ;;  %s4901_s15 = smov 16   ;;  %s4902_s16 = smov 17   ;;  %v7129_v25 = vmov 0.0   ;;  %v4909_v26 = vmov 0   ;;  %v7200_v40 = vmov 0  ;;  %s7089_s0 = inlined_call_operand.vmem [shape: f32[1,512], index: 0, kind: input, shape index: {}]   ;;  %s7090_s2 = inlined_call_operand.vmem [shape: f32[8,1], index: 2, kind: input, shape index: {}]   ;;  %s7091_s1 = inlined_call_operand.vmem [shape: f32[8,9], index: 1, kind: input, shape index: {}]   ;;  %s7092_s3 = inlined_call_operand.vmem [shape: f32[16,72], index: 3, kind: input, shape index: {}]   ;;  %s7093_s4 = inlined_call_operand.vmem [shape: f32[16,1], index: 4, kind: input, shape index: {}]   ;;  %s7094_s6 = inlined_call_operand.vmem [shape: f32[32,1], index: 6, kind: input, shape index: {}]   ;;  %s7095_s5 = inlined_call_operand.vmem [shape: f32[32,144], index: 5, kind: input, shape index: {}]   ;;  %s7096_s14 = inlined_call_operand.vmem [shape: f32[32,32], index: 14, kind: output, shape index: {1}]   ;;  %s7097_s7 = inlined_call_operand.vmem [shape: f32[16,288], index: 7, kind: input, shape index: {}]   ;;  %s7098_s8 = inlined_call_operand.vmem [shape: f32[16,1], index: 8, kind: input, shape index: {}]   ;;  %s7099_s12 = inlined_call_operand.<no memory space> [shape: f32[1,1], index: 12, kind: input, shape index: {}]   ;;  %s7100_s9 = inlined_call_operand.vmem [shape: f32[8,144], index: 9, kind: input, shape index: {}]   ;;  %s7101_s10 = inlined_call_operand.vmem [shape: f32[8,1], index: 10, kind: input, shape index: {}]   ;;  %s7102_s11 = inlined_call_operand.vmem [shape: f32[1,8], index: 11, kind: input, shape index: {}]   ;;  %s7103_s13 = inlined_call_operand.vmem [shape: f32[1,512], index: 13, kind: output, shape index: {0}]  }
   0x1   :  { %v48_v2 = vld [vmem:[%s7089_s0] sm:$0xf]  ;;  %s4900_s0 = smov 15   ;;  %s4903_s17 = smov 1   ;;  %449 = vmatprep.mubr.f32.mxu1 %v7129_v25  ;;  %4613 = vset.pattern.permute.xlu1 %v4909_v26  ;;  %v7203_v45 = vmov 0  ;;  %v7206_v51 = vmov 0 }
   0x2   :  { %v4996_v1 = vshrl.u32 %v7127_v0, 7  ;;  %v5026_v13 = vand.u32 127, %v7127_v0  ;;  %s4904_s18 = smov 127   ;;  %s4905_s19 = smov 113   ;;  %v50_v27 = vld [vmem:[%s7090_s2] sm:$0xff]  ;;  %4644 = vset.pattern.permute.xlu0 %v4909_v26  ;;  %v7208_v55 = vmov 0 }
   0x3   :  { %s4906_s20 = smov 112   ;;  %s7192_s21 = smov 111   ;;  %vm7109_vm8 = vcmask 1040384  }
   0x4   :  { %v7128_v3 = vsub.s32 0, %v4996_v1  ;;  %v75_v4 = vsub.s32 1, %v4996_v1  ;;  %v79_v5 = vsub.s32 2, %v4996_v1  ;;  %v83_v6 = vsub.s32 3, %v4996_v1  ;;  %s4913_s25 = smov 9   ;;  %s4914_s26 = smov 7  }
   0x5   :  { %v60_v14 = vshra.s32 %v5026_v13, 4  ;;  %v5030_v15 = vand.u32 15, %v5026_v13  ;;  %v5058_v28 = vadd.s32 128, %v5026_v13  ;;  %v5062_v30 = vadd.s32 256, %v5026_v13  ;;  %s4915_s29 = smov 121   ;;  %s4916_s30 = smov 119  }
   0x6   :  { %v5007_v7 = vrot.slane %v48_v2, %v7128_v3  ;;  %v5009_v8 = vrot.slane %v48_v2, %v75_v4  ;;  %v5011_v9 = vrot.slane %v48_v2, %v79_v5  ;;  %v5013_v10 = vrot.slane %v48_v2, %v83_v6  ;;  %s4917_s22 = smov 120  }
   0x7   :  { %7199 = vst [vmem:[#allocation3_spill] sm:$0xff] %v5030_v15  ;;  %v1074_v18 = vshll.u32 %v60_v14, 6  ;;  %v1072_v19 = vshra.s32 %v5030_v15, 2  ;;  %v1073_v20 = vand.u32 3, %v5030_v15  ;;  %v61_v29 = vshra.s32 %v5058_v28, 4 }
   0x8   :  { %v4548_v11 = vpack.i.bf16 %v5009_v8, %v5007_v7  ;;  %v4543_v12 = vpack.i.bf16 %v5011_v9, %v5013_v10  ;;  %v4583_v16 = vpack.i.bf16 %v5013_v10, %v5007_v7  ;;  %v4578_v17 = vpack.i.bf16 %v5011_v9, %v5009_v8 }
   0x9   :  { %v1075_v21 = vshll.u32 %v1072_v19, 4  ;;  %v1077_v22 = vshll.u32 %v1073_v20, 1  ;;  %v5065_v31 = vadd.s32 384, %v5026_v13  ;;  %v57_v32 = vand.u32 15, %v5058_v28 }
   0xa   :  { %4549 = vrot.lane.b32.xlu1 %v4548_v11, %s4900_s0  ;;  %4539 = vrot.lane.b32.xlu0 %v4548_v11, %s4901_s15  ;;  %v5068_v33 = vand.u32 15, %v61_v29  ;;  %vm7106_vm0 = vcmp.lt.s32.totalorder %v5026_v13, 15  ;;  %v62_v36 = vshra.s32 %v5062_v30, 4  ;;  %vm7107_vm1 = vcmp.lt.s32.totalorder %v5026_v13, 16 }
   0xb   :  { %v1076_v23 = vadd.s32 %v1075_v21, %v1074_v18  ;;  %v63_v37 = vshra.s32 %v5065_v31, 4  ;;  %vm7105_vm2 = vcmp.lt.s32.totalorder %v5026_v13, 17  ;;  %vm5078_vm4 = vcmp.lt.s32.totalorder %v57_v32, 15 }
   0xc   :  { %vm7104_vm3 = vcmp.ge.s32.totalorder %v5068_v33, 1  ;;  %v7201_v40 = vsel %vm5078_vm4, 4294967295, %v7200_v40  ;;  %vm5086_vm5 = vcmp.ge.s32.totalorder %v57_v32, 1  ;;  %v5092_v48 = vand.u32 15, %v60_v14 }
   0xd   :  { %v5042_v24 = vadd.s32 %v1077_v22, %v1076_v23  ;;  %7202 = vst [vmem:[#allocation4_spill] sm:$0xff] %v7201_v40  ;;  %v7204_v45 = vsel %vm5086_vm5, 4294967295, %v7203_v45  ;;  %v5094_v49 = vand.u32 15, %v62_v36  ;;  %v5096_v50 = vand.u32 15, %v63_v37  ;;  %vm5102_vm6 = vmand %vm5078_vm4, %vm7104_vm3 }
   0xe   :  { %4554 = vrot.lane.b32.xlu1 %v4548_v11, %s4902_s16  ;;  %4544 = vrot.lane.b32.xlu0 %v4543_v12, %s4901_s15  ;;  %7205 = vst [vmem:[#allocation5_spill] sm:$0xff] %v7204_v45  ;;  %v7207_v51 = vsel %vm5102_vm6, 4294967295, %v7206_v51  ;;  %v58_v53 = vand.u32 15, %v5062_v30  ;;  %vm5115_vm7 = vmand %vm5086_vm5, %vm7104_vm3  ;;  %vm7110_vm10 = vcmp.ge.s32.totalorder %v5092_v48, 1  ;;  %vm7112_vm11 = vcmp.lt.s32.totalorder %v5026_v13, 1 }
   0xf   :  { %v7209_v55 = vsel %vm5115_vm7, 4294967295, %v7208_v55  ;;  %vm7111_vm12 = vcmp.ge.s32.totalorder %v5094_v49, 1  ;;  %vm7113_vm13 = vcmp.ge.s32.totalorder %v5096_v50, 1  ;;  %v59_v62 = vand.u32 15, %v5065_v31 }
  0x10   :  { %vm7108_vm14 = vcmp.lt.s32.totalorder %v5030_v15, 15  ;;  %vm5139_vm15 = vcmp.lt.s32.totalorder %v58_v53, 15  ;;  %v7210_v4 = vmov 0  ;;  %v7213_v22 = vmov 0 }
  0x11   :  { %v7211_v4 = vsel %vm5139_vm15, 4294967295, %v7210_v4  ;;  %vm5156_vm9 = vcmp.ge.s32.totalorder %v58_v53, 1  ;;  %v7216_v23 = vmov 0  ;;  %v7219_v32 = vmov 0 }
  0x12   :  { %4564 = vrot.lane.b32.xlu1 %v4548_v11, %s4903_s17  ;;  %4559 = vrot.lane.b32.xlu0 %v4543_v12, %s4900_s0  ;;  %7212 = vst [vmem:[#allocation6_spill] sm:$0xff] %v7211_v4  ;;  %v7217_v23 = vsel %vm5156_vm9, 4294967295, %v7216_v23  ;;  %v7225_v37 = vmov 0  ;;  %v7228_v53 = vmov 0 }
  0x13   :  { %7218 = vst [vmem:[#allocation8_spill] sm:$0xff] %v7217_v23 }
  0x16   :  { %4574 = vrot.lane.b32.xlu1 %v4543_v12, %s4903_s17  ;;  %4569 = vrot.lane.b32.xlu0 %v4543_v12, %s4902_s16 }
  0x1a   :  { %4584 = vrot.lane.b32.xlu1 %v4583_v16, %s4904_s18  ;;  %4579 = vrot.lane.b32.xlu0 %v4578_v17, %s4904_s18 }
  0x1e   :  { %4594 = vrot.lane.b32.xlu1 %v4583_v16, %s4905_s19  ;;  %4589 = vrot.lane.b32.xlu0 %v4578_v17, %s4905_s19 }
  0x22   :  { %4604 = vrot.lane.b32.xlu1 %v4583_v16, %s4906_s20  ;;  %4599 = vrot.lane.b32.xlu0 %v4578_v17, %s4906_s20 }
  0x26   :  { %4609 = vrot.lane.b32.xlu0 %v4578_v17, %s7192_s21  ;;  %236 = vrot.lane.b32.xlu1 %v5007_v7, %s7192_s21 }
  0x2a   :  { %242 = vrot.lane.b32.xlu0 %v5013_v10, %s7192_s21  ;;  %366 = vperm.xlu1 %4613, %v50_v27  }
  0x7c   :  { %v5070_v34 = vpop.permute.xlu1 %4549  ;;  %v4540_v35 = vpop.permute.xlu0 %4539 }
  0x7d   :  { %v4542_v38 = vunpack.i.h.bf16 %v4540_v35  ;;  %v4541_v39 = vunpack.i.l.bf16 %v4540_v35  ;;  %v4552_v41 = vunpack.i.h.bf16 %v5070_v34  ;;  %v4551_v42 = vunpack.i.l.bf16 %v5070_v34 }
  0x7e   :  { %v7222_v34 = vmov 0 }
  0x7f   :  { %v129_v52 = vsel %vm7107_vm1, %v4541_v39, %v4542_v38  ;;  %v146_v54 = vsel %vm7106_vm0, %v4551_v42, %v4552_v41  ;;  %vm5190_vm0 = vmand %vm5139_vm15, %vm7111_vm12 }
  0x80   :  { %v5084_v43 = vpop.permute.xlu1 %4554  ;;  %v4545_v44 = vpop.permute.xlu0 %4544  ;;  %v132_v61 = vsel %vm7104_vm3, %v129_v52, 0.0  ;;  %v157_v63 = vsel %vm5102_vm6, %v146_v54, 0.0  ;;  %vm5151_vm3 = vcmp.lt.s32.totalorder %v59_v62, 15  ;;  %v7226_v37 = vsel %vm5190_vm0, 4294967295, %v7225_v37 }
  0x81   :  { %v4557_v46 = vunpack.i.h.bf16 %v5084_v43  ;;  %v4556_v47 = vunpack.i.l.bf16 %v5084_v43  ;;  %v4547_v57 = vunpack.i.h.bf16 %v4545_v44  ;;  %v4546_v58 = vunpack.i.l.bf16 %v4545_v44  ;;  %7227 = vst [vmem:[#allocation11_spill] sm:$0xff] %v7226_v37 }
  0x82   :  { %v262_v17 = vrot.slane %v132_v61, 7  ;;  %v274_v21 = vrot.slane %v157_v63, 6  ;;  %v7214_v22 = vsel %vm5151_vm3, 4294967295, %v7213_v22 }
  0x83   :  { %v100_v56 = vsel %vm7105_vm2, %v4556_v47, %v4557_v46  ;;  %v128_v5 = vsel %vm7107_vm1, %v4542_v38, %v4547_v57  ;;  %v130_v6 = vsel %vm7107_vm1, %v4546_v58, %v4541_v39  ;;  %v127_v18 = vsel %vm7107_vm1, %v4547_v57, %v4546_v58  ;;  %7215 = vst [vmem:[#allocation7_spill] sm:$0xff] %v7214_v22  ;;  %vm5172_vm1 = vmand %vm7108_vm14, %vm7110_vm10 }
  0x84   :  { %v5125_v59 = vpop.permute.xlu1 %4564  ;;  %v4560_v60 = vpop.permute.xlu0 %4559  ;;  %v115_v2 = vsel %vm5115_vm7, %v100_v56, 0.0  ;;  %v5164_v27 = vsel %vm7110_vm10, %v130_v6, 0.0  ;;  %v133_v29 = vsel %vm7111_vm12, %v128_v5, 0.0  ;;  %v7220_v32 = vsel %vm5172_vm1, 4294967295, %v7219_v32  ;;  %vm5202_vm14 = vmand %vm5151_vm3, %vm7113_vm13 }
  0x85   :  { %v4567_v11 = vunpack.i.h.bf16 %v5125_v59  ;;  %v4566_v12 = vunpack.i.l.bf16 %v5125_v59  ;;  %v4562_v19 = vunpack.i.h.bf16 %v4560_v60  ;;  %v4561_v20 = vunpack.i.l.bf16 %v4560_v60  ;;  %7221 = vst [vmem:[#allocation9_spill] sm:$0xff] %v7220_v32 }
  0x86   :  { %v331_v26 = vsel %vm7109_vm8, %v115_v2, %v262_v17  ;;  %vm5176_vm2 = vcmp.ge.s32.totalorder %v59_v62, 1  ;;  %v5182_v35 = vsel %vm7113_vm13, %v127_v18, 0.0  ;;  %v7229_v53 = vsel %vm5202_vm14, 4294967295, %v7228_v53 }
  0x87   :  { %v7223_v34 = vsel %vm5176_vm2, 4294967295, %v7222_v34  ;;  %v171_v36 = vsel %vm7112_vm11, %v4566_v12, %v4567_v11  ;;  %vm7230_vm8 = vcmp.lt.s32.totalorder %v5026_v13, 15  ;;  %vm7233_vm11 = vcmask 1041408  }
  0x88   :  { %v4575_v14 = vpop.permute.xlu1 %4574  ;;  %v4570_v16 = vpop.permute.xlu0 %4569  ;;  %7224 = vst [vmem:[#allocation10_spill] sm:$0xff] %v7223_v34  ;;  %v145_v54 = vsel %vm7230_vm8, %v4552_v41, %v4562_v19  ;;  %vm7231_vm10 = vmmov %vm7230_vm8  ;;  %v5213_v59 = vsel %vm7233_vm11, %v331_v26, %v274_v21  ;;  %v261_v60 = vrot.slane %v5164_v27, 7  ;;  %v263_v62 = vrot.slane %v133_v29, 7 }
  0x89   :  { %v4576_v38 = vunpack.i.l.bf16 %v4575_v14  ;;  %v4572_v39 = vunpack.i.h.bf16 %v4570_v16  ;;  %v144_v56 = vsel %vm7231_vm10, %v4562_v19, %v4561_v20  ;;  %vm7232_vm12 = vmmov %vm7230_vm8  ;;  %v4577_v58 = vunpack.i.h.bf16 %v4575_v14 }
  0x8a   :  { %v147_v57 = vsel %vm7232_vm12, %v4561_v20, %v4551_v42  ;;  %v4571_v61 = vunpack.i.l.bf16 %v4570_v16  ;;  %v264_v63 = vrot.slane %v5182_v35, 7  ;;  %vm7234_vm8 = vcmp.lt.s32.totalorder %v5026_v13, 1 }
  0x8b   :  { %v172_v41 = vsel %vm7234_vm8, %v4576_v38, %v4566_v12  ;;  %vm7235_vm10 = vcmp.ge.s32.totalorder %v5094_v49, 1  ;;  %v7236_v42 = vmov 0  ;;  %vm7238_vm11 = vcmp.lt.s32.totalorder %v5026_v13, 17 }
  0x8c   :  { %v5194_v44 = vpop.permute.xlu1 %4584  ;;  %v5196_v52 = vpop.permute.xlu0 %4579  ;;  %vm5224_vm12 = vmand %vm5156_vm9, %vm7235_vm10  ;;  %v99_v2 = vsel %vm7238_vm11, %v4557_v46, %v4572_v39  ;;  %v174_v5 = vsel %vm5086_vm5, %v171_v36, 0.0  ;;  %v158_v6 = vsel %vm5190_vm0, %v145_v54, 0.0  ;;  %v156_v12 = vsel %vm5172_vm1, %v147_v57, 0.0 }
  0x8d   :  { %v7237_v42 = vsel %vm5224_vm12, 4294967295, %v7236_v42  ;;  %v159_v14 = vsel %vm5202_vm14, %v144_v56, 0.0  ;;  %vm7239_vm10 = vmmov %vm7234_vm8  ;;  %v4587_v19 = vunpack.i.h.bf16 %v5194_v44  ;;  %v4586_v20 = vunpack.i.l.bf16 %v5194_v44 }
  0x8e   :  { %v169_v17 = vsel %vm7239_vm10, %v4577_v58, %v4576_v38  ;;  %vm7240_vm11 = vmmov %vm7234_vm8  ;;  %vm7241_vm13 = vcmp.ge.s32.totalorder %v5030_v15, 1  ;;  %vm7242_vm8 = vcmp.ge.s32.totalorder %v5096_v50, 1  ;;  %v7243_v26 = vmov 0 }
  0x8f   :  { %v170_v18 = vsel %vm7240_vm11, %v4567_v11, %v4577_v58  ;;  %v5256_v21 = vsel %vm7241_vm13, %v172_v41, 0.0  ;;  %vm5262_vm0 = vmand %vm5176_vm2, %vm7242_vm8  ;;  %v116_v11 = vsel %vm5224_vm12, %v99_v2, 0.0  ;;  %vm7245_vm10 = vcmp.lt.s32.totalorder %v5026_v13, 17 }
  0x90   :  { %v5242_v16 = vpop.permute.xlu1 %4594  ;;  %v5245_v46 = vpop.permute.xlu0 %4589  ;;  %v7244_v26 = vsel %vm5262_vm0, 4294967295, %v7243_v26  ;;  %v98_v27 = vsel %vm7245_vm10, %v4572_v39, %v4571_v61  ;;  %v4582_v29 = vunpack.i.h.bf16 %v5196_v52  ;;  %v5272_v35 = vrot.slane %v174_v5, 5 }
  0x91   :  { %v275_v36 = vrot.slane %v158_v6, 6  ;;  %v273_v38 = vrot.slane %v156_v12, 6  ;;  %vm7246_vm13 = vcmp.ge.s32.totalorder %v5092_v48, 1  ;;  %vm7247_vm8 = vcmp.ge.s32.totalorder %v5030_v15, 1 }
  0x92   :  { %vm5278_vm6 = vmand %vm7247_vm8, %vm7246_vm13  ;;  %v7248_v44 = vmov 0  ;;  %v101_v39 = vsel %vm7245_vm10, %v4571_v61, %v4556_v47  ;;  %v276_v54 = vrot.slane %v159_v14, 6  ;;  %v175_v56 = vsel %vm5156_vm9, %v170_v18, 0.0 }
  0x93   :  { %v7249_v44 = vsel %vm5278_vm6, 4294967295, %v7248_v44  ;;  %v176_v57 = vsel %vm5176_vm2, %v169_v17, 0.0  ;;  %v4581_v58 = vunpack.i.l.bf16 %v5196_v52  ;;  %v285_v2 = vrot.slane %v5256_v21, 5 }
  0x94   :  { %v5291_v41 = vpop.permute.xlu0 %4599  ;;  %v117_v5 = vsel %vm5262_vm0, %v98_v27, 0.0  ;;  %vm7250_vm13 = vcmask 1040384   ;;  %vm7251_vm8 = vcmp.lt.s32.totalorder %v5026_v13, 127  ;;  %v4605_v61 = vpop.permute.xlu1 %4604  ;;  %v114_v6 = vsel %vm5278_vm6, %v101_v39, 0.0 }
  0x95   :  { %v332_v43 = vsel %vm7250_vm13, %v116_v11, %v263_v62  ;;  %v189_v47 = vsel %vm7251_vm8, %v4587_v19, %v4586_v20  ;;  %vm7252_vm10 = vmmov %vm7251_vm8  ;;  %v4597_v52 = vunpack.i.h.bf16 %v5242_v16  ;;  %v4596_v14 = vunpack.i.l.bf16 %v5242_v16 }
  0x96   :  { %v186_v12 = vsel %vm7252_vm10, %v4582_v29, %v4587_v19  ;;  %v5305_v17 = vrot.slane %v175_v56, 5  ;;  %v288_v18 = vrot.slane %v176_v57, 5  ;;  %v4592_v62 = vunpack.i.h.bf16 %v5245_v46  ;;  %vm7253_vm8 = vmmov %vm7250_vm13 }
  0x97   :  { %v4591_v21 = vunpack.i.l.bf16 %v5245_v46  ;;  %v333_v11 = vsel %vm7253_vm8, %v117_v5, %v264_v63  ;;  %v193_v27 = vsel %vm5151_vm3, %v189_v47, 0.0  ;;  %v4606_v19 = vunpack.i.l.bf16 %v4605_v61  ;;  %vm7254_vm1 = vmmov %vm7253_vm8 }
  0x98   :  { %v4601_v39 = vunpack.i.l.bf16 %v5291_v41  ;;  %v330_v16 = vsel %vm7254_vm1, %v114_v6, %v261_v60  ;;  %vm7255_vm11 = vcmask 1041408   ;;  %v192_v57 = vsel %vm5139_vm15, %v186_v12, 0.0  ;;  %vm7256_vm14 = vmmov %vm7252_vm10  ;;  %v5344_v47 = vpop.permute.xlu0 %4609 }
  0x99   :  { %v5316_v56 = vsel %vm7255_vm11, %v332_v43, %v275_v36  ;;  %v188_v46 = vsel %vm7256_vm14, %v4586_v20, %v4581_v58  ;;  %vm7257_vm8 = vcmp.lt.s32.totalorder %v5096_v50, 15  ;;  %v7258_v63 = vmov 0  ;;  %vm7261_vm1 = vmmov %vm7252_vm10 }
  0x9a   :  { %vm5326_vm13 = vmand %vm5176_vm2, %vm7257_vm8  ;;  %v187_v60 = vsel %vm7261_vm1, %v4581_v58, %v4582_v29  ;;  %vm7262_vm11 = vcmp.lt.s32.totalorder %v5026_v13, 113  ;;  %vm7263_vm6 = vcmp.lt.s32.totalorder %v5092_v48, 15  ;;  %vm7264_vm14 = vcmp.ge.s32.totalorder %v5030_v15, 1 }
  0x9b   :  { %v7259_v63 = vsel %vm5326_vm13, 4294967295, %v7258_v63  ;;  %v206_v36 = vsel %vm7262_vm11, %v4597_v52, %v4596_v14  ;;  %vm5338_vm7 = vmand %vm7264_vm14, %vm7263_vm6  ;;  %v7265_v20 = vmov 0  ;;  %v4607_v43 = vunpack.i.h.bf16 %v4605_v61 }
  0x9c   :  { %7260 = vst [vmem:[#allocation12_spill] sm:$0xff] %v7259_v63  ;;  %v7266_v20 = vsel %vm5338_vm7, 4294967295, %v7265_v20  ;;  %vm7268_vm8 = vmmov %vm7262_vm11  ;;  %vm7269_vm10 = vcmask 1041408   ;;  %v300_v58 = vrot.slane %v193_v27, 3  ;;  %vm7270_vm1 = vcmp.lt.s32.totalorder %v5068_v33, 15 }
  0x9d   :  { %7267 = vst [vmem:[#allocation13_spill] sm:$0xff] %v7266_v20  ;;  %v205_v5 = vsel %vm7268_vm8, %v4596_v14, %v4591_v21  ;;  %v338_v29 = vsel %vm7269_vm10, %v333_v11, %v276_v54  ;;  %vm5351_vm11 = vmand %vm5086_vm5, %vm7270_vm1  ;;  %v7271_v6 = vmov 0  ;;  %v4602_v14 = vunpack.i.h.bf16 %v5291_v41 }
  0x9e   :  { %v7272_v6 = vsel %vm5351_vm11, 4294967295, %v7271_v6  ;;  %vm7274_vm6 = vmmov %vm7268_vm8  ;;  %v5359_v0 = vrot.slane %v192_v57, 3  ;;  %vm7277_vm8 = vcmp.lt.s32.totalorder %v5026_v13, 112  ;;  %v191_v27 = vsel %vm5078_vm4, %v187_v60, 0.0 }
  0x9f   :  { %7273 = vst [vmem:[#allocation14_spill] sm:$0xff] %v7272_v6  ;;  %v204_v12 = vsel %vm7274_vm6, %v4591_v21, %v4592_v62  ;;  %vm7275_vm14 = vmmov %vm7269_vm10  ;;  %vm7276_vm10 = vcmp.lt.s32.totalorder %v5030_v15, 15  ;;  %v230_v11 = vsel %vm7277_vm8, %v4606_v19, %v4601_v39  ;;  %v218_v3 = vsel %vm5326_vm13, %v206_v36, 0.0 }
  0xa0   :  { %v335_v61 = vsel %vm7275_vm14, %v330_v16, %v273_v38  ;;  %v190_v54 = vsel %vm7276_vm10, %v188_v46, 0.0  ;;  %vm7278_vm1 = vcmp.lt.s32.totalorder %v5094_v49, 15  ;;  %v7279_v38 = vmov 0  ;;  %vm7283_vm10 = vmmov %vm7277_vm8 }
  0xa1   :  { %vm5373_vm6 = vmand %vm5156_vm9, %vm7278_vm1  ;;  %vm7282_vm14 = vcmp.lt.s32.totalorder %v5026_v13, 113  ;;  %v215_v21 = vsel %vm5338_vm7, %v205_v5, 0.0  ;;  %v216_v16 = vsel %vm5351_vm11, %v204_v12, 0.0  ;;  %v231_v57 = vsel %vm7283_vm10, %v4607_v43, %v4606_v19 }
  0xa2   :  { %v7280_v38 = vsel %vm5373_vm6, 4294967295, %v7279_v38  ;;  %v203_v41 = vsel %vm7282_vm14, %v4592_v62, %v4597_v52  ;;  %vm7284_vm8 = vcmp.lt.s32.totalorder %v5092_v48, 15  ;;  %v4611_v60 = vunpack.i.l.bf16 %v5344_v47  ;;  %vm7285_vm1 = vmmov %vm7283_vm10  ;;  %v237_v62 = vpop.permute.xlu1 %236 }
  0xa3   :  { %7281 = vst [vmem:[#allocation15_spill] sm:$0xff] %v7280_v38  ;;  %v232_v46 = vsel %vm7284_vm8, %v230_v11, 0.0  ;;  %v297_v36 = vrot.slane %v190_v54, 3  ;;  %v229_v25 = vsel %vm7285_vm1, %v4601_v39, %v4602_v14  ;;  %v4612_v52 = vunpack.i.h.bf16 %v5344_v47  ;;  %vm7287_vm10 = vmmov %vm7285_vm1  ;;  %v243_v11 = vpop.permute.xlu0 %242 }
  0xa4   :  { %vm7286_vm14 = vcmask 1042432   ;;  %v298_v63 = vrot.slane %v191_v27, 3  ;;  %v217_v12 = vsel %vm5373_vm6, %v203_v41, 0.0  ;;  %v309_v20 = vrot.slane %v215_v21, 2 }
  0xa5   :  { %v340_v5 = vsel %vm7286_vm14, %v335_v61, %v285_v2  ;;  %v228_v19 = vsel %vm7287_vm10, %v4602_v14, %v4607_v43  ;;  %v312_v6 = vrot.slane %v218_v3, 2  ;;  %v310_v23 = vrot.slane %v216_v16, 2 }
  0xa6   :  { %vm7288_vm8 = vcmp.lt.s32.totalorder %v5096_v50, 15  ;;  %v321_v39 = vrot.slane %v232_v46, 1  ;;  %vm7289_vm1 = vcmp.lt.s32.totalorder %v5092_v48, 15  ;;  %vm7290_vm12 = vcmp.lt.s32.totalorder %v5030_v15, 15 }
  0xa7   :  { %v235_v54 = vsel %vm7288_vm8, %v231_v57, 0.0  ;;  %vm5402_vm14 = vmand %vm7290_vm12, %vm7289_vm1  ;;  %v7291_v2 = vmov 0  ;;  %vm7294_vm6 = vcmp.lt.s32.totalorder %v5026_v13, 111  ;;  %vm7295_vm10 = vcmask 1043456  }
  0xa8   :  { %v7292_v2 = vsel %vm5402_vm14, 4294967295, %v7291_v2  ;;  %v247_v47 = vsel %vm7294_vm6, %v237_v62, %v4611_v60  ;;  %v345_v43 = vsel %vm7295_vm10, %v340_v5, %v5007_v7  ;;  %vm7296_vm13 = vmmov %vm7288_vm8  ;;  %v7297_v3 = vmov 0 }
  0xa9   :  { %7293 = vst [vmem:[#allocation16_spill] sm:$0xff] %v7292_v2  ;;  %vm5414_vm8 = vmand %vm5151_vm3, %vm7296_vm13  ;;  %vm7300_vm7 = vcmask 1042432   ;;  %vm7301_vm12 = vcmp.lt.s32.totalorder %v5068_v33, 15  ;;  %vm7302_vm1 = vcmp.lt.s32.totalorder %v5094_v49, 15  ;;  %vm7303_vm6 = vcmask 1044480  }
  0xaa   :  { %v7298_v3 = vsel %vm5414_vm8, 4294967295, %v7297_v3  ;;  %v343_v14 = vsel %vm7300_vm7, %v338_v29, %v288_v18  ;;  %v233_v61 = vsel %vm7301_vm12, %v229_v25, 0.0  ;;  %v234_v27 = vsel %vm7302_vm1, %v228_v19, 0.0  ;;  %vm7306_vm13 = vmmov %vm7301_vm12 }
  0xab   :  { %7299 = vst [vmem:[#allocation17_spill] sm:$0xff] %v7298_v3  ;;  %v350_v41 = vsel %vm7303_vm6, %v345_v43, %v297_v36  ;;  %vm7304_vm10 = vcmp.lt.s32.totalorder %v5026_v13, 111  ;;  %vm5432_vm3 = vmand %vm5078_vm4, %vm7306_vm13  ;;  %v7307_v18 = vmov 0  ;;  %v324_v25 = vrot.slane %v235_v54, 1 }
  0xac   :  { %v248_v7 = vsel %vm7304_vm10, %v243_v11, %v237_v62  ;;  %vm7305_vm11 = vmmov %vm7304_vm10  ;;  %v7308_v18 = vsel %vm5432_vm3, 4294967295, %v7307_v18  ;;  %vm7310_vm7 = vcmask 1045504   ;;  %v322_v16 = vrot.slane %v233_v61, 1  ;;  %v49_v61 = vld [vmem:[%s7091_s1] sm:$0xff]  ;;  %s4912_s1 = smov 8  }
  0xad   :  { %v246_v21 = vsel %vm7305_vm11, %v4611_v60, %v4612_v52  ;;  %7309 = vst [vmem:[#allocation18_spill] sm:$0xff] %v7308_v18  ;;  %v355_v29 = vsel %vm7310_vm7, %v350_v41, %v309_v20  ;;  %vm7311_vm12 = vcmask 1042432   ;;  %v253_v46 = vsel %vm5402_vm14, %v247_v47, 0.0 }
  0xae   :  { %v341_v57 = vsel %vm7311_vm12, %v5213_v59, %v5272_v35  ;;  %vm7312_vm11 = vcmask 1046528   ;;  %vm7313_vm1 = vcmask 1043456   ;;  %v256_v5 = vsel %vm5414_vm8, %v248_v7, 0.0 }
  0xaf   :  { %v360_v60 = vsel %vm7312_vm11, %v355_v29, %v321_v39  ;;  %v348_v36 = vsel %vm7313_vm1, %v343_v14, %v5013_v10  ;;  %vm7314_vm6 = vmmov %vm7313_vm1  ;;  %vm7315_vm10 = vcmask 1044480   ;;  %v254_v19 = vsel %vm5432_vm3, %v246_v21, 0.0 }
  0xb0   :  { %v346_v62 = vsel %vm7314_vm6, %v341_v57, %v5009_v8  ;;  %v353_v20 = vsel %vm7315_vm10, %v348_v36, %v300_v58  ;;  %vm7316_vm13 = vmmov %vm7315_vm10  ;;  %v311_v35 = vrot.slane %v217_v12, 2  ;;  %vm7317_vm7 = vcmp.lt.s32.totalorder %v5094_v49, 15 }
  0xb1   :  { %v351_v59 = vsel %vm7316_vm13, %v346_v62, %v298_v63  ;;  %vm5457_vm12 = vmand %vm5139_vm15, %vm7317_vm7  ;;  %v7318_v10 = vmov 0  ;;  %vm7321_vm11 = vcmask 1042432   ;;  %vm7322_vm1 = vcmask 1045504  }
  0xb2   :  { %v7319_v10 = vsel %vm5457_vm12, 4294967295, %v7318_v10  ;;  %v342_v8 = vsel %vm7321_vm11, %v5316_v56, %v5305_v17  ;;  %v358_v58 = vsel %vm7322_vm1, %v353_v20, %v312_v6  ;;  %vm7323_vm6 = vmmov %vm7322_vm1  ;;  %v4056_v39 = vpack.c.bf16 %v253_v46, %v360_v60 }
  0xb3   :  { %7320 = vst [vmem:[#allocation19_spill] sm:$0xff] %v7319_v10  ;;  %v356_v54 = vsel %vm7323_vm6, %v351_v59, %v310_v23  ;;  %vm7324_vm10 = vcmp.lt.s32.totalorder %v5026_v13, 111  ;;  %vm7325_vm13 = vcmask 1046528   ;;  %vm7152_vm7 = vmmov 1  }
  0xb4   :  { %v245_v63 = vsel %vm7324_vm10, %v4612_v52, %v243_v11  ;;  %v363_v12 = vsel %vm7325_vm13, %v358_v58, %v324_v25  ;;  %vm7326_vm8 = vmmov %vm7325_vm13  ;;  %vm7327_vm14 = vcmask 1040384   ;;  %v323_v17 = vrot.slane %v234_v27, 1 }
  0xb5   :  { %v361_v47 = vsel %vm7326_vm8, %v356_v54, %v322_v16  ;;  %vm5472_vm3 = vmpackc.low %vm7327_vm14, %vm7152_vm7  ;;  %v4059_v56 = vpack.c.bf16 %v256_v5, %v363_v12  ;;  %vm7330_vm11 = vcmask 1043456   ;;  %v255_v52 = vsel %vm5457_vm12, %v245_v63, 0.0 }
  0xb6   :  { %v4053_v6 = vpack.c.bf16 %v254_v19, %v361_v47  ;;  %v347_v23 = vsel %vm7330_vm11, %v342_v8, %v5011_v9  ;;  %vm7331_vm1 = vcmask 1044480   ;;  %vm7332_vm8 = vmmov %vm7323_vm6  ;;  %vm369_vm14 = vcmask 72704  }
  0xb7   :  { %v352_v11 = vsel %vm7331_vm1, %v347_v23, %v5359_v0  ;;  %vm7333_vm6 = vmmov %vm7325_vm13  ;;  %v7334_v0 = vmov 0.0   ;;  %v7161_v41 = vshra.s32 %v5026_v13, 6  ;;  %v645_v7 = vand.u32 63, %v5026_v13 }
  0xb8   :  { %4055 = vmatprep.subr.msk.bf16.mxu1 %vm5472_vm3, %v4053_v6  ;;  %v357_v14 = vsel %vm7332_vm8, %v352_v11, %v311_v35  ;;  %v596_v46 = vadd.s32 128, %v4996_v1  ;;  %v597_v60 = vadd.s32 136, %v4996_v1  ;;  %v628_v62 = vadd.s32 384, %v4996_v1 }
  0xb9   :  { %4058 = vmatpush1.bf16.msk.msra.mxu1 %vm5472_vm3, %v4056_v39  ;;  %v362_v9 = vsel %vm7333_vm6, %v357_v14, %v323_v17  ;;  %v5498_v21 = vshra.s32 %v645_v7, 3  ;;  %v5500_v25 = vand.u32 7, %v645_v7  ;;  %v648_v29 = vshll.u32 %v7161_v41, 8 }
  0xba   :  { %4061 = vmatprep.subr.msk.bf16.mxu1 %vm5472_vm3, %v4059_v56  ;;  %v4062_v27 = vpack.c.bf16 %v255_v52, %v362_v9  ;;  %v629_v5 = vadd.s32 392, %v4996_v1  ;;  %v5511_v20 = vadd.s32 8, %v4996_v1  ;;  %v612_v19 = vadd.s32 256, %v4996_v1 }
  0xbb   :  { %v649_v16 = vshll.u32 %v5498_v21, 5  ;;  %v651_v57 = vshll.u32 %v5500_v25, 1  ;;  %v613_v59 = vadd.s32 264, %v4996_v1  ;;  %v598_v35 = vadd.s32 144, %v4996_v1 }
  0xbc   :  { %3349 = vmatmul.mubr.msk.f32.vlgmr.msra.gmra.mrb[0].mxu1 %vm369_vm14, %v49_v61  ;;  %v599_v58 = vadd.s32 152, %v4996_v1  ;;  %v630_v54 = vadd.s32 400, %v4996_v1  ;;  %v631_v39 = vadd.s32 408, %v4996_v1  ;;  %v5522_v63 = vadd.s32 16, %v4996_v1 }
  0xbd   :  { %4064 = vmatpush1.bf16.msk.msra.mxu1 %vm5472_vm3, %v4062_v27  ;;  %520 = vmatprep.mubr.f32.mxu1 %v7334_v0  ;;  %v650_v36 = vadd.s32 %v649_v16, %v648_v29  ;;  %v5525_v12 = vadd.s32 24, %v4996_v1  ;;  %v614_v47 = vadd.s32 272, %v4996_v1  ;;  %v615_v43 = vadd.s32 280, %v4996_v1 }
  0xbe   :  { %v7170_v17 = vmov 1.0|1.0   ;;  %v600_v56 = vadd.s32 160, %v4996_v1  ;;  %v601_v6 = vadd.s32 168, %v4996_v1  ;;  %v632_v23 = vadd.s32 416, %v4996_v1 }
  0xbf   :  { %v5516_v8 = vadd.s32 %v651_v57, %v650_v36  ;;  %v633_v52 = vadd.s32 424, %v4996_v1  ;;  %v5559_v11 = vadd.s32 32, %v4996_v1  ;;  %v5562_v14 = vadd.s32 40, %v4996_v1  ;;  %v367_v57 = vpop.permute.xlu1 %366 }
  0xc0   :  { %3352 = vmatmul.mubr.msk.f32.vlgmr.msra.gmra.mrb[2].mxu1 %vm369_vm14, %v49_v61  ;;  %v616_v61 = vadd.s32 288, %v4996_v1  ;;  %v617_v9 = vadd.s32 296, %v4996_v1  ;;  %v602_v27 = vadd.s32 176, %v4996_v1  ;;  %v603_v7 = vadd.s32 184, %v4996_v1 }
  0xc1   :  { %vm669_vm3 = vcmp.eq.s32.totalorder %v596_v46, %v5516_v8  ;;  %vm670_vm10 = vcmp.eq.s32.totalorder %v597_v60, %v5516_v8  ;;  %vm701_vm13 = vcmp.eq.s32.totalorder %v628_v62, %v5516_v8  ;;  %vm702_vm11 = vcmp.eq.s32.totalorder %v629_v5, %v5516_v8 }
  0xc2   :  { %vm4065_vm1 = vmpackc.low %vm670_vm10, %vm669_vm3  ;;  %vm653_vm8 = vcmp.eq.s32.totalorder %v4996_v1, %v5516_v8  ;;  %vm654_vm14 = vcmp.eq.s32.totalorder %v5511_v20, %v5516_v8  ;;  %vm686_vm7 = vcmp.eq.s32.totalorder %v613_v59, %v5516_v8  ;;  %vm671_vm15 = vcmp.eq.s32.totalorder %v598_v35, %v5516_v8 }
  0xc3   :  { %4066 = vmatprep.subr.msk.bf16.mxu0 %vm4065_vm1, %v7170_v17  ;;  %vm4097_vm12 = vmpackc.low %vm702_vm11, %vm701_vm13  ;;  %vm672_vm4 = vcmp.eq.s32.totalorder %v599_v58, %v5516_v8  ;;  %vm703_vm10 = vcmp.eq.s32.totalorder %v630_v54, %v5516_v8  ;;  %vm704_vm6 = vcmp.eq.s32.totalorder %v631_v39, %v5516_v8  ;;  %vm7335_vm13 = vcmp.eq.s32.totalorder %v612_v19, %v5516_v8 }
  0xc4   :  { %4098 = vmatprep.subr.msk.bf16.mxu1 %vm4097_vm12, %v7170_v17  ;;  %vm4067_vm3 = vmpackc.low %vm654_vm14, %vm653_vm8  ;;  %vm655_vm1 = vcmp.eq.s32.totalorder %v5522_v63, %v5516_v8  ;;  %vm656_vm12 = vcmp.eq.s32.totalorder %v5525_v12, %v5516_v8  ;;  %vm688_vm14 = vcmp.eq.s32.totalorder %v615_v43, %v5516_v8  ;;  %vm706_vm9 = vcmp.eq.s32.totalorder %v633_v52, %v5516_v8 }
  0xc5   :  { %4068 = vmatpush3.bf16.msk.msra.mxu0 %vm4067_vm3, %v7170_v17  ;;  %vm4099_vm11 = vmpackc.low %vm686_vm7, %vm7335_vm13  ;;  %vm687_vm7 = vcmp.eq.s32.totalorder %v614_v47, %v5516_v8  ;;  %vm673_vm13 = vcmp.eq.s32.totalorder %v600_v56, %v5516_v8  ;;  %vm689_vm2 = vcmp.eq.s32.totalorder %v616_v61, %v5516_v8  ;;  %v634_v29 = vadd.s32 432, %v4996_v1 }
  0xc6   :  { %4100 = vmatpush3.bf16.msk.msra.mxu1 %vm4099_vm11, %v7170_v17  ;;  %vm4069_vm8 = vmpackc.low %vm672_vm4, %vm671_vm15  ;;  %vm674_vm11 = vcmp.eq.s32.totalorder %v601_v6, %v5516_v8  ;;  %vm705_vm15 = vcmp.eq.s32.totalorder %v632_v23, %v5516_v8  ;;  %v635_v16 = vadd.s32 440, %v4996_v1  ;;  %v5603_v46 = vadd.s32 48, %v4996_v1 }
  0xc7   :  { %4070 = vmatprep.subr.msk.bf16.mxu0 %vm4069_vm8, %v7170_v17  ;;  %vm4101_vm3 = vmpackc.low %vm704_vm6, %vm703_vm10  ;;  %vm657_vm6 = vcmp.eq.s32.totalorder %v5559_v11, %v5516_v8  ;;  %vm658_vm10 = vcmp.eq.s32.totalorder %v5562_v14, %v5516_v8  ;;  %v5606_v60 = vadd.s32 56, %v4996_v1  ;;  %v618_v36 = vadd.s32 304, %v4996_v1 }
  0xc8   :  { %4102 = vmatprep.subr.msk.bf16.mxu1 %vm4101_vm3, %v7170_v17  ;;  %vm4071_vm4 = vmpackc.low %vm656_vm12, %vm655_vm1  ;;  %vm690_vm1 = vcmp.eq.s32.totalorder %v617_v9, %v5516_v8  ;;  %v619_v62 = vadd.s32 312, %v4996_v1  ;;  %v604_v58 = vadd.s32 192, %v4996_v1  ;;  %v605_v54 = vadd.s32 200, %v4996_v1 }
  0xc9   :  { %4072 = vmatpush3.bf16.msk.msra.mxu0 %vm4071_vm4, %v7170_v17  ;;  %vm4103_vm8 = vmpackc.low %vm688_vm14, %vm687_vm7  ;;  %vm707_vm14 = vcmp.eq.s32.totalorder %v634_v29, %v5516_v8  ;;  %v636_v39 = vadd.s32 448, %v4996_v1  ;;  %v637_v43 = vadd.s32 456, %v4996_v1  ;;  %v5633_v56 = vadd.s32 64, %v4996_v1 }
  0xca   :  { %4104 = vmatpush3.bf16.msk.msra.mxu1 %vm4103_vm8, %v7170_v17  ;;  %vm4073_vm3 = vmpackc.low %vm674_vm11, %vm673_vm13  ;;  %vm708_vm13 = vcmp.eq.s32.totalorder %v635_v16, %v5516_v8  ;;  %vm660_vm8 = vcmp.eq.s32.totalorder %v5606_v60, %v5516_v8  ;;  %v5636_v6 = vadd.s32 72, %v4996_v1  ;;  %v620_v16 = vadd.s32 320, %v4996_v1 }
  0xcb   :  { %4074 = vmatprep.subr.msk.bf16.mxu0 %vm4073_vm3, %v7170_v17  ;;  %vm4105_vm12 = vmpackc.low %vm706_vm9, %vm705_vm15  ;;  %vm676_vm9 = vcmp.eq.s32.totalorder %v603_v7, %v5516_v8  ;;  %vm659_vm15 = vcmp.eq.s32.totalorder %v5603_v46, %v5516_v8  ;;  %v5741_v41 = vadd.s32 120, %v4996_v1  ;;  %vm1085_vm0 = vcmp.eq.s32.totalorder %v5603_v46, %v5042_v24 }
  0xcc   :  { %4106 = vmatprep.subr.msk.bf16.mxu1 %vm4105_vm12, %v7170_v17  ;;  %vm4075_vm4 = vmpackc.low %vm658_vm10, %vm657_vm6  ;;  %vm691_vm6 = vcmp.eq.s32.totalorder %v618_v36, %v5516_v8  ;;  %vm692_vm10 = vcmp.eq.s32.totalorder %v619_v62, %v5516_v8  ;;  %v621_v36 = vadd.s32 328, %v4996_v1 }
  0xcd   :  { %4076 = vmatpush3.bf16.msk.msra.mxu0 %vm4075_vm4, %v7170_v17  ;;  %vm4107_vm7 = vmpackc.low %vm690_vm1, %vm689_vm2  ;;  %vm675_vm2 = vcmp.eq.s32.totalorder %v602_v27, %v5516_v8  ;;  %vm677_vm4 = vcmp.eq.s32.totalorder %v604_v58, %v5516_v8  ;;  %v639_v58 = vadd.s32 472, %v4996_v1 }
  0xce   :  { %4108 = vmatpush3.bf16.msk.msra.mxu1 %vm4107_vm7, %v7170_v17  ;;  %vm4077_vm11 = vmpackc.low %vm676_vm9, %vm675_vm2  ;;  %vm678_vm7 = vcmp.eq.s32.totalorder %v605_v54, %v5516_v8  ;;  %vm709_vm2 = vcmp.eq.s32.totalorder %v636_v39, %v5516_v8  ;;  %v5672_v54 = vadd.s32 80, %v4996_v1 }
  0xcf   :  { %4078 = vmatprep.subr.msk.bf16.mxu0 %vm4077_vm11, %v7170_v17  ;;  %vm4109_vm3 = vmpackc.low %vm708_vm13, %vm707_vm14  ;;  %vm710_vm14 = vcmp.eq.s32.totalorder %v637_v43, %v5516_v8  ;;  %vm661_vm13 = vcmp.eq.s32.totalorder %v5633_v56, %v5516_v8  ;;  %vm662_vm11 = vcmp.eq.s32.totalorder %v5636_v6, %v5516_v8  ;;  %v5683_v43 = vadd.s32 88, %v4996_v1 }
  0xd0   :  { %4110 = vmatprep.subr.msk.bf16.mxu1 %vm4109_vm3, %v7170_v17  ;;  %vm4079_vm1 = vmpackc.low %vm660_vm8, %vm659_vm15 }
  0xd1   :  { %4080 = vmatpush3.bf16.msk.msra.mxu0 %vm4079_vm1, %v7170_v17  ;;  %vm4111_vm12 = vmpackc.low %vm692_vm10, %vm691_vm6  ;;  %vm693_vm6 = vcmp.eq.s32.totalorder %v620_v16, %v5516_v8  ;;  %vm694_vm10 = vcmp.eq.s32.totalorder %v621_v36, %v5516_v8  ;;  %v608_v16 = vadd.s32 224, %v4996_v1  ;;  %v609_v36 = vadd.s32 232, %v4996_v1 }
  0xd2   :  { %4112 = vmatpush3.bf16.msk.msra.mxu1 %vm4111_vm12, %v7170_v17  ;;  %vm4081_vm9 = vmpackc.low %vm678_vm7, %vm677_vm4 }
  0xd3   :  { %4082 = vmatprep.subr.msk.bf16.mxu0 %vm4081_vm9, %v7170_v17  ;;  %vm4113_vm15 = vmpackc.low %vm710_vm14, %vm709_vm2  ;;  %vm712_vm2 = vcmp.eq.s32.totalorder %v639_v58, %v5516_v8  ;;  %vm663_vm9 = vcmp.eq.s32.totalorder %v5672_v54, %v5516_v8  ;;  %v5710_v58 = vadd.s32 104, %v4996_v1 }
  0xd4   :  { %4114 = vmatprep.subr.msk.bf16.mxu1 %vm4113_vm15, %v7170_v17  ;;  %vm4083_vm8 = vmpackc.low %vm662_vm11, %vm661_vm13  ;;  %vm664_vm13 = vcmp.eq.s32.totalorder %v5683_v43, %v5516_v8 }
  0xd5   :  { %4084 = vmatpush3.bf16.msk.msra.mxu0 %vm4083_vm8, %v7170_v17  ;;  %vm4115_vm1 = vmpackc.low %vm694_vm10, %vm693_vm6  ;;  %vm681_vm6 = vcmp.eq.s32.totalorder %v608_v16, %v5516_v8  ;;  %vm682_vm10 = vcmp.eq.s32.totalorder %v609_v36, %v5516_v8  ;;  %v610_v16 = vadd.s32 240, %v4996_v1  ;;  %v611_v36 = vadd.s32 248, %v4996_v1 }
  0xd6   :  { %4116 = vmatpush3.bf16.msk.msra.mxu1 %vm4115_vm1, %v7170_v17  ;;  %vm4087_vm11 = vmpackc.low %vm664_vm13, %vm663_vm9  ;;  %vm666_vm9 = vcmp.eq.s32.totalorder %v5710_v58, %v5516_v8 }
 0x18f   :  { %v451_v5 = vpop.f32.mrb[0].mxu1 }
 0x190   :  { %v5620_v19 = vadd.f32 %v451_v5, %v367_v57  ;;  %v453_v59 = vpop.f32.mrb[1].mxu1  ;;  %v607_v5 = vadd.s32 216, %v4996_v1 }
 0x191   :  { %v5623_v35 = vadd.f32 %v453_v59, %v367_v57  ;;  %v638_v59 = vadd.s32 464, %v4996_v1 }
 0x192   :  { %v7162_v47 = vmax.f32 %v5620_v19, 0.0  ;;  %vm680_vm12 = vcmp.eq.s32.totalorder %v607_v5, %v5516_v8  ;;  %v641_v5 = vadd.s32 488, %v4996_v1 }
 0x193   :  { %v7164_v23 = vmax.f32 %v5623_v35, 0.0  ;;  %v522_v52 = vpop.f32.mrb[2].mxu1  ;;  %vm711_vm7 = vcmp.eq.s32.totalorder %v638_v59, %v5516_v8  ;;  %v5700_v59 = vadd.s32 96, %v4996_v1 }
 0x194   :  { %v5643_v61 = vadd.f32 %v522_v52, %v367_v57  ;;  %v524_v9 = vpop.f32.mrb[3].mxu1  ;;  %vm4117_vm14 = vmpackc.low %vm712_vm2, %vm711_vm7  ;;  %v622_v52 = vadd.s32 336, %v4996_v1 }
 0x195   :  { %v5650_v27 = vadd.f32 %v524_v9, %v367_v57  ;;  %v4614_v7 = vpack.i.bf16 %v7164_v23, %v7162_v47  ;;  %v606_v57 = vadd.s32 208, %v4996_v1  ;;  %v623_v9 = vadd.s32 344, %v4996_v1  ;;  %4118 = vmatprep.subr.msk.bf16.mxu1 %vm4117_vm14, %v7170_v17  ;;  %vm4089_vm7 = vmpackc.low %vm682_vm10, %vm681_vm6 }
 0x196   :  { %v7165_v29 = vmax.f32 %v5643_v61, 0.0  ;;  %vm695_vm15 = vcmp.eq.s32.totalorder %v622_v52, %v5516_v8  ;;  %v624_v52 = vadd.s32 352, %v4996_v1 }
 0x197   :  { %v7163_v62 = vmax.f32 %v5650_v27, 0.0  ;;  %4615 = vrot.lane.b32.xlu0 %v4614_v7, %s4904_s18  ;;  %vm679_vm3 = vcmp.eq.s32.totalorder %v606_v57, %v5516_v8  ;;  %v640_v57 = vadd.s32 480, %v4996_v1  ;;  %vm696_vm8 = vcmp.eq.s32.totalorder %v623_v9, %v5516_v8 }
 0x198   :  { %vm4085_vm4 = vmpackc.low %vm680_vm12, %vm679_vm3  ;;  %vm714_vm12 = vcmp.eq.s32.totalorder %v641_v5, %v5516_v8  ;;  %v625_v9 = vadd.s32 360, %v4996_v1  ;;  %v5727_v5 = vadd.s32 112, %v4996_v1  ;;  %vm697_vm13 = vcmp.eq.s32.totalorder %v624_v52, %v5516_v8 }
 0x199   :  { %v4629_v39 = vpack.i.bf16 %v7163_v62, %v7165_v29  ;;  %4086 = vmatprep.subr.msk.bf16.mxu0 %vm4085_vm4, %v7170_v17  ;;  %vm4119_vm3 = vmpackc.low %vm696_vm8, %vm695_vm15  ;;  %vm713_vm1 = vcmp.eq.s32.totalorder %v640_v57, %v5516_v8  ;;  %vm665_vm4 = vcmp.eq.s32.totalorder %v5700_v59, %v5516_v8  ;;  %v642_v57 = vadd.s32 496, %v4996_v1 }
 0x19a   :  { %4088 = vmatpush3.bf16.msk.msra.mxu0 %vm4087_vm11, %v7170_v17  ;;  %4120 = vmatpush3.bf16.msk.msra.mxu1 %vm4119_vm3, %v7170_v17  ;;  %vm4121_vm2 = vmpackc.low %vm714_vm12, %vm713_vm1  ;;  %vm698_vm11 = vcmp.eq.s32.totalorder %v625_v9, %v5516_v8  ;;  %vm683_vm15 = vcmp.eq.s32.totalorder %v610_v16, %v5516_v8  ;;  %vm684_vm8 = vcmp.eq.s32.totalorder %v611_v36, %v5516_v8  ;;  %v626_v52 = vadd.s32 368, %v4996_v1 }
 0x19b   :  { %4630 = vrot.lane.b32.xlu1 %v4629_v39, %s4904_s18  ;;  %4620 = vrot.lane.b32.xlu0 %v4614_v7, %s4906_s20  ;;  %vm4091_vm14 = vmpackc.low %vm666_vm9, %vm665_vm4  ;;  %vm715_vm10 = vcmp.eq.s32.totalorder %v642_v57, %v5516_v8  ;;  %vm667_vm1 = vcmp.eq.s32.totalorder %v5727_v5, %v5516_v8  ;;  %v627_v9 = vadd.s32 376, %v4996_v1 }
 0x19c   :  { %4090 = vmatprep.subr.msk.bf16.mxu0 %vm4089_vm7, %v7170_v17  ;;  %4122 = vmatprep.subr.msk.bf16.mxu1 %vm4121_vm2, %v7170_v17  ;;  %vm4123_vm6 = vmpackc.low %vm698_vm11, %vm697_vm13  ;;  %vm668_vm7 = vcmp.eq.s32.totalorder %v5741_v41, %v5516_v8  ;;  %vm699_vm9 = vcmp.eq.s32.totalorder %v626_v52, %v5516_v8  ;;  %vm7336_vm11 = vcmp.lt.s32.totalorder %v5026_v13, 127 }
 0x19d   :  { %vm4093_vm12 = vmpackc.low %vm684_vm8, %vm683_vm15 }
 0x19e   :  { %4092 = vmatpush3.bf16.msk.msra.mxu0 %vm4091_vm14, %v7170_v17  ;;  %4124 = vmatpush3.bf16.msk.msra.mxu1 %vm4123_vm6, %v7170_v17  ;;  %vm4095_vm2 = vmpackc.low %vm668_vm7, %vm667_vm1  ;;  %vm700_vm14 = vcmp.eq.s32.totalorder %v627_v9, %v5516_v8 }
 0x19f   :  { %4635 = vrot.lane.b32.xlu1 %v4629_v39, %s4906_s20  ;;  %4625 = vrot.lane.b32.xlu0 %v4614_v7, %s7192_s21  ;;  %v643_v7 = vadd.s32 504, %v4996_v1  ;;  %vm4127_vm13 = vmpackc.low %vm700_vm14, %vm699_vm9  ;;  %vm970_vm14 = vcmask 588800  }
 0x1a0   :  { %4094 = vmatprep.subr.msk.bf16.mxu0 %vm4093_vm12, %v7170_v17  ;;  %vm7337_vm15 = vmmov %vm7336_vm11 }
 0x1a1   :  { %vm716_vm3 = vcmp.eq.s32.totalorder %v643_v7, %v5516_v8  ;;  %vm7338_vm8 = vmmov %vm7336_vm11 }
 0x1a2   :  { %vm4125_vm4 = vmpackc.low %vm716_vm3, %vm715_vm10  ;;  %4096 = vmatpush3.bf16.msk.msra.mxu0 %vm4095_vm2, %v7170_v17  ;;  %vm7340_vm10 = vcmp.lt.s32.totalorder %v5026_v13, 111  ;;  %vm7342_vm3 = vcmp.lt.s32.totalorder %v5026_v13, 112 }
 0x1a3   :  { %4640 = vrot.lane.b32.xlu1 %v4629_v39, %s7192_s21  ;;  %4126 = vmatprep.subr.msk.bf16.mxu1 %vm4125_vm4, %v7170_v17  ;;  %vm7339_vm6 = vmmov %vm7338_vm8 }
 0x1a4   :  { %4128 = vmatpush3.bf16.msk.msra.mxu1 %vm4127_vm13, %v7170_v17  ;;  %vm7343_vm1 = vmmov %vm7342_vm3 }
 0x1a5   :  { %vm7344_vm12 = vmmov %vm7343_vm1 }
 0x1a6   :  { %vm7346_vm4 = vmmov %vm7343_vm1 }
 0x1a7   :  { %vm7347_vm7 = vmmov %vm7340_vm10 }
 0x1a8   :  { %vm7348_vm2 = vmmov %vm7347_vm7 }
 0x1a9   :  { %vm7349_vm9 = vmmov %vm7348_vm2 }
 0x209   :  { %v4616_v39 = vpop.permute.xlu0 %4615 }
 0x20a   :  { %v4618_v47 = vunpack.i.h.bf16 %v4616_v39  ;;  %v4617_v62 = vunpack.i.l.bf16 %v4616_v39 }
 0x20c   :  { %v541_v38 = vsel %vm7338_vm8, %v4617_v62, %v4618_v47 }
 0x20d   :  { %v4631_v16 = vpop.permute.xlu1 %4630  ;;  %v4621_v36 = vpop.permute.xlu0 %4620 }
 0x20e   :  { %v4633_v57 = vunpack.i.h.bf16 %v4631_v16  ;;  %v4632_v7 = vunpack.i.l.bf16 %v4631_v16  ;;  %v4623_v10 = vunpack.i.h.bf16 %v4621_v36  ;;  %v4622_v3 = vunpack.i.l.bf16 %v4621_v36 }
 0x210   :  { %v539_v8 = vsel %vm7336_vm11, %v4632_v7, %v4633_v57  ;;  %v540_v17 = vsel %vm7337_vm15, %v4618_v47, %v4632_v7  ;;  %v542_v39 = vsel %vm7339_vm6, %v4633_v57, %v4617_v62  ;;  %v557_v22 = vsel %vm7342_vm3, %v4622_v3, %v4623_v10 }
 0x211   :  { %v4636_v23 = vpop.permute.xlu1 %4635  ;;  %v4626_v29 = vpop.permute.xlu0 %4625  ;;  %v7345_v62 = vmax.f32 %v5623_v35, 0.0 }
 0x212   :  { %v4628_v2 = vunpack.i.h.bf16 %v4626_v29  ;;  %v4627_v52 = vunpack.i.l.bf16 %v4626_v29  ;;  %v4638_v9 = vunpack.i.h.bf16 %v4636_v23  ;;  %v4637_v18 = vunpack.i.l.bf16 %v4636_v23 }
 0x213   :  { %v7341_v29 = vmax.f32 %v5643_v61, 0.0  ;;  %v544_v57 = vmax.f32 %v7345_v62, %v540_v17  ;;  %v7351_v17 = vmax.f32 %v5620_v19, 0.0  ;;  %v7352_v19 = vmov 0 }
 0x214   :  { %v569_v16 = vsel %vm7340_vm10, %v4627_v52, %v4628_v2  ;;  %v555_v7 = vsel %vm7343_vm1, %v4637_v18, %v4638_v9  ;;  %v558_v47 = vsel %vm7344_vm12, %v4638_v9, %v4622_v3  ;;  %v556_v34 = vsel %vm7346_vm4, %v4623_v10, %v4637_v18 }
 0x215   :  { %v4641_v36 = vpop.permute.xlu1 %4640  ;;  %v545_v4 = vmax.f32 %v7341_v29, %v539_v8  ;;  %v571_v29 = vmax.f32 %v557_v22, %v569_v16  ;;  %v7350_v3 = vmax.f32 %v5650_v27, 0.0  ;;  %v543_v62 = vmax.f32 %v7351_v17, %v541_v38 }
 0x216   :  { %v4643_v23 = vunpack.i.h.bf16 %v4641_v36  ;;  %v4642_v40 = vunpack.i.l.bf16 %v4641_v36  ;;  %vm7360_vm12 = vmmov 1  }
 0x217   :  { %v546_v9 = vmax.f32 %v7350_v3, %v542_v39  ;;  %v575_v32 = vmax.f32 %v543_v62, %v571_v29 }
 0x218   :  { %v567_v61 = vsel %vm7347_vm7, %v4642_v40, %v4643_v23  ;;  %v570_v8 = vsel %vm7348_vm2, %v4643_v23, %v4627_v52  ;;  %v568_v36 = vsel %vm7349_vm9, %v4628_v2, %v4642_v40  ;;  %v2416_v23 = vshra.s32 %v5065_v31, 8 }
 0x219   :  { %v573_v15 = vmax.f32 %v555_v7, %v567_v61  ;;  %v572_v45 = vmax.f32 %v556_v34, %v568_v36  ;;  %v574_v35 = vmax.f32 %v558_v47, %v570_v8 }
 0x21b   :  { %v576_v18 = vmax.f32 %v544_v57, %v572_v45  ;;  %v578_v10 = vmax.f32 %v546_v9, %v574_v35  ;;  %v577_v37 = vmax.f32 %v545_v4, %v573_v15  ;;  %v921_v15 = vld [vmem:[%s7092_s3] sm:$0xff]  ;;  %v924_v45 = vld [vmem:[%s7093_s4 + $0x8] sm:$0xff] }
 0x21c   :  { %v923_v4 = vld [vmem:[%s7093_s4] sm:$0xff] }
 0x21d   :  { %845 = vmatprep.mubr.f32.mxu0 %v576_v18  ;;  %915 = vmatprep.mubr.f32.mxu1 %v578_v10  ;;  %v7363_v10 = vmov 0 }
 0x21e   :  { %846 = vmatmul.mubr.f32.vlgmr.msra.gmra.mrb[0].mxu0 %v575_v32  ;;  %916 = vmatmul.mubr.f32.vlgmr.msra.gmra.mrb[4].mxu1 %v577_v37  ;;  %v926_v32 = vshra.s32 %v5026_v13, 3  ;;  %v925_v37 = vand.u32 7, %v5026_v13 }
 0x21f   :  { %3902 = vmatprep.mubr.msk.f32.mxu0 %vm970_vm14, %v921_v15 }
 0x220   :  { %v5809_v38 = vand.u32 7, %v926_v32  ;;  %vm5811_vm13 = vcmp.ge.s32.totalorder %v925_v37, 1  ;;  %vm5824_vm8 = vcmp.lt.s32.totalorder %v925_v37, 7 }
 0x221   :  { %v7353_v19 = vsel %vm5811_vm13, 4294967295, %v7352_v19  ;;  %vm4142_vm4 = vmpackc.low %vm5824_vm8, %vm7360_vm12  ;;  %vm1081_vm12 = vcmp.eq.s32.totalorder %v5522_v63, %v5042_v24 }
 0x222   :  { %vm7188_vm11 = vcmp.ge.s32.totalorder %v5809_v38, 1  ;;  %vm7187_vm1 = vcmp.lt.s32.totalorder %v5809_v38, 7 }
 0x223   :  { %vm5820_vm15 = vmand %vm5811_vm13, %vm7188_vm11 }
 0x224   :  { %vm4130_vm6 = vmpackc.low %vm7188_vm11, %vm5820_vm15 }
 0x225   :  { %vm5836_vm10 = vmand %vm5824_vm8, %vm7188_vm11  ;;  %vm1083_vm11 = vcmp.eq.s32.totalorder %v5559_v11, %v5042_v24 }
 0x226   :  { %vm4136_vm3 = vmpackc.low %vm5811_vm13, %vm5836_vm10 }
 0x227   :  { %vm5852_vm7 = vmand %vm5811_vm13, %vm7187_vm1 }
 0x228   :  { %vm4148_vm2 = vmpackc.low %vm7187_vm1, %vm5852_vm7 }
 0x229   :  { %vm5864_vm9 = vmand %vm5824_vm8, %vm7187_vm1 }
 0x22a   :  { %v7364_v10 = vsel %vm5864_vm9, 4294967295, %v7363_v10 }
 0x2f1   :  { %v3717_v52 = vpop.f32.mrb[0].mxu0  ;;  %v3752_v40 = vpop.f32.mrb[4].mxu1 }
 0x2f2   :  { %v3718_v22 = vpop.f32.mrb[1].mxu0  ;;  %v3753_v2 = vpop.f32.mrb[5].mxu1 }
 0x2f3   :  { %v3719_v34 = vadd.f32 %v3718_v22, %v3717_v52  ;;  %v3754_v16 = vadd.f32 %v3753_v2, %v3752_v40  ;;  %v922_v40 = vld [vmem:[%s7092_s3 + $0x8] sm:$0xff]  ;;  %v7365_v22 = vmov 1.0|1.0  }
 0x2f5   :  { %v918_v27 = vadd.f32 %v3754_v16, %v3719_v34 }
 0x2f7   :  { %934 = vrot.lane.b32.xlu1 %v918_v27, %s4912_s1  ;;  %928 = vrot.lane.b32.xlu0 %v918_v27, %s4913_s25 }
 0x2fb   :  { %942 = vrot.lane.b32.xlu1 %v918_v27, %s4903_s17  ;;  %937 = vrot.lane.b32.xlu0 %v918_v27, %s4914_s26 }
 0x2ff   :  { %948 = vrot.lane.b32.xlu1 %v918_v27, %s4915_s29  ;;  %945 = vrot.lane.b32.xlu0 %v918_v27, %s4904_s18 }
 0x303   :  { %956 = vrot.lane.b32.xlu1 %v918_v27, %s4916_s30  ;;  %953 = vrot.lane.b32.xlu0 %v918_v27, %s4917_s22 }
 0x307   :  { %967 = vperm.xlu1 %4613, %v924_v45   ;;  %962 = vperm.xlu0 %4644, %v923_v4  }
 0x369   :  { %v935_v7 = vpop.permute.xlu1 %934  ;;  %v929_v47 = vpop.permute.xlu0 %928 }
 0x36a   :  { %v4129_v57 = vpack.c.bf16 %v935_v7, %v929_v47  ;;  %v1194_v7 = vld [vmem:[%s7094_s6] sm:$0xff]  ;;  %v1195_v47 = vld [vmem:[%s7094_s6 + $0x8] sm:$0xff] }
 0x36c   :  { %4131 = vmatprep.subr.msk.bf16.mxu0 %vm4130_vm6, %v4129_v57 }
 0x36d   :  { %v943_v8 = vpop.permute.xlu1 %942  ;;  %4134 = vmatpush3.bf16.msk.msra.mxu0 %vm4130_vm6, %v4129_v57  ;;  %v938_v36 = vpop.permute.xlu0 %937  ;;  %vm1079_vm6 = vcmp.eq.s32.totalorder %v4996_v1, %v5042_v24  ;;  %v1197_v57 = vld [vmem:[%s7094_s6 + $0x18] sm:$0xff] }
 0x36e   :  { %v4135_v29 = vpack.c.bf16 %v943_v8, %v938_v36  ;;  %v1201_v8 = vadd.s32 4294967291, %v5026_v13  ;;  %v1383_v36 = vadd.s32 4294967293, %v5026_v13 }
 0x370   :  { %4137 = vmatprep.subr.msk.bf16.mxu0 %vm4136_vm3, %v4135_v29 }
 0x371   :  { %4140 = vmatpush3.bf16.msk.msra.mxu0 %vm4136_vm3, %v4135_v29  ;;  %v946_v3 = vpop.permute.xlu0 %945  ;;  %v949_v17 = vpop.permute.xlu1 %948  ;;  %vm1080_vm3 = vcmp.eq.s32.totalorder %v5511_v20, %v5042_v24 }
 0x372   :  { %v4141_v9 = vpack.c.bf16 %v946_v3, %v918_v27 }
 0x374   :  { %4143 = vmatprep.subr.msk.bf16.mxu0 %vm4142_vm4, %v4141_v9 }
 0x375   :  { %4146 = vmatpush3.bf16.msk.msra.mxu0 %vm4142_vm4, %v4141_v9  ;;  %v954_v62 = vpop.permute.xlu0 %953  ;;  %v957_v52 = vpop.permute.xlu1 %956  ;;  %vm1082_vm4 = vcmp.eq.s32.totalorder %v5525_v12, %v5042_v24 }
 0x376   :  { %v4147_v18 = vpack.c.bf16 %v954_v62, %v949_v17  ;;  %vm4157_vm1 = vmpackc.low %vm1082_vm4, %vm1081_vm12  ;;  %vm1087_vm12 = vcmp.eq.s32.totalorder %v5633_v56, %v5042_v24  ;;  %vm1088_vm4 = vcmp.eq.s32.totalorder %v5636_v6, %v5042_v24 }
 0x378   :  { %4149 = vmatprep.subr.msk.bf16.mxu0 %vm4148_vm2, %v4147_v18 }
 0x379   :  { %4152 = vmatpush3.bf16.msk.msra.mxu0 %vm4148_vm2, %v4147_v18  ;;  %vm4153_vm2 = vmpackc.low %vm1080_vm3, %vm1079_vm6  ;;  %vm1086_vm6 = vcmp.eq.s32.totalorder %v5606_v60, %v5042_v24 }
 0x37a   :  { %3900 = vmatprep.subr.msk.mxu0 %vm5864_vm9, %v957_v52  ;;  %4154 = vmatprep.subr.msk.bf16.mxu1 %vm4153_vm2, %v7365_v22  ;;  %vm4165_vm3 = vmpackc.low %vm1086_vm6, %vm1085_vm0 }
 0x37b   :  { %4156 = vmatpush3.bf16.msk.msra.mxu1 %vm4153_vm2, %v7365_v22  ;;  %vm1089_vm2 = vcmp.eq.s32.totalorder %v5672_v54, %v5042_v24 }
 0x37c   :  { %4158 = vmatprep.subr.msk.bf16.mxu1 %vm4157_vm1, %v7365_v22 }
 0x37d   :  { %3901 = vmatpush3.msk.msra.mxu0 %vm5864_vm9, %v957_v52 }
 0x37e   :  { %3903 = vmatmul.mubr.msk.f32.vlgmr.msra.gmra.mrb[2].mxu0 %vm970_vm14, %v922_v40  ;;  %vm1084_vm14 = vcmp.eq.s32.totalorder %v5562_v14, %v5042_v24 }
 0x37f   :  { %vm4161_vm5 = vmpackc.low %vm1084_vm14, %vm1083_vm11  ;;  %4160 = vmatpush3.bf16.msk.msra.mxu1 %vm4157_vm1, %v7365_v22  ;;  %vm1090_vm1 = vcmp.eq.s32.totalorder %v5683_v43, %v5042_v24  ;;  %vm1092_vm14 = vcmp.eq.s32.totalorder %v5710_v58, %v5042_v24 }
 0x380   :  { %4162 = vmatprep.subr.msk.bf16.mxu1 %vm4161_vm5, %v7365_v22  ;;  %vm4169_vm11 = vmpackc.low %vm1088_vm4, %vm1087_vm12  ;;  %vm1094_vm12 = vcmp.eq.s32.totalorder %v5741_v41, %v5042_v24 }
 0x381   :  { %vm4173_vm0 = vmpackc.low %vm1090_vm1, %vm1089_vm2  ;;  %vm1203_vm2 = vcmp.eq.s32.totalorder %v5511_v20, %v1201_v8  ;;  %vm1384_vm1 = vcmp.eq.s32.totalorder %v4996_v1, %v1383_v36 }
 0x383   :  { %4164 = vmatpush3.bf16.msk.msra.mxu1 %vm4161_vm5, %v7365_v22  ;;  %vm1091_vm5 = vcmp.eq.s32.totalorder %v5700_v59, %v5042_v24 }
 0x384   :  { %4166 = vmatprep.subr.msk.bf16.mxu1 %vm4165_vm3, %v7365_v22  ;;  %vm4177_vm6 = vmpackc.low %vm1092_vm14, %vm1091_vm5  ;;  %vm1204_vm14 = vcmp.eq.s32.totalorder %v5522_v63, %v1201_v8 }
 0x386   :  { %v963_v2 = vpop.permute.xlu0 %962  ;;  %v968_v34 = vpop.permute.xlu1 %967 }
 0x387   :  { %4168 = vmatpush3.bf16.msk.msra.mxu1 %vm4165_vm3, %v7365_v22  ;;  %vm1093_vm3 = vcmp.eq.s32.totalorder %v5727_v5, %v5042_v24  ;;  %v1196_v24 = vld [vmem:[%s7094_s6 + $0x10] sm:$0xff] }
 0x388   :  { %4170 = vmatprep.subr.msk.bf16.mxu1 %vm4169_vm11, %v7365_v22  ;;  %vm4181_vm4 = vmpackc.low %vm1094_vm12, %vm1093_vm3 }
 0x38b   :  { %4172 = vmatpush3.bf16.msk.msra.mxu1 %vm4169_vm11, %v7365_v22  ;;  %vm1202_vm11 = vcmp.eq.s32.totalorder %v4996_v1, %v1201_v8 }
 0x38c   :  { %4174 = vmatprep.subr.msk.bf16.mxu1 %vm4173_vm0, %v7365_v22  ;;  %vm4185_vm5 = vmpackc.low %vm1203_vm2, %vm1202_vm11  ;;  %vm1387_vm11 = vcmp.eq.s32.totalorder %v5525_v12, %v1383_v36 }
 0x38d   :  { %4186 = vmatprep.subr.msk.bf16.mxu0 %vm4185_vm5, %v7365_v22 }
 0x38e   :  { %4188 = vmatpush3.bf16.msk.msra.mxu0 %vm4185_vm5, %v7365_v22 }
 0x38f   :  { %4176 = vmatpush3.bf16.msk.msra.mxu1 %vm4173_vm0, %v7365_v22  ;;  %vm1385_vm0 = vcmp.eq.s32.totalorder %v5511_v20, %v1383_v36 }
 0x390   :  { %4178 = vmatprep.subr.msk.bf16.mxu1 %vm4177_vm6, %v7365_v22  ;;  %vm5948_vm3 = vmpackc.low %vm1385_vm0, %vm1384_vm1 }
 0x393   :  { %4180 = vmatpush3.bf16.msk.msra.mxu1 %vm4177_vm6, %v7365_v22  ;;  %vm1205_vm6 = vcmp.eq.s32.totalorder %v5525_v12, %v1201_v8  ;;  %v1731_v8 = vadd.s32 4, %v5026_v13 }
 0x394   :  { %4182 = vmatprep.subr.msk.bf16.mxu1 %vm4181_vm4, %v7365_v22  ;;  %vm4189_vm12 = vmpackc.low %vm1205_vm6, %vm1204_vm14 }
 0x395   :  { %4190 = vmatprep.subr.msk.bf16.mxu0 %vm4189_vm12, %v7365_v22  ;;  %vm1732_vm13 = vcmp.eq.s32.totalorder %v4996_v1, %v1731_v8 }
 0x396   :  { %4192 = vmatpush3.bf16.msk.msra.mxu0 %vm4189_vm12, %v7365_v22  ;;  %vm7198_vm12 = vcmask 261120  }
 0x397   :  { %4184 = vmatpush3.bf16.msk.msra.mxu1 %vm4181_vm4, %v7365_v22  ;;  %vm1386_vm4 = vcmp.eq.s32.totalorder %v5522_v63, %v1383_v36 }
 0x398   :  { %4202 = vmatprep.subr.msk.bf16.mxu1 %vm5948_vm3, %v7365_v22  ;;  %vm4205_vm2 = vmpackc.low %vm1387_vm11, %vm1386_vm4 }
 0x451   :  { %v3904_v16 = vpop.f32.mrb[2].mxu0 }
 0x452   :  { %v1049_v27 = vadd.f32 %v3904_v16, %v968_v34  ;;  %v1043_v15 = vpop.f32.mrb[3].mxu0 }
 0x453   :  { %v1044_v45 = vadd.f32 %v1043_v15, %v963_v2 }
 0x454   :  { %v1053_v4 = vmax.f32 %v1049_v27, 0.0 }
 0x455   :  { %v1052_v32 = vmax.f32 %v1044_v45, 0.0 }
 0x457   :  { %v4650_v37 = vpack.i.bf16 %v1053_v4, %v1052_v32 }
 0x459   :  { %4651 = vrot.lane.b32.xlu0 %v4650_v37, %s4917_s22  ;;  %4646 = vrot.lane.b32.xlu1 %v4650_v37, %s4904_s18 }
 0x45d   :  { %1906 = vperm.xlu0 %4644, %v1194_v7   ;;  %4656 = vrot.lane.b32.xlu1 %v4650_v37, %s4916_s30 }
 0x461   :  { %1916 = vperm.xlu0 %4644, %v1196_v24   ;;  %1911 = vperm.xlu1 %4613, %v1195_v47  }
 0x465   :  { %1921 = vperm.xlu1 %4613, %v1197_v57   ;;  %v1471_v57 = vadd.s32 4294967295, %v5026_v13 }
 0x4cb   :  { %v4647_v3 = vpop.permute.xlu1 %4646  ;;  %v4652_v9 = vpop.permute.xlu0 %4651 }
 0x4cc   :  { %v4649_v17 = vunpack.i.h.bf16 %v4647_v3  ;;  %v4648_v62 = vunpack.i.l.bf16 %v4647_v3  ;;  %v4654_v52 = vunpack.i.h.bf16 %v4652_v9  ;;  %v4653_v40 = vunpack.i.l.bf16 %v4652_v9 }
 0x4ce   :  { %v1059_v16 = vmax.f32 %v1053_v4, %v4649_v17  ;;  %v1058_v27 = vmax.f32 %v1052_v32, %v4648_v62  ;;  %v1297_v4 = vadd.s32 4294967292, %v5026_v13  ;;  %v1557_v32 = vadd.s32 1, %v5026_v13 }
 0x4cf   :  { %v4657_v18 = vpop.permute.xlu1 %4656 }
 0x4d0   :  { %v4659_v2 = vunpack.i.h.bf16 %v4657_v18  ;;  %v4658_v34 = vunpack.i.l.bf16 %v4657_v18  ;;  %vm1298_vm1 = vcmp.eq.s32.totalorder %v4996_v1, %v1297_v4  ;;  %vm1299_vm0 = vcmp.eq.s32.totalorder %v5511_v20, %v1297_v4 }
 0x4d1   :  { %vm1558_vm5 = vcmp.eq.s32.totalorder %v4996_v1, %v1557_v32  ;;  %vm1559_vm14 = vcmp.eq.s32.totalorder %v5511_v20, %v1557_v32  ;;  %vm5971_vm6 = vmpackc.low %vm1299_vm0, %vm1298_vm1  ;;  %vm1300_vm4 = vcmp.eq.s32.totalorder %v5522_v63, %v1297_v4  ;;  %vm1301_vm11 = vcmp.eq.s32.totalorder %v5525_v12, %v1297_v4 }
 0x4d2   :  { %v1069_v15 = vmax.f32 %v4654_v52, %v4659_v2  ;;  %v1068_v45 = vmax.f32 %v4653_v40, %v4658_v34  ;;  %4194 = vmatprep.subr.msk.bf16.mxu0 %vm5971_vm6, %v7365_v22  ;;  %vm1561_vm1 = vcmp.eq.s32.totalorder %v5525_v12, %v1557_v32  ;;  %vm5999_vm0 = vmpackc.low %vm1301_vm11, %vm1300_vm4  ;;  %vm1733_vm4 = vcmp.eq.s32.totalorder %v5511_v20, %v1731_v8  ;;  %v1187_v34 = vld [vmem:[%s7095_s5 + $0x8] sm:$0xff] }
 0x4d3   :  { %v1643_v18 = vadd.s32 3, %v5026_v13  ;;  %v1817_v40 = vadd.s32 5, %v5026_v13  ;;  %v4918_v2 = vmov 0.0|0.0  }
 0x4d4   :  { %v1071_v37 = vmax.f32 %v1059_v16, %v1069_v15  ;;  %v1070_v7 = vmax.f32 %v1058_v27, %v1068_v45  ;;  %v1199_v16 = vshra.s32 %v5026_v13, 2  ;;  %v1198_v27 = vand.u32 3, %v5026_v13  ;;  %v1189_v45 = vld [vmem:[%s7095_s5 + $0x18] sm:$0xff] }
 0x4d6   :  { %3937 = vmatprep.mubr.f32.mxu1 %v1070_v7  ;;  %v1200_v15 = vand.u32 3, %v1199_v16 }
 0x4d7   :  { %3938 = vmatmul.mubr.f32.vlgmr.msra.gmra.mrb[6].mxu1 %v1071_v37 }
 0x4d8   :  { %4204 = vmatpush3.bf16.msk.msra.mxu1 %vm5948_vm3, %v7365_v22  ;;  %vm5978_vm3 = vmpackc.low %vm1559_vm14, %vm1558_vm5  ;;  %vm1472_vm5 = vcmp.eq.s32.totalorder %v4996_v1, %v1471_v57  ;;  %vm1473_vm14 = vcmp.eq.s32.totalorder %v5511_v20, %v1471_v57 }
 0x4d9   :  { %4206 = vmatprep.subr.msk.bf16.mxu1 %vm4205_vm2, %v7365_v22  ;;  %vm6023_vm11 = vmpackc.low %vm1473_vm14, %vm1472_vm5  ;;  %vm1735_vm5 = vcmp.eq.s32.totalorder %v5525_v12, %v1731_v8  ;;  %vm1645_vm14 = vcmp.eq.s32.totalorder %v5511_v20, %v1643_v18 }
 0x4dc   :  { %4208 = vmatpush3.bf16.msk.msra.mxu1 %vm4205_vm2, %v7365_v22  ;;  %vm1560_vm2 = vcmp.eq.s32.totalorder %v5522_v63, %v1557_v32 }
 0x4dd   :  { %4218 = vmatprep.subr.msk.bf16.mxu1 %vm5978_vm3, %v7365_v22  ;;  %vm4221_vm9 = vmpackc.low %vm1561_vm1, %vm1560_vm2  ;;  %vm1475_vm2 = vcmp.eq.s32.totalorder %v5525_v12, %v1471_v57  ;;  %vm1734_vm1 = vcmp.eq.s32.totalorder %v5522_v63, %v1731_v8 }
 0x5aa   :  { %v5989_v36 = vpop.f32.mrb[6].mxu1 }
 0x5ab   :  { %v5993_v29 = vpop.f32.mrb[7].mxu1 }
 0x5ac   :  { %3948 = vmatprep.mubr.msk.f32.mxu0 %vm7198_vm12, %v5993_v29  ;;  %3970 = vmatprep.mubr.msk.f32.mxu1 %vm7198_vm12, %v5993_v29  ;;  %v4266_v9 = vpack.c.bf16 %v5989_v36, %v5993_v29 }
 0x5ad   :  { %3949 = vmatmul.mubr.msk.f32.vlgmr.msra.gmra.mrb[4].mxu0 %vm7198_vm12, %v5989_v36  ;;  %3971 = vmatmul.mubr.msk.f32.vlgmr.msra.gmra.mrb[8].mxu1 %vm7198_vm12, %v5989_v36 }
 0x5ae   :  { %4196 = vmatpush3.bf16.msk.msra.mxu0 %vm5971_vm6, %v7365_v22  ;;  %4220 = vmatpush3.bf16.msk.msra.mxu1 %vm5978_vm3, %v7365_v22  ;;  %vm6031_vm6 = vmpackc.low %vm1733_vm4, %vm1732_vm13  ;;  %vm1474_vm3 = vcmp.eq.s32.totalorder %v5522_v63, %v1471_v57  ;;  %v1190_v57 = vld [vmem:[%s7095_s5 + $0x20] sm:$0xff] }
 0x5af   :  { %3959 = vmatprep.mubr.msk.f32.mxu0 %vm7198_vm12, %v5993_v29  ;;  %3992 = vmatprep.mubr.msk.f32.mxu1 %vm7198_vm12, %v5993_v29  ;;  %vm6050_vm13 = vmpackc.low %vm1475_vm2, %vm1474_vm3  ;;  %vm1646_vm3 = vcmp.eq.s32.totalorder %v5522_v63, %v1643_v18  ;;  %vm1818_vm2 = vcmp.eq.s32.totalorder %v4996_v1, %v1817_v40 }
 0x5b0   :  { %4198 = vmatprep.subr.msk.bf16.mxu0 %vm5999_vm0, %v7365_v22  ;;  %4222 = vmatprep.subr.msk.bf16.mxu1 %vm4221_vm9, %v7365_v22 }
 0x5b2   :  { %4200 = vmatpush3.bf16.msk.msra.mxu0 %vm5999_vm0, %v7365_v22  ;;  %4224 = vmatpush3.bf16.msk.msra.mxu1 %vm4221_vm9, %v7365_v22  ;;  %vm4237_vm9 = vmpackc.low %vm1735_vm5, %vm1734_vm1  ;;  %vm1644_vm0 = vcmp.eq.s32.totalorder %v4996_v1, %v1643_v18  ;;  %vm1819_vm1 = vcmp.eq.s32.totalorder %v5511_v20, %v1817_v40 }
 0x5b3   :  { %4210 = vmatprep.subr.msk.bf16.mxu0 %vm6023_vm11, %v7365_v22  ;;  %4234 = vmatprep.subr.msk.bf16.mxu1 %vm6031_vm6, %v7365_v22  ;;  %vm4225_vm4 = vmpackc.low %vm1645_vm14, %vm1644_vm0  ;;  %vm7197_vm14 = vcmask 130048  }
 0x5b4   :  { %vm4241_vm5 = vmpackc.low %vm1819_vm1, %vm1818_vm2  ;;  %vm6120_vm2 = vcmp.lt.s32.totalorder %v1198_v27, 3 }
 0x5b5   :  { %3960 = vmatmul.mubr.msk.f32.vlgmr.msra.gmra.mrb[6].mxu0 %vm7198_vm12, %v5989_v36  ;;  %3993 = vmatmul.mubr.msk.f32.vlgmr.msra.gmra.mrb[10].mxu1 %vm7198_vm12, %v5989_v36 }
 0x5b6   :  { %4212 = vmatpush3.bf16.msk.msra.mxu0 %vm6023_vm11, %v7365_v22  ;;  %3981 = vmatprep.mubr.msk.f32.mxu0 %vm7198_vm12, %v5993_v29  ;;  %vm1647_vm11 = vcmp.eq.s32.totalorder %v5525_v12, %v1643_v18 }
 0x5b7   :  { %4236 = vmatpush3.bf16.msk.msra.mxu1 %vm6031_vm6, %v7365_v22  ;;  %4014 = vmatprep.mubr.msk.f32.mxu1 %vm7198_vm12, %v5993_v29  ;;  %vm4229_vm6 = vmpackc.low %vm1647_vm11, %vm1646_vm3  ;;  %vm1293_vm3 = vcmp.ge.s32.totalorder %v1200_v15, 1 }
 0x5b8   :  { %4214 = vmatprep.subr.msk.bf16.mxu0 %vm6050_vm13, %v7365_v22  ;;  %4238 = vmatprep.subr.msk.bf16.mxu1 %vm4237_vm9, %v7365_v22  ;;  %vm4255_vm1 = vmpackc.low %vm1293_vm3, %vm1293_vm3 }
 0x5ba   :  { %4216 = vmatpush3.bf16.msk.msra.mxu0 %vm6050_vm13, %v7365_v22  ;;  %vm1820_vm13 = vcmp.eq.s32.totalorder %v5522_v63, %v1817_v40 }
 0x5bb   :  { %4240 = vmatpush3.bf16.msk.msra.mxu1 %vm4237_vm9, %v7365_v22  ;;  %4226 = vmatprep.subr.msk.bf16.mxu0 %vm4225_vm4, %v7365_v22  ;;  %vm1821_vm9 = vcmp.eq.s32.totalorder %v5525_v12, %v1817_v40 }
 0x5bc   :  { %vm4245_vm0 = vmpackc.low %vm1821_vm9, %vm1820_vm13  ;;  %4249 = vmatprep.subr.bf16.mxu1 %v4918_v2 }
 0x5bd   :  { %3982 = vmatmul.mubr.msk.f32.vlgmr.msra.gmra.mrb[8].mxu0 %vm7198_vm12, %v5989_v36 }
 0x5be   :  { %4015 = vmatmul.mubr.msk.f32.vlgmr.msra.gmra.mrb[12].mxu1 %vm7198_vm12, %v5989_v36  ;;  %4228 = vmatpush3.bf16.msk.msra.mxu0 %vm4225_vm4, %v7365_v22  ;;  %vm6112_vm4 = vcmp.ge.s32.totalorder %v1198_v27, 1 }
 0x5bf   :  { %4003 = vmatprep.mubr.msk.f32.mxu0 %vm7198_vm12, %v5993_v29  ;;  %4230 = vmatprep.subr.msk.bf16.mxu0 %vm4229_vm6, %v7365_v22  ;;  %vm1294_vm11 = vmand %vm6112_vm4, %vm1293_vm3 }
 0x5c0   :  { %3507 = vmatprep.mubr.msk.f32.mxu1 %vm7197_vm14, %v1187_v34  ;;  %vm4263_vm9 = vmpackc.low %vm6112_vm4, %vm6112_vm4 }
 0x5c2   :  { %4232 = vmatpush3.bf16.msk.msra.mxu0 %vm4229_vm6, %v7365_v22  ;;  %vm4251_vm6 = vmpackc.low %vm1294_vm11, %vm1294_vm11 }
 0x5c3   :  { %4242 = vmatprep.subr.msk.bf16.mxu0 %vm4241_vm5, %v7365_v22 }
 0x5c5   :  { %4004 = vmatmul.mubr.msk.f32.vlgmr.msra.gmra.mrb[10].mxu0 %vm7198_vm12, %v5989_v36 }
 0x5c6   :  { %4244 = vmatpush3.bf16.msk.msra.mxu0 %vm4241_vm5, %v7365_v22  ;;  %4025 = vmatprep.mubr.msk.f32.mxu0 %vm7198_vm12, %v5993_v29  ;;  %vm1468_vm5 = vmand %vm6120_vm2, %vm1293_vm3 }
 0x5c7   :  { %4246 = vmatprep.subr.msk.bf16.mxu0 %vm4245_vm0, %v7365_v22  ;;  %vm4259_vm13 = vmpackc.low %vm1468_vm5, %vm1468_vm5 }
 0x5c8   :  { %vm4270_vm3 = vmpackc.low %vm6120_vm2, %vm6120_vm2 }
 0x5ca   :  { %4248 = vmatpush3.bf16.msk.msra.mxu0 %vm4245_vm0, %v7365_v22  ;;  %vm1727_vm0 = vcmp.lt.s32.totalorder %v1200_v15, 3  ;;  %v1188_v15 = vld [vmem:[%s7095_s5 + $0x10] sm:$0xff] }
 0x5cb   :  { %vm1728_vm11 = vmand %vm6112_vm4, %vm1727_vm0 }
 0x5cc   :  { %vm1901_vm5 = vmand %vm6120_vm2, %vm1727_vm0 }
 0x5cd   :  { %4026 = vmatmul.mubr.msk.f32.vlgmr.msra.gmra.mrb[12].mxu0 %vm7198_vm12, %v5989_v36  ;;  %vm4282_vm4 = vmpackc.low %vm1901_vm5, %vm1901_vm5 }
 0x680   :  { %v3950_v37 = vpop.f32.mrb[4].mxu0  ;;  %v3972_v7 = vpop.f32.mrb[8].mxu1 }
 0x681   :  { %v1283_v4 = vpop.f32.mrb[5].mxu0  ;;  %v1458_v32 = vpop.f32.mrb[9].mxu1 }
 0x682   :  { %v4250_v24 = vpack.c.bf16 %v3950_v37, %v1283_v4  ;;  %v4258_v47 = vpack.c.bf16 %v3972_v7, %v1458_v32 }
 0x684   :  { %4252 = vmatpush1.bf16.msk.msra.mxu1 %vm4251_vm6, %v4250_v24  ;;  %vm4274_vm6 = vmpackc.low %vm1728_vm11, %vm1728_vm11 }
 0x685   :  { %4253 = vmatprep.subr.bf16.mxu1 %v4918_v2 }
 0x688   :  { %v3961_v8 = vpop.f32.mrb[6].mxu0  ;;  %v3994_v3 = vpop.f32.mrb[10].mxu1 }
 0x689   :  { %v1372_v17 = vpop.f32.mrb[7].mxu0  ;;  %v1632_v62 = vpop.f32.mrb[11].mxu1 }
 0x68a   :  { %v4254_v18 = vpack.c.bf16 %v3961_v8, %v1372_v17  ;;  %v4269_v52 = vpack.c.bf16 %v3994_v3, %v1632_v62  ;;  %v1193_v8 = vld [vmem:[%s7095_s5 + $0x38] sm:$0xff]  ;;  %v1192_v3 = vld [vmem:[%s7095_s5 + $0x30] sm:$0xff]  ;;  %v2031_v17 = vshra.s32 %v5498_v21, 1  ;;  %v7384_v62 = vshra.s32 %v5026_v13, 6  ;;  %v1907_v21 = vpop.permute.xlu0 %1906 }
 0x68c   :  { %4256 = vmatpush1.bf16.msk.msra.mxu1 %vm4255_vm1, %v4254_v18  ;;  %vm4278_vm1 = vmpackc.low %vm1727_vm0, %vm1727_vm0  ;;  %v2030_v18 = vshll.u32 %v7384_v62, 4 }
 0x68d   :  { %4257 = vmatprep.subr.bf16.mxu1 %v4918_v2 }
 0x690   :  { %v3983_v40 = vpop.f32.mrb[8].mxu0  ;;  %4260 = vmatpush1.bf16.msk.msra.mxu1 %vm4259_vm13, %v4258_v47 }
 0x691   :  { %v4016_v34 = vpop.f32.mrb[12].mxu1  ;;  %v1546_v16 = vpop.f32.mrb[9].mxu0  ;;  %4261 = vmatprep.subr.bf16.mxu1 %v4918_v2 }
 0x692   :  { %v4262_v27 = vpack.c.bf16 %v3983_v40, %v1546_v16  ;;  %v1806_v37 = vpop.f32.mrb[13].mxu1  ;;  %v2034_v40 = vshra.s32 %v5500_v25, 1 }
 0x693   :  { %v4277_v7 = vpack.c.bf16 %v4016_v34, %v1806_v37 }
 0x694   :  { %4264 = vmatpush1.bf16.msk.msra.mxu1 %vm4263_vm9, %v4262_v27 }
 0x695   :  { %4265 = vmatprep.subr.bf16.mxu1 %v4918_v2 }
 0x698   :  { %v4005_v4 = vpop.f32.mrb[10].mxu0  ;;  %4267 = vmatpush1.bf16.msra.mxu1 %v4266_v9  ;;  %v1186_v9 = vld [vmem:[%s7095_s5] sm:$0xff] }
 0x699   :  { %v1718_v32 = vpop.f32.mrb[11].mxu0  ;;  %4268 = vmatprep.subr.bf16.mxu1 %v4918_v2 }
 0x69a   :  { %v4273_v24 = vpack.c.bf16 %v4005_v4, %v1718_v32  ;;  %v1912_v4 = vpop.permute.xlu1 %1911 }
 0x69c   :  { %4271 = vmatpush1.bf16.msk.msra.mxu1 %vm4270_vm3, %v4269_v52  ;;  %v2032_v52 = vshll.u32 %v2031_v17, 2 }
 0x69d   :  { %4272 = vmatprep.subr.bf16.mxu1 %v4918_v2 }
 0x69e   :  { %v2033_v34 = vadd.s32 %v2032_v52, %v2030_v18 }
 0x6a0   :  { %v4027_v47 = vpop.f32.mrb[12].mxu0  ;;  %4275 = vmatpush1.bf16.msk.msra.mxu1 %vm4274_vm6, %v4273_v24  ;;  %v2035_v16 = vadd.s32 %v2034_v40, %v2033_v34 }
 0x6a1   :  { %v1892_v36 = vpop.f32.mrb[13].mxu0  ;;  %4276 = vmatprep.subr.bf16.mxu1 %v4918_v2 }
 0x6a2   :  { %v4281_v29 = vpack.c.bf16 %v4027_v47, %v1892_v36  ;;  %vm2036_vm2 = vcmp.eq.s32.totalorder %v4996_v1, %v2035_v16  ;;  %vm2037_vm13 = vcmp.eq.s32.totalorder %v5511_v20, %v2035_v16  ;;  %vm2038_vm9 = vcmp.eq.s32.totalorder %v5522_v63, %v2035_v16 }
 0x6a3   :  { %vm2039_vm0 = vcmp.eq.s32.totalorder %v5525_v12, %v2035_v16  ;;  %vm4284_vm3 = vmpackc.low %vm2037_vm13, %vm2036_vm2 }
 0x6a4   :  { %4279 = vmatpush1.bf16.msk.msra.mxu1 %vm4278_vm1, %v4277_v7  ;;  %4285 = vmatprep.subr.msk.bf16.mxu0 %vm4284_vm3, %v7365_v22  ;;  %vm4288_vm11 = vmpackc.low %vm2039_vm0, %vm2038_vm9 }
 0x6a5   :  { %4280 = vmatprep.subr.bf16.mxu1 %v4918_v2  ;;  %v1191_v2 = vld [vmem:[%s7095_s5 + $0x28] sm:$0xff]  ;;  %4287 = vmatpush3.bf16.msk.msra.mxu0 %vm4284_vm3, %v7365_v22 }
 0x6a6   :  { %4289 = vmatprep.subr.msk.bf16.mxu0 %vm4288_vm11, %v7365_v22 }
 0x6a8   :  { %4283 = vmatpush1.bf16.msk.msra.mxu1 %vm4282_vm4, %v4281_v29  ;;  %v1917_v29 = vpop.permute.xlu0 %1916 }
 0x6a9   :  { %4291 = vmatpush3.bf16.msk.msra.mxu0 %vm4288_vm11, %v7365_v22 }
 0x6ab   :  { %2002 = vmatmul.mubr.f32.vlgmr.msra.gmra.mrb[14].mxu1 %v1186_v9 }
 0x6ac   :  { %3508 = vmatprep.mubr.msk.f32.mxu1 %vm7197_vm14, %v1189_v45 }
 0x6af   :  { %2007 = vmatmul.mubr.f32.gmra.mrb[16].mxu1 %v1188_v15 }
 0x6b0   :  { %3509 = vmatprep.mubr.msk.f32.mxu1 %vm7197_vm14, %v1191_v2 }
 0x6b3   :  { %2012 = vmatmul.mubr.f32.gmra.mrb[18].mxu1 %v1190_v57  ;;  %v1922_v57 = vpop.permute.xlu1 %1921 }
 0x6b4   :  { %3510 = vmatprep.mubr.msk.f32.mxu1 %vm7197_vm14, %v1193_v8 }
 0x6b7   :  { %2017 = vmatmul.mubr.f32.gmra.mrb[20].mxu1 %v1192_v3 }
 0x6b8   :  { %2645 = vmatprep.mubr.f32.mxu1 %v7334_v0 }
 0x77e   :  { %v2003_v25 = vpop.f32.mrb[14].mxu1 }
 0x77f   :  { %v2004_v27 = vadd.f32 %v2003_v25, %v1907_v21  ;;  %v2005_v37 = vpop.f32.mrb[15].mxu1 }
 0x780   :  { %v2418_v37 = vand.u32 255, %v5058_v28 }
 0x781   :  { %v2022_v7 = vmax.f32 %v2004_v27, 0.0 }
 0x782   :  { %v2008_v32 = vpop.f32.mrb[16].mxu1 }
 0x783   :  { %2026 = vst.msk [vmem:[%s7096_s14] sm:$0xff] %vm7198_vm12, %v2022_v7  ;;  %v2009_v24 = vadd.f32 %v2008_v32, %v1912_v4  ;;  %v2010_v47 = vpop.f32.mrb[17].mxu1  ;;  %4036 = vmatprep.mubr.msk.f32.mxu0 %vm7198_vm12, %v2022_v7  ;;  %v2422_v7 = vshra.s32 %v2418_v37, 4  ;;  %v2414_v4 = vshra.s32 %v5058_v28, 8  ;;  %v2147_v28 = vld [vmem:[%s7098_s8] sm:$0xff] }
 0x784   :  { %v2426_v47 = vand.u32 15, %v2418_v37 }
 0x785   :  { %v2023_v36 = vmax.f32 %v2009_v24, 0.0  ;;  %v2434_v32 = vshra.s32 %v2422_v7, 1  ;;  %v2142_v24 = vld [vmem:[%s7097_s7 + $0x8] sm:$0xff] }
 0x786   :  { %v2013_v9 = vpop.f32.mrb[18].mxu1 }
 0x787   :  { %2027 = vst.msk [vmem:[%s7096_s14 + $0x8] sm:$0xff] %vm7198_vm12, %v2023_v36  ;;  %v2014_v45 = vadd.f32 %v2013_v9, %v1917_v29  ;;  %v2015_v15 = vpop.f32.mrb[19].mxu1  ;;  %4037 = vmatmul.mubr.msk.f32.vlgmr.msra.gmra.mrb[14].mxu0 %vm7198_vm12, %v2023_v36  ;;  %v2430_v36 = vshll.u32 %v2414_v4, 6  ;;  %v2438_v29 = vshll.u32 %v2434_v32, 3 }
 0x789   :  { %v2024_v2 = vmax.f32 %v2014_v45, 0.0  ;;  %v2442_v9 = vadd.s32 %v2438_v29, %v2430_v36  ;;  %v2446_v45 = vshra.s32 %v2426_v47, 1 }
 0x78a   :  { %v2018_v8 = vpop.f32.mrb[20].mxu1 }
 0x78b   :  { %2028 = vst.msk [vmem:[%s7096_s14 + $0x10] sm:$0xff] %vm7198_vm12, %v2024_v2  ;;  %v2019_v3 = vadd.f32 %v2018_v8, %v1922_v57  ;;  %v2020_v17 = vpop.f32.mrb[21].mxu1  ;;  %4039 = vmatprep.mubr.msk.f32.mxu0 %vm7198_vm12, %v2024_v2  ;;  %v6241_v15 = vadd.s32 %v2446_v45, %v2442_v9  ;;  %v2148_v2 = vld [vmem:[%s7098_s8 + $0x8] sm:$0xff]  ;;  %v2413_v57 = vshra.s32 %v5026_v13, 8  ;;  %v2417_v8 = vand.u32 255, %v5026_v13 }
 0x78d   :  { %v2025_v62 = vmax.f32 %v2019_v3, 0.0  ;;  %vm2454_vm6 = vcmp.eq.s32.totalorder %v4996_v1, %v6241_v15  ;;  %vm2458_vm1 = vcmp.eq.s32.totalorder %v5511_v20, %v6241_v15  ;;  %v2421_v3 = vshra.s32 %v2417_v8, 4 }
 0x78e   :  { %vm4350_vm5 = vmpackc.low %vm2458_vm1, %vm2454_vm6  ;;  %v2425_v17 = vand.u32 15, %v2417_v8  ;;  %vm2462_vm4 = vcmp.eq.s32.totalorder %v5522_v63, %v6241_v15  ;;  %vm2466_vm2 = vcmp.eq.s32.totalorder %v5525_v12, %v6241_v15  ;;  %vm2470_vm1 = vcmp.eq.s32.totalorder %v5559_v11, %v6241_v15 }
 0x78f   :  { %2029 = vst.msk [vmem:[%s7096_s14 + $0x18] sm:$0xff] %vm7198_vm12, %v2025_v62  ;;  %4040 = vmatmul.mubr.msk.f32.gmra.mrb[16].mxu0 %vm7198_vm12, %v2025_v62  ;;  %4351 = vmatprep.subr.msk.bf16.mxu1 %vm4350_vm5, %v7365_v22  ;;  %v2429_v62 = vshll.u32 %v2413_v57, 6  ;;  %vm4354_vm0 = vmpackc.low %vm2466_vm2, %vm2462_vm4  ;;  %vm2474_vm5 = vcmp.eq.s32.totalorder %v5562_v14, %v6241_v15 }
 0x790   :  { %2325 = vmatprep.mubr.f32.mxu0 %v2142_v24  ;;  %vm4358_vm12 = vmpackc.low %vm2474_vm5, %vm2470_vm1  ;;  %vm2486_vm1 = vcmp.eq.s32.totalorder %v5633_v56, %v6241_v15  ;;  %vm2490_vm5 = vcmp.eq.s32.totalorder %v5636_v6, %v6241_v15 }
 0x85a   :  { %v4038_v18 = vpop.f32.mrb[14].mxu0 }
 0x85b   :  { %v2122_v52 = vpop.f32.mrb[15].mxu0 }
 0x85c   :  { %v4660_v40 = vpack.i.bf16 %v4038_v18, %v2122_v52  ;;  %v4292_v34 = vpack.c.bf16 %v4038_v18, %v2122_v52  ;;  %v2433_v18 = vshra.s32 %v2421_v3, 1 }
 0x85e   :  { %4661 = vrot.lane.b32.xlu0 %v4660_v40, %s4913_s25  ;;  %4293 = vmatprep.subr.bf16.mxu0 %v4292_v34  ;;  %v2437_v52 = vshll.u32 %v2433_v18, 3 }
 0x860   :  { %v2441_v34 = vadd.s32 %v2437_v52, %v2429_v62 }
 0x862   :  { %4666 = vrot.lane.b32.xlu0 %v4660_v40, %s4904_s18  ;;  %v6212_v16 = vpop.f32.mrb[16].mxu0 }
 0x863   :  { %v6214_v21 = vpop.f32.mrb[17].mxu0 }
 0x864   :  { %v4680_v25 = vpack.i.bf16 %v6212_v16, %v6214_v21  ;;  %v4297_v27 = vpack.c.bf16 %v6212_v16, %v6214_v21 }
 0x866   :  { %4681 = vrot.lane.b32.xlu0 %v4680_v25, %s4904_s18  ;;  %4671 = vrot.lane.b32.xlu1 %v4680_v25, %s4913_s25 }
 0x86a   :  { %4686 = vrot.lane.b32.xlu0 %v4660_v40, %s4915_s29  ;;  %4676 = vrot.lane.b32.xlu1 %v4660_v40, %s4912_s1 }
 0x86e   :  { %4701 = vrot.lane.b32.xlu0 %v4680_v25, %s4915_s29  ;;  %4691 = vrot.lane.b32.xlu1 %v4680_v25, %s4912_s1 }
 0x872   :  { %4706 = vrot.lane.b32.xlu0 %v4660_v40, %s4917_s22  ;;  %4696 = vrot.lane.b32.xlu1 %v4660_v40, %s4914_s26 }
 0x876   :  { %4721 = vrot.lane.b32.xlu0 %v4680_v25, %s4917_s22  ;;  %4711 = vrot.lane.b32.xlu1 %v4680_v25, %s4914_s26 }
 0x87a   :  { %4731 = vrot.lane.b32.xlu0 %v4660_v40, %s4916_s30  ;;  %4716 = vrot.lane.b32.xlu1 %v4660_v40, %s4903_s17  ;;  %v2445_v40 = vshra.s32 %v2425_v17, 1 }
 0x87e   :  { %2247 = vperm.xlu0 %4644, %v2147_v28   ;;  %4726 = vrot.lane.b32.xlu1 %v4680_v25, %s4903_s17 }
 0x882   :  { %4736 = vrot.lane.b32.xlu1 %v4680_v25, %s4916_s30  ;;  %v6258_v25 = vadd.s32 %v2445_v40, %v2441_v34 }
 0x884   :  { %vm2453_vm13 = vcmp.eq.s32.totalorder %v4996_v1, %v6258_v25  ;;  %vm2457_vm9 = vcmp.eq.s32.totalorder %v5511_v20, %v6258_v25  ;;  %vm2461_vm3 = vcmp.eq.s32.totalorder %v5522_v63, %v6258_v25  ;;  %vm2465_vm11 = vcmp.eq.s32.totalorder %v5525_v12, %v6258_v25 }
 0x885   :  { %vm4352_vm6 = vmpackc.low %vm2457_vm9, %vm2453_vm13  ;;  %vm2469_vm4 = vcmp.eq.s32.totalorder %v5559_v11, %v6258_v25  ;;  %vm2473_vm2 = vcmp.eq.s32.totalorder %v5562_v14, %v6258_v25  ;;  %vm2478_vm13 = vcmp.eq.s32.totalorder %v5603_v46, %v6241_v15  ;;  %vm2482_vm9 = vcmp.eq.s32.totalorder %v5606_v60, %v6241_v15 }
 0x886   :  { %2252 = vperm.xlu1 %4613, %v2148_v2   ;;  %4353 = vmatpush1.bf16.msk.msra.mxu1 %vm4352_vm6, %v7365_v22  ;;  %vm4356_vm14 = vmpackc.low %vm2465_vm11, %vm2461_vm3  ;;  %vm2477_vm3 = vcmp.eq.s32.totalorder %v5603_v46, %v6258_v25  ;;  %vm2481_vm11 = vcmp.eq.s32.totalorder %v5606_v60, %v6258_v25 }
 0x887   :  { %4355 = vmatprep.subr.msk.bf16.mxu1 %vm4354_vm0, %v7365_v22  ;;  %vm4360_vm6 = vmpackc.low %vm2473_vm2, %vm2469_vm4  ;;  %vm2485_vm4 = vcmp.eq.s32.totalorder %v5633_v56, %v6258_v25  ;;  %vm2489_vm2 = vcmp.eq.s32.totalorder %v5636_v6, %v6258_v25 }
 0x888   :  { %vm4362_vm0 = vmpackc.low %vm2482_vm9, %vm2478_vm13 }
 0x889   :  { %vm4368_vm13 = vmpackc.low %vm2489_vm2, %vm2485_vm4 }
 0x88a   :  { %4357 = vmatpush1.bf16.msk.msra.mxu1 %vm4356_vm14, %v7365_v22  ;;  %vm4364_vm14 = vmpackc.low %vm2481_vm11, %vm2477_vm3  ;;  %vm7388_vm11 = vcmp.lt.s32.totalorder %v5809_v38, 7 }
 0x88b   :  { %4359 = vmatprep.subr.msk.bf16.mxu1 %vm4358_vm12, %v7365_v22  ;;  %vm4366_vm12 = vmpackc.low %vm2490_vm5, %vm2486_vm1 }
 0x88c   :  { %vm4295_vm9 = vmpackc.low %vm5820_vm15, %vm5820_vm15 }
 0x88d   :  { %vm4315_vm15 = vmpackc.low %vm5852_vm7, %vm5852_vm7  ;;  %vm7391_vm7 = vnez %v7353_v19  ;;  %v2144_v19 = vld [vmem:[%s7097_s7 + $0x18] sm:$0xff] }
 0x88e   :  { %4361 = vmatpush1.bf16.msk.msra.mxu1 %vm4360_vm6, %v7365_v22  ;;  %vm4303_vm6 = vmpackc.low %vm5824_vm8, %vm5824_vm8 }
 0x88f   :  { %4363 = vmatprep.subr.msk.bf16.mxu1 %vm4362_vm0, %v7365_v22  ;;  %vm7385_vm0 = vcmp.ge.s32.totalorder %v5809_v38, 1  ;;  %vm4318_vm8 = vmpackc.low %vm5836_vm10, %vm5836_vm10  ;;  %vm7392_vm10 = vnez %v7364_v10  ;;  %v2141_v10 = vld [vmem:[%s7097_s7] sm:$0xff] }
 0x890   :  { %vm6328_vm3 = vmpackc.low %vm7385_vm0, %vm7385_vm0 }
 0x891   :  { %vm6369_vm1 = vmpackc.low %vm7388_vm11, %vm7388_vm11 }
 0x892   :  { %4365 = vmatpush1.bf16.msk.msra.mxu1 %vm4364_vm14, %v7365_v22  ;;  %vm4330_vm5 = vmpackc.low %vm7391_vm7, %vm7391_vm7 }
 0x893   :  { %4367 = vmatprep.subr.msk.bf16.mxu1 %vm4366_vm12, %v7365_v22  ;;  %vm6393_vm14 = vmpackc.low %vm7392_vm10, %vm7392_vm10 }
 0x896   :  { %4369 = vmatpush1.bf16.msk.msra.mxu1 %vm4368_vm13, %v7365_v22 }
 0x8d0   :  { %v4662_v37 = vpop.permute.xlu0 %4661 }
 0x8d1   :  { %v4664_v7 = vunpack.i.h.bf16 %v4662_v37  ;;  %v4663_v4 = vunpack.i.l.bf16 %v4662_v37 }
 0x8d3   :  { %v4294_v32 = vpack.c.bf16 %v4664_v7, %v4663_v4 }
 0x8d4   :  { %v4667_v24 = vpop.permute.xlu0 %4666 }
 0x8d5   :  { %4296 = vmatpush3.bf16.msk.msra.mxu0 %vm4295_vm9, %v4294_v32  ;;  %v4669_v47 = vunpack.i.h.bf16 %v4667_v24  ;;  %v4668_v36 = vunpack.i.l.bf16 %v4667_v24  ;;  %v2419_v24 = vand.u32 255, %v5062_v30 }
 0x8d6   :  { %4298 = vmatprep.subr.bf16.mxu0 %v4297_v27  ;;  %v2420_v27 = vand.u32 255, %v5065_v31 }
 0x8d7   :  { %v4302_v57 = vpack.c.bf16 %v4669_v47, %v4668_v36 }
 0x8d8   :  { %v4682_v29 = vpop.permute.xlu0 %4681  ;;  %v4672_v28 = vpop.permute.xlu1 %4671  ;;  %v2424_v36 = vshra.s32 %v2420_v27, 4  ;;  %v2428_v31 = vand.u32 15, %v2420_v27  ;;  %v2427_v27 = vand.u32 15, %v2419_v24 }
 0x8d9   :  { %v4674_v9 = vunpack.i.h.bf16 %v4672_v28  ;;  %v4673_v45 = vunpack.i.l.bf16 %v4672_v28  ;;  %v4684_v8 = vunpack.i.h.bf16 %v4682_v29  ;;  %v4683_v3 = vunpack.i.l.bf16 %v4682_v29 }
 0x8db   :  { %v4299_v2 = vpack.c.bf16 %v4674_v9, %v4673_v45  ;;  %v4308_v40 = vpack.c.bf16 %v4684_v8, %v4683_v3  ;;  %v2423_v3 = vshra.s32 %v2419_v24, 4 }
 0x8dc   :  { %v4687_v17 = vpop.permute.xlu0 %4686  ;;  %v4677_v62 = vpop.permute.xlu1 %4676 }
 0x8dd   :  { %v4679_v18 = vunpack.i.h.bf16 %v4677_v62  ;;  %v4678_v52 = vunpack.i.l.bf16 %v4677_v62  ;;  %4301 = vmatpush3.bf16.msk.msra.mxu0 %vm4295_vm9, %v4299_v2  ;;  %v4689_v39 = vunpack.i.h.bf16 %v4687_v17  ;;  %v4688_v34 = vunpack.i.l.bf16 %v4687_v17 }
 0x8de   :  { %4304 = vmatprep.subr.msk.bf16.mxu0 %vm4303_vm6, %v4302_v57  ;;  %v2436_v62 = vshra.s32 %v2424_v36, 1 }
 0x8df   :  { %v4305_v21 = vpack.c.bf16 %v4679_v18, %v4678_v52  ;;  %v4314_v29 = vpack.c.bf16 %v4689_v39, %v4688_v34 }
 0x8e0   :  { %v4702_v37 = vpop.permute.xlu0 %4701  ;;  %v4692_v7 = vpop.permute.xlu1 %4691  ;;  %v2440_v36 = vshll.u32 %v2436_v62, 3 }
 0x8e1   :  { %v4694_v4 = vunpack.i.h.bf16 %v4692_v7  ;;  %v4693_v32 = vunpack.i.l.bf16 %v4692_v7  ;;  %4307 = vmatpush3.bf16.msk.msra.mxu0 %vm6328_vm3, %v4305_v21  ;;  %v4704_v28 = vunpack.i.h.bf16 %v4702_v37  ;;  %v4703_v9 = vunpack.i.l.bf16 %v4702_v37 }
 0x8e2   :  { %4310 = vmatprep.subr.msk.bf16.mxu0 %vm4303_vm6, %v4308_v40  ;;  %v2415_v37 = vshra.s32 %v5062_v30, 8  ;;  %v2432_v7 = vshll.u32 %v2416_v23, 6 }
 0x8e3   :  { %v4311_v47 = vpack.c.bf16 %v4694_v4, %v4693_v32  ;;  %v4320_v18 = vpack.c.bf16 %v4704_v28, %v4703_v9  ;;  %v2435_v4 = vshra.s32 %v2423_v3, 1 }
 0x8e4   :  { %v4707_v45 = vpop.permute.xlu0 %4706  ;;  %v4697_v2 = vpop.permute.xlu1 %4696  ;;  %v2431_v38 = vshll.u32 %v2415_v37, 6  ;;  %v2444_v3 = vadd.s32 %v2440_v36, %v2432_v7 }
 0x8e5   :  { %v4699_v57 = vunpack.i.h.bf16 %v4697_v2  ;;  %v4698_v8 = vunpack.i.l.bf16 %v4697_v2  ;;  %4313 = vmatpush3.bf16.msk.msra.mxu0 %vm6328_vm3, %v4311_v47  ;;  %v4709_v52 = vunpack.i.h.bf16 %v4707_v45  ;;  %v4708_v21 = vunpack.i.l.bf16 %v4707_v45 }
 0x8e6   :  { %4316 = vmatprep.subr.msk.bf16.mxu0 %vm4315_vm15, %v4314_v29  ;;  %vm7395_vm3 = vcmask 261120  }
 0x8e7   :  { %v4317_v17 = vpack.c.bf16 %v4699_v57, %v4698_v8  ;;  %v4326_v29 = vpack.c.bf16 %v4709_v52, %v4708_v21  ;;  %v2439_v57 = vshll.u32 %v2435_v4, 3  ;;  %v2448_v8 = vshra.s32 %v2428_v31, 1  ;;  %vm7396_vm7 = vmmov %vm7395_vm3 }
 0x8e8   :  { %v4722_v16 = vpop.permute.xlu0 %4721  ;;  %v4712_v40 = vpop.permute.xlu1 %4711 }
 0x8e9   :  { %v4714_v39 = vunpack.i.h.bf16 %v4712_v40  ;;  %v4713_v34 = vunpack.i.l.bf16 %v4712_v40  ;;  %4319 = vmatpush3.bf16.msk.msra.mxu0 %vm4318_vm8, %v4317_v17  ;;  %v4724_v30 = vunpack.i.h.bf16 %v4722_v16  ;;  %v4723_v28 = vunpack.i.l.bf16 %v4722_v16 }
 0x8ea   :  { %4322 = vmatprep.subr.msk.bf16.mxu0 %vm4315_vm15, %v4320_v18  ;;  %v2443_v24 = vadd.s32 %v2439_v57, %v2431_v38  ;;  %v2447_v16 = vshra.s32 %v2427_v27, 1 }
 0x8eb   :  { %v4323_v32 = vpack.c.bf16 %v4714_v39, %v4713_v34  ;;  %v4332_v17 = vpack.c.bf16 %v4724_v30, %v4723_v28  ;;  %v6397_v34 = vadd.s32 %v2448_v8, %v2444_v3  ;;  %v2146_v30 = vld [vmem:[%s7097_s7 + $0x28] sm:$0xff] }
 0x8ec   :  { %v4717_v9 = vpop.permute.xlu1 %4716  ;;  %v4732_v45 = vpop.permute.xlu0 %4731  ;;  %v6412_v47 = vadd.s32 %v2447_v16, %v2443_v24 }
 0x8ed   :  { %v4719_v35 = vunpack.i.h.bf16 %v4717_v9  ;;  %v4718_v2 = vunpack.i.l.bf16 %v4717_v9  ;;  %4325 = vmatpush3.bf16.msk.msra.mxu0 %vm4318_vm8, %v4323_v32  ;;  %v4734_v62 = vunpack.i.h.bf16 %v4732_v45  ;;  %v4733_v18 = vunpack.i.l.bf16 %v4732_v45  ;;  %v2145_v32 = vld [vmem:[%s7097_s7 + $0x20] sm:$0xff] }
 0x8ee   :  { %4328 = vmatprep.subr.msk.bf16.mxu0 %vm6369_vm1, %v4326_v29  ;;  %vm2456_vm12 = vcmp.eq.s32.totalorder %v4996_v1, %v6397_v34  ;;  %vm2460_vm4 = vcmp.eq.s32.totalorder %v5511_v20, %v6397_v34  ;;  %v2143_v29 = vld [vmem:[%s7097_s7 + $0x10] sm:$0xff]  ;;  %vm2455_vm13 = vcmp.eq.s32.totalorder %v4996_v1, %v6412_v47  ;;  %vm2459_vm9 = vcmp.eq.s32.totalorder %v5511_v20, %v6412_v47 }
 0x8ef   :  { %v4329_v23 = vpack.c.bf16 %v4719_v35, %v4718_v2  ;;  %v4338_v37 = vpack.c.bf16 %v4734_v62, %v4733_v18  ;;  %vm4382_vm2 = vmpackc.low %vm2460_vm4, %vm2456_vm12  ;;  %vm2464_vm6 = vcmp.eq.s32.totalorder %v5522_v63, %v6397_v34  ;;  %vm2468_vm0 = vcmp.eq.s32.totalorder %v5525_v12, %v6397_v34 }
 0x8f0   :  { %v4727_v52 = vpop.permute.xlu1 %4726  ;;  %vm4384_vm15 = vmpackc.low %vm2459_vm9, %vm2455_vm13  ;;  %vm2463_vm11 = vcmp.eq.s32.totalorder %v5522_v63, %v6412_v47  ;;  %vm2476_vm10 = vcmp.eq.s32.totalorder %v5562_v14, %v6397_v34  ;;  %vm2471_vm4 = vcmp.eq.s32.totalorder %v5559_v11, %v6412_v47  ;;  %vm2480_vm13 = vcmp.eq.s32.totalorder %v5603_v46, %v6397_v34 }
 0x8f1   :  { %v4729_v61 = vunpack.i.h.bf16 %v4727_v52  ;;  %v4728_v21 = vunpack.i.l.bf16 %v4727_v52  ;;  %4331 = vmatpush3.bf16.msk.msra.mxu0 %vm4330_vm5, %v4329_v23  ;;  %vm4386_vm8 = vmpackc.low %vm2468_vm0, %vm2464_vm6  ;;  %vm2484_vm9 = vcmp.eq.s32.totalorder %v5606_v60, %v6397_v34 }
 0x8f2   :  { %4334 = vmatprep.subr.msk.bf16.mxu0 %vm6369_vm1, %v4332_v17  ;;  %vm2467_vm1 = vcmp.eq.s32.totalorder %v5525_v12, %v6412_v47  ;;  %vm4394_vm0 = vmpackc.low %vm2484_vm9, %vm2480_vm13  ;;  %vm2500_vm13 = vcmp.eq.s32.totalorder %v5683_v43, %v6397_v34 }
 0x8f3   :  { %v4335_v40 = vpack.c.bf16 %v4729_v61, %v4728_v21  ;;  %v2736_v61 = vld [vmem:[%s7100_s9 + $0x8] sm:$0xff]  ;;  %v2737_v21 = vld [vmem:[%s7101_s10] sm:$0xff] }
 0x8f4   :  { %v4737_v31 = vpop.permute.xlu1 %4736 }
 0x8f5   :  { %v4739_v7 = vunpack.i.h.bf16 %v4737_v31  ;;  %v4738_v4 = vunpack.i.l.bf16 %v4737_v31  ;;  %4337 = vmatpush3.bf16.msk.msra.mxu0 %vm4330_vm5, %v4335_v40  ;;  %vm2472_vm5 = vcmp.eq.s32.totalorder %v5559_v11, %v6397_v34 }
 0x8f6   :  { %4340 = vmatprep.subr.msk.bf16.mxu0 %vm6393_vm14, %v4338_v37  ;;  %vm4390_vm12 = vmpackc.low %vm2476_vm10, %vm2472_vm5  ;;  %vm2487_vm5 = vcmp.eq.s32.totalorder %v5633_v56, %v6412_v47  ;;  %vm2491_vm10 = vcmp.eq.s32.totalorder %v5636_v6, %v6412_v47 }
 0x8f7   :  { %v4344_v36 = vpack.c.bf16 %v4739_v7, %v4738_v4 }
 0x8f8   :  { %2326 = vmatmul.mubr.f32.vlgmr.msra.gmra.mrb[18].mxu0 %v2141_v10 }
 0x8f9   :  { %4343 = vmatpush3.bf16.msk.msra.mxu0 %vm6393_vm14, %v4338_v37  ;;  %2330 = vmatprep.mubr.f32.mxu0 %v2145_v32 }
 0x8fa   :  { %4346 = vmatprep.subr.msk.bf16.mxu0 %vm6393_vm14, %v4344_v36 }
 0x8fc   :  { %2331 = vmatmul.mubr.f32.gmra.mrb[20].mxu0 %v2144_v19 }
 0x8fd   :  { %4349 = vmatpush3.bf16.msk.msra.mxu0 %vm6393_vm14, %v4344_v36  ;;  %4050 = vmatprep.mubr.msk.f32.mxu0 %vm7395_vm3, %v2143_v29  ;;  %vm4388_vm14 = vmpackc.low %vm2467_vm1, %vm2463_vm11  ;;  %vm2479_vm3 = vcmp.eq.s32.totalorder %v5603_v46, %v6412_v47  ;;  %vm2492_vm11 = vcmp.eq.s32.totalorder %v5636_v6, %v6397_v34 }
 0x8fe   :  { %4383 = vmatprep.subr.msk.bf16.mxu0 %vm4382_vm2, %v7365_v22  ;;  %vm2475_vm2 = vcmp.eq.s32.totalorder %v5562_v14, %v6412_v47 }
 0x8ff   :  { %vm4392_vm6 = vmpackc.low %vm2475_vm2, %vm2471_vm4  ;;  %vm2498_vm4 = vcmp.eq.s32.totalorder %v5683_v43, %v6241_v15  ;;  %vm2496_vm2 = vcmp.eq.s32.totalorder %v5672_v54, %v6397_v34 }
 0x900   :  { %4051 = vmatmul.mubr.msk.f32.vlgmr.msra.gmra.mrb[22].mxu0 %vm7396_vm7, %v2146_v30 }
 0x901   :  { %4385 = vmatpush1.bf16.msk.msra.mxu0 %vm4384_vm15, %v7365_v22  ;;  %2722 = vmatprep.mubr.f32.mxu0 %v7334_v0  ;;  %vm2483_vm15 = vcmp.eq.s32.totalorder %v5606_v60, %v6412_v47  ;;  %v2248_v60 = vpop.permute.xlu0 %2247 }
 0x902   :  { %4387 = vmatprep.subr.msk.bf16.mxu0 %vm4386_vm8, %v7365_v22  ;;  %vm2488_vm8 = vcmp.eq.s32.totalorder %v5633_v56, %v6397_v34  ;;  %vm4396_vm1 = vmpackc.low %vm2483_vm15, %vm2479_vm3  ;;  %vm2495_vm3 = vcmp.eq.s32.totalorder %v5672_v54, %v6412_v47  ;;  %vm2499_vm15 = vcmp.eq.s32.totalorder %v5683_v43, %v6412_v47 }
 0x903   :  { %vm4398_vm7 = vmpackc.low %vm2492_vm11, %vm2488_vm8 }
 0x904   :  { %vm4402_vm8 = vmpackc.low %vm2500_vm13, %vm2496_vm2  ;;  %vm2505_vm2 = vcmp.eq.s32.totalorder %v5710_v58, %v6258_v25  ;;  %vm2503_vm13 = vcmp.eq.s32.totalorder %v5700_v59, %v6412_v47 }
 0x905   :  { %4389 = vmatpush1.bf16.msk.msra.mxu0 %vm4388_vm14, %v7365_v22  ;;  %vm4400_vm14 = vmpackc.low %vm2491_vm10, %vm2487_vm5  ;;  %vm2506_vm5 = vcmp.eq.s32.totalorder %v5710_v58, %v6241_v15  ;;  %vm2504_vm10 = vcmp.eq.s32.totalorder %v5700_v59, %v6397_v34  ;;  %v2253_v56 = vpop.permute.xlu1 %2252 }
 0x906   :  { %4391 = vmatprep.subr.msk.bf16.mxu0 %vm4390_vm12, %v7365_v22  ;;  %vm2494_vm12 = vcmp.eq.s32.totalorder %v5672_v54, %v6241_v15 }
 0x907   :  { %vm4370_vm9 = vmpackc.low %vm2498_vm4, %vm2494_vm12  ;;  %vm2501_vm4 = vcmp.eq.s32.totalorder %v5700_v59, %v6258_v25 }
 0x908   :  { %4371 = vmatprep.subr.msk.bf16.mxu1 %vm4370_vm9, %v7365_v22  ;;  %vm2507_vm9 = vcmp.eq.s32.totalorder %v5710_v58, %v6412_v47 }
 0x909   :  { %4393 = vmatpush1.bf16.msk.msra.mxu0 %vm4392_vm6, %v7365_v22  ;;  %vm2493_vm6 = vcmp.eq.s32.totalorder %v5672_v54, %v6258_v25 }
 0x90a   :  { %4395 = vmatprep.subr.msk.bf16.mxu0 %vm4394_vm0, %v7365_v22  ;;  %vm2497_vm0 = vcmp.eq.s32.totalorder %v5683_v43, %v6258_v25 }
 0x90b   :  { %vm4372_vm11 = vmpackc.low %vm2497_vm0, %vm2493_vm6 }
 0x90c   :  { %4373 = vmatpush1.bf16.msk.msra.mxu1 %vm4372_vm11, %v7365_v22  ;;  %vm4376_vm0 = vmpackc.low %vm2505_vm2, %vm2501_vm4  ;;  %vm2512_vm11 = vcmp.eq.s32.totalorder %v5727_v5, %v6397_v34 }
 0x90d   :  { %4397 = vmatpush1.bf16.msk.msra.mxu0 %vm4396_vm1, %v7365_v22  ;;  %vm4404_vm1 = vmpackc.low %vm2499_vm15, %vm2495_vm3  ;;  %vm2510_vm15 = vcmp.eq.s32.totalorder %v5727_v5, %v6241_v15 }
 0x90e   :  { %4399 = vmatprep.subr.msk.bf16.mxu0 %vm4398_vm7, %v7365_v22  ;;  %vm2502_vm7 = vcmp.eq.s32.totalorder %v5700_v59, %v6241_v15  ;;  %vm4408_vm3 = vmpackc.low %vm2507_vm9, %vm2503_vm13  ;;  %vm7398_vm9 = vcmask 130048  }
 0x90f   :  { %vm4374_vm12 = vmpackc.low %vm2506_vm5, %vm2502_vm7  ;;  %vm2509_vm5 = vcmp.eq.s32.totalorder %v5727_v5, %v6258_v25 }
 0x910   :  { %4375 = vmatprep.subr.msk.bf16.mxu1 %vm4374_vm12, %v7365_v22  ;;  %vm2515_vm12 = vcmp.eq.s32.totalorder %v5741_v41, %v6412_v47 }
 0x911   :  { %4401 = vmatpush1.bf16.msk.msra.mxu0 %vm4400_vm14, %v7365_v22  ;;  %vm2508_vm14 = vcmp.eq.s32.totalorder %v5710_v58, %v6397_v34  ;;  %4377 = vmatpush1.bf16.msk.msra.mxu1 %vm4376_vm0, %v7365_v22  ;;  %vm7400_vm0 = vcmp.lt.s32.totalorder %v5026_v13, 17 }
 0x912   :  { %4403 = vmatprep.subr.msk.bf16.mxu0 %vm4402_vm8, %v7365_v22  ;;  %vm4406_vm6 = vmpackc.low %vm2508_vm14, %vm2504_vm10  ;;  %vm2514_vm8 = vcmp.eq.s32.totalorder %v5741_v41, %v6241_v15  ;;  %vm2513_vm10 = vcmp.eq.s32.totalorder %v5741_v41, %v6258_v25  ;;  %vm2511_vm14 = vcmp.eq.s32.totalorder %v5727_v5, %v6412_v47  ;;  %v20_v15 = vstv %s7099_s12  ;;  %s7397_s12 = smov 111  }
 0x913   :  { %vm4378_vm7 = vmpackc.low %vm2514_vm8, %vm2510_vm15  ;;  %21 = vst [vmem:[#allocation2] sm:$0x1] %v20_v15 }
 0x914   :  { %4379 = vmatprep.subr.msk.bf16.mxu1 %vm4378_vm7, %v7365_v22  ;;  %vm4380_vm2 = vmpackc.low %vm2513_vm10, %vm2509_vm5  ;;  %vm7407_vm10 = vnez %v7209_v55 }
 0x915   :  { %4405 = vmatpush1.bf16.msk.msra.mxu0 %vm4404_vm1, %v7365_v22  ;;  %vm2516_vm1 = vcmp.eq.s32.totalorder %v5741_v41, %v6397_v34  ;;  %4381 = vmatpush1.bf16.msk.msra.mxu1 %vm4380_vm2, %v7365_v22  ;;  %vm4412_vm13 = vmpackc.low %vm2515_vm12, %vm2511_vm14  ;;  %vm7410_vm2 = vnez %v7249_v44 }
 0x916   :  { %4407 = vmatprep.subr.msk.bf16.mxu0 %vm4406_vm6, %v7365_v22  ;;  %vm4410_vm4 = vmpackc.low %vm2516_vm1, %vm2512_vm11  ;;  %vm7404_vm11 = vnez %v7244_v26 }
 0x917   :  { %vm7399_vm6 = vmmov %vm7398_vm9 }
 0x918   :  { %vm7402_vm15 = vmmov %vm7400_vm0 }
 0x919   :  { %4409 = vmatpush1.bf16.msk.msra.mxu0 %vm4408_vm3, %v7365_v22  ;;  %vm7401_vm3 = vmmov %vm7400_vm0 }
 0x91a   :  { %4411 = vmatprep.subr.msk.bf16.mxu0 %vm4410_vm4, %v7365_v22  ;;  %v3149_v24 = vld [vmem:[#allocation2] sm:$0x1]  ;;  %vm7403_vm8 = vmmov %vm7400_vm0 }
 0x91b   :  { %vm4467_vm1 = vmpackc.low %vm7404_vm11, %vm7404_vm11 }
 0x91c   :  { %vm7405_vm7 = vmmov %vm7400_vm0 }
 0x91d   :  { %4413 = vmatpush1.bf16.msk.msra.mxu0 %vm4412_vm13, %v7365_v22  ;;  %vm7406_vm5 = vmmov %vm7400_vm0 }
 0x91e   :  { %vm4415_vm14 = vmpackc.low %vm7407_vm10, %vm7407_vm10  ;;  %vm7425_vm10 = vcmp.ge.s32.totalorder %v5092_v48, 1 }
 0x91f   :  { %vm7408_vm12 = vmmov %vm7400_vm0 }
 0x920   :  { %vm7409_vm4 = vmmov %vm7400_vm0 }
 0x921   :  { %vm4418_vm13 = vmpackc.low %vm7410_vm2, %vm7410_vm2  ;;  %vm7428_vm2 = vcmp.ge.s32.totalorder %v5094_v49, 1 }
 0x9cb   :  { %v3872_v20 = vpop.f32.mrb[18].mxu0 }
 0x9cc   :  { %v3873_v63 = vpop.f32.mrb[19].mxu0 }
 0x9cd   :  { %v3874_v12 = vadd.f32 %v3873_v63, %v3872_v20 }
 0x9cf   :  { %v3875_v11 = vpop.f32.mrb[20].mxu0  ;;  %v2328_v54 = vadd.f32 %v3874_v12, %v2248_v60 }
 0x9d0   :  { %v3876_v14 = vpop.f32.mrb[21].mxu0 }
 0x9d1   :  { %v3877_v46 = vadd.f32 %v3876_v14, %v3875_v11 }
 0x9d3   :  { %v2333_v41 = vadd.f32 %v3877_v46, %v2253_v56  ;;  %v4052_v6 = vpop.f32.mrb[22].mxu0 }
 0x9d4   :  { %v2402_v43 = vpop.f32.mrb[23].mxu0 }
 0x9d5   :  { %v2408_v59 = vadd.f32 %v4052_v6, %v2333_v41  ;;  %v2403_v58 = vadd.f32 %v2402_v43, %v2328_v54 }
 0x9d7   :  { %v2411_v5 = vmax.f32 %v2403_v58, 0.0  ;;  %v2412_v22 = vmax.f32 %v2408_v59, 0.0 }
 0x9d9   :  { %2646 = vmatmul.mubr.f32.vlgmr.msra.gmra.mrb[22].mxu1 %v2411_v5  ;;  %2723 = vmatmul.mubr.f32.vlgmr.msra.gmra.mrb[24].mxu0 %v2411_v5 }
 0x9da   :  { %2651 = vmatprep.mubr.f32.mxu1 %v7334_v0  ;;  %2728 = vmatprep.mubr.f32.mxu0 %v7334_v0 }
 0x9dd   :  { %2652 = vmatmul.mubr.f32.gmra.mrb[24].mxu1 %v2412_v22  ;;  %2729 = vmatmul.mubr.f32.gmra.mrb[26].mxu0 %v2412_v22 }
 0x9de   :  { %3649 = vmatprep.mubr.msk.f32.mxu1 %vm7398_vm9, %v2736_v61  ;;  %3682 = vmatprep.mubr.msk.f32.mxu0 %vm7399_vm6, %v2736_v61  ;;  %vm7411_vm9 = vnez %v7237_v42 }
 0x9df   :  { %vm4470_vm6 = vmpackc.low %vm7411_vm9, %vm7411_vm9  ;;  %vm7431_vm9 = vcmp.lt.s32.totalorder %v5026_v13, 15 }
 0xaac   :  { %v6547_v25 = vpop.f32.mrb[22].mxu1  ;;  %v6549_v28 = vpop.f32.mrb[24].mxu0 }
 0xaad   :  { %v6551_v9 = vpop.f32.mrb[23].mxu1  ;;  %v6553_v45 = vpop.f32.mrb[25].mxu0 }
 0xab0   :  { %v6555_v35 = vpop.f32.mrb[24].mxu1  ;;  %v6557_v2 = vpop.f32.mrb[26].mxu0 }
 0xab1   :  { %v6559_v38 = vpop.f32.mrb[25].mxu1  ;;  %v6561_v27 = vpop.f32.mrb[27].mxu0  ;;  %v4745_v57 = vpack.i.bf16 %v6557_v2, %v6549_v28  ;;  %v4740_v8 = vpack.i.bf16 %v6555_v35, %v6547_v25  ;;  %v4440_v18 = vpack.c.bf16 %v6555_v35, %v6547_v25  ;;  %v4492_v52 = vpack.c.bf16 %v6557_v2, %v6549_v28  ;;  %v7511_v25 = vld [vmem:[#allocation18_spill] sm:$0xff] }
 0xab2   :  { %v4805_v23 = vpack.i.bf16 %v6561_v27, %v6553_v45  ;;  %v4800_v3 = vpack.i.bf16 %v6559_v38, %v6551_v9  ;;  %v4438_v17 = vpack.c.bf16 %v6559_v38, %v6551_v9  ;;  %v4490_v62 = vpack.c.bf16 %v6561_v27, %v6553_v45 }
 0xab3   :  { %4746 = vrot.lane.b32.xlu1 %v4745_v57, %s4902_s16  ;;  %4741 = vrot.lane.b32.xlu0 %v4740_v8, %s4902_s16 }
 0xab7   :  { %4756 = vrot.lane.b32.xlu1 %v4745_v57, %s4901_s15  ;;  %4751 = vrot.lane.b32.xlu0 %v4740_v8, %s4901_s15 }
 0xabb   :  { %4766 = vrot.lane.b32.xlu1 %v4745_v57, %s4900_s0  ;;  %4761 = vrot.lane.b32.xlu0 %v4740_v8, %s4900_s0 }
 0xabf   :  { %4776 = vrot.lane.b32.xlu1 %v4745_v57, %s4903_s17  ;;  %4771 = vrot.lane.b32.xlu0 %v4740_v8, %s4903_s17 }
 0xac3   :  { %4781 = vrot.lane.b32.xlu1 %v4745_v57, %s4904_s18  ;;  %4786 = vrot.lane.b32.xlu0 %v4740_v8, %s4904_s18 }
 0xac7   :  { %4791 = vrot.lane.b32.xlu1 %v4745_v57, %s4905_s19  ;;  %4796 = vrot.lane.b32.xlu0 %v4740_v8, %s4905_s19 }
 0xacb   :  { %4806 = vrot.lane.b32.xlu0 %v4805_v23, %s4902_s16  ;;  %4801 = vrot.lane.b32.xlu1 %v4800_v3, %s4902_s16 }
 0xacf   :  { %4816 = vrot.lane.b32.xlu0 %v4805_v23, %s4901_s15  ;;  %4811 = vrot.lane.b32.xlu1 %v4800_v3, %s4901_s15 }
 0xad3   :  { %4826 = vrot.lane.b32.xlu0 %v4805_v23, %s4900_s0  ;;  %4821 = vrot.lane.b32.xlu1 %v4800_v3, %s4900_s0 }
 0xad7   :  { %4841 = vrot.lane.b32.xlu0 %v4740_v8, %s4906_s20  ;;  %4831 = vrot.lane.b32.xlu1 %v4800_v3, %s4903_s17 }
 0xadb   :  { %4851 = vrot.lane.b32.xlu0 %v4805_v23, %s4903_s17  ;;  %4836 = vrot.lane.b32.xlu1 %v4745_v57, %s4906_s20 }
 0xadf   :  { %4856 = vrot.lane.b32.xlu0 %v4800_v3, %s4904_s18  ;;  %4846 = vrot.lane.b32.xlu1 %v4745_v57, %s7397_s12 }
 0xae3   :  { %4866 = vrot.lane.b32.xlu0 %v4800_v3, %s4905_s19  ;;  %4861 = vrot.lane.b32.xlu1 %v4805_v23, %s4904_s18 }
 0xae7   :  { %4876 = vrot.lane.b32.xlu0 %v4800_v3, %s4906_s20  ;;  %4871 = vrot.lane.b32.xlu1 %v4805_v23, %s4905_s19 }
 0xaeb   :  { %4886 = vrot.lane.b32.xlu0 %v4800_v3, %s7397_s12  ;;  %4881 = vrot.lane.b32.xlu1 %v4805_v23, %s4906_s20 }
 0xaef   :  { %4891 = vrot.lane.b32.xlu0 %v4740_v8, %s7397_s12  ;;  %4896 = vrot.lane.b32.xlu1 %v4805_v23, %s7397_s12 }
 0xaf3   :  { %2996 = vperm.xlu0 %4644, %v2737_v21   ;;  %3152 = vperm.xlu1 %4613, %v3149_v24  }
 0xb25   :  { %v4747_v16 = vpop.permute.xlu1 %4746  ;;  %v4742_v40 = vpop.permute.xlu0 %4741 }
 0xb26   :  { %v4749_v19 = vunpack.i.h.bf16 %v4747_v16  ;;  %v4748_v29 = vunpack.i.l.bf16 %v4747_v16  ;;  %v4744_v30 = vunpack.i.h.bf16 %v4742_v40  ;;  %v4743_v20 = vunpack.i.l.bf16 %v4742_v40 }
 0xb29   :  { %v6619_v39 = vpop.permute.xlu1 %4756  ;;  %v6621_v34 = vpop.permute.xlu0 %4751 }
 0xb2a   :  { %v4759_v63 = vunpack.i.h.bf16 %v6619_v39  ;;  %v4758_v12 = vunpack.i.l.bf16 %v6619_v39  ;;  %v4754_v11 = vunpack.i.h.bf16 %v6621_v34  ;;  %v4753_v14 = vunpack.i.l.bf16 %v6621_v34 }
 0xb2d   :  { %v6623_v37 = vpop.permute.xlu1 %4766  ;;  %v6625_v31 = vpop.permute.xlu0 %4761 }
 0xb2e   :  { %v4769_v43 = vunpack.i.h.bf16 %v6623_v37  ;;  %v4768_v59 = vunpack.i.l.bf16 %v6623_v37  ;;  %v4764_v58 = vunpack.i.h.bf16 %v6625_v31  ;;  %v4763_v5 = vunpack.i.l.bf16 %v6625_v31  ;;  %v7443_v31 = vld [vmem:[#allocation11_spill] sm:$0xff] }
 0xb31   :  { %v6627_v7 = vpop.permute.xlu1 %4776  ;;  %v6629_v4 = vpop.permute.xlu0 %4771 }
 0xb35   :  { %v6631_v10 = vpop.permute.xlu1 %4781  ;;  %v6633_v32 = vpop.permute.xlu0 %4786 }
 0xb36   :  { %v4783_v42 = vunpack.i.l.bf16 %v6631_v10 }
 0xb39   :  { %v6635_v47 = vpop.permute.xlu1 %4791  ;;  %v6637_v36 = vpop.permute.xlu0 %4796 }
 0xb3d   :  { %v4807_v46 = vpop.permute.xlu0 %4806  ;;  %v4802_v60 = vpop.permute.xlu1 %4801 }
 0xb3e   :  { %v4809_v56 = vunpack.i.h.bf16 %v4807_v46  ;;  %v4808_v41 = vunpack.i.l.bf16 %v4807_v46  ;;  %v4804_v6 = vunpack.i.h.bf16 %v4802_v60  ;;  %v4803_v54 = vunpack.i.l.bf16 %v4802_v60 }
 0xb40   :  { %v2755_v22 = vsel %vm7400_vm0, %v4749_v19, %v4809_v56  ;;  %v2754_v15 = vsel %vm7401_vm3, %v4748_v29, %v4808_v41  ;;  %v2760_v57 = vsel %vm7402_vm15, %v4808_v41, %v4743_v20  ;;  %v2761_v8 = vsel %vm7403_vm8, %v4809_v56, %v4744_v30 }
 0xb41   :  { %v4417_v23 = vpack.c.bf16 %v2761_v8, %v2760_v57  ;;  %v4466_v3 = vpack.c.bf16 %v2755_v22, %v2754_v15  ;;  %v2757_v61 = vsel %vm7405_vm7, %v4804_v6, %v4749_v19  ;;  %v2759_v21 = vsel %vm7406_vm5, %v4744_v30, %v4804_v6  ;;  %v4817_v24 = vpop.permute.xlu0 %4816  ;;  %v4812_v16 = vpop.permute.xlu1 %4811 }
 0xb42   :  { %v2756_v40 = vsel %vm7408_vm12, %v4803_v54, %v4748_v29  ;;  %v2758_v39 = vsel %vm7409_vm4, %v4743_v20, %v4803_v54  ;;  %v4819_v34 = vunpack.i.h.bf16 %v4817_v24  ;;  %v4818_v46 = vunpack.i.l.bf16 %v4817_v24 }
 0xb43   :  { %v4414_v19 = vpack.c.bf16 %v2759_v21, %v2758_v39  ;;  %v4469_v30 = vpack.c.bf16 %v2757_v61, %v2756_v40  ;;  %v4814_v60 = vunpack.i.h.bf16 %v4812_v16  ;;  %v4813_v56 = vunpack.i.l.bf16 %v4812_v16  ;;  %4468 = vmatprep.subr.msk.bf16.mxu0 %vm4467_vm1, %v4466_v3 }
 0xb44   :  { %vm7412_vm0 = vcmp.lt.s32.totalorder %v5026_v13, 16  ;;  %vm7416_vm7 = vcmp.ge.s32.totalorder %v5096_v50, 1  ;;  %vm7421_vm12 = vcmp.ge.s32.totalorder %v5068_v33, 1 }
 0xb45   :  { %v2787_v29 = vsel %vm7412_vm0, %v4759_v63, %v4819_v34  ;;  %vm7413_vm3 = vmmov %vm7412_vm0  ;;  %4416 = vmatprep.subr.msk.bf16.mxu1 %vm4415_vm14, %v4414_v19  ;;  %v4827_v8 = vpop.permute.xlu0 %4826  ;;  %v4822_v3 = vpop.permute.xlu1 %4821  ;;  %4471 = vmatpush1.bf16.msk.msra.mxu0 %vm4470_vm6, %v4469_v30 }
 0xb46   :  { %v2786_v20 = vsel %vm7413_vm3, %v4758_v12, %v4818_v46  ;;  %vm7414_vm15 = vmmov %vm7412_vm0  ;;  %4419 = vmatpush1.bf16.msk.msra.mxu1 %vm4418_vm13, %v4417_v23  ;;  %v4829_v55 = vunpack.i.h.bf16 %v4827_v8  ;;  %v4828_v21 = vunpack.i.l.bf16 %v4827_v8  ;;  %v4824_v44 = vunpack.i.h.bf16 %v4822_v3  ;;  %v7447_v8 = vld [vmem:[#allocation5_spill] sm:$0xff] }
 0xb47   :  { %v2792_v41 = vsel %vm7414_vm15, %v4818_v46, %v4753_v14  ;;  %vm7415_vm8 = vmmov %vm7412_vm0  ;;  %v4472_v22 = vpack.c.bf16 %v2787_v29, %v2786_v20  ;;  %v4823_v16 = vunpack.i.l.bf16 %v4822_v3  ;;  %v4774_v46 = vunpack.i.h.bf16 %v6629_v4 }
 0xb48   :  { %v2793_v6 = vsel %vm7415_vm8, %v4819_v34, %v4754_v11  ;;  %vm6691_vm11 = vmpackc.low %vm7416_vm7, %vm7416_vm7  ;;  %v2819_v23 = vsel %vm7431_vm9, %v4769_v43, %v4829_v55  ;;  %vm7435_vm7 = vnez %v7229_v53  ;;  %v4773_v20 = vunpack.i.l.bf16 %v6629_v4 }
 0xb49   :  { %v4423_v54 = vpack.c.bf16 %v2793_v6, %v2792_v41  ;;  %vm7419_vm1 = vmmov %vm7412_vm0  ;;  %4474 = vmatprep.subr.msk.bf16.mxu0 %vm6691_vm11, %v4472_v22  ;;  %v4832_v29 = vpop.permute.xlu1 %4831  ;;  %v7441_v6 = vld [vmem:[#allocation9_spill] sm:$0xff] }
 0xb4a   :  { %v2789_v15 = vsel %vm7419_vm1, %v4814_v60, %v4759_v63  ;;  %vm7420_vm5 = vmmov %vm7412_vm0  ;;  %v2788_v63 = vsel %vm7412_vm0, %v4813_v56, %v4758_v12  ;;  %v4834_v26 = vunpack.i.h.bf16 %v4832_v29  ;;  %v4833_v22 = vunpack.i.l.bf16 %v4832_v29  ;;  %v7461_v29 = vld [vmem:[#allocation8_spill] sm:$0xff] }
 0xb4b   :  { %v2791_v57 = vsel %vm7420_vm5, %v4754_v11, %v4814_v60  ;;  %vm6707_vm4 = vmpackc.low %vm7421_vm12, %vm7421_vm12  ;;  %v4475_v24 = vpack.c.bf16 %v2789_v15, %v2788_v63  ;;  %vm7438_vm12 = vnez %v7207_v51 }
 0xb4c   :  { %vm7424_vm3 = vmmov %vm7412_vm0 }
 0xb4d   :  { %v2790_v11 = vsel %vm7424_vm3, %v4753_v14, %v4813_v56  ;;  %vm6728_vm14 = vmpackc.low %vm7425_vm10, %vm7425_vm10  ;;  %v6763_v56 = vpop.permute.xlu0 %4841 }
 0xb4e   :  { %v4420_v14 = vpack.c.bf16 %v2791_v57, %v2790_v11  ;;  %vm6737_vm13 = vmpackc.low %vm7428_vm2, %vm7428_vm2  ;;  %v6803_v57 = vpop.permute.xlu1 %4836  ;;  %v7451_v11 = vld [vmem:[#allocation3_spill] sm:$0xff] }
 0xb4f   :  { %vm7432_vm6 = vmmov %vm7431_vm9  ;;  %4477 = vmatpush1.bf16.msk.msra.mxu0 %vm6737_vm13, %v4475_v24  ;;  %vm7444_vm9 = vnez %v7443_v31  ;;  %vm7445_vm13 = vcmp.lt.s32.totalorder %v5026_v13, 1 }
 0xb50   :  { %v2818_v40 = vsel %vm7432_vm6, %v4768_v59, %v4828_v21  ;;  %vm7433_vm15 = vmmov %vm7432_vm6  ;;  %4422 = vmatprep.subr.msk.bf16.mxu1 %vm6707_vm4, %v4420_v14  ;;  %vm7442_vm4 = vnez %v7441_v6 }
 0xb51   :  { %v2824_v39 = vsel %vm7433_vm15, %v4828_v21, %v4763_v5  ;;  %vm7434_vm8 = vmmov %vm7432_vm6  ;;  %v4478_v19 = vpack.c.bf16 %v2819_v23, %v2818_v40  ;;  %4425 = vmatpush1.bf16.msk.msra.mxu1 %vm6728_vm14, %v4423_v54  ;;  %v2855_v54 = vsel %vm7445_vm13, %v4774_v46, %v4834_v26  ;;  %v4852_v53 = vpop.permute.xlu0 %4851  ;;  %vm7448_vm15 = vnez %v7447_v8 }
 0xb52   :  { %v2825_v34 = vsel %vm7434_vm8, %v4829_v55, %v4764_v58  ;;  %vm4479_vm11 = vmpackc.low %vm7435_vm7, %vm7435_vm7  ;;  %v4854_v3 = vunpack.i.h.bf16 %v4852_v53  ;;  %v4853_v61 = vunpack.i.l.bf16 %v4852_v53  ;;  %v4839_v53 = vunpack.i.h.bf16 %v6803_v57 }
 0xb53   :  { %vm7436_vm1 = vmmov %vm7432_vm6  ;;  %v4429_v41 = vpack.c.bf16 %v2825_v34, %v2824_v39  ;;  %4480 = vmatprep.subr.msk.bf16.mxu0 %vm4479_vm11, %v4478_v19  ;;  %v6837_v34 = vpop.permute.xlu1 %4846  ;;  %v4789_v19 = vunpack.i.h.bf16 %v6633_v32  ;;  %v4838_v8 = vunpack.i.l.bf16 %v6803_v57 }
 0xb54   :  { %v2821_v30 = vsel %vm7436_vm1, %v4824_v44, %v4769_v43  ;;  %vm7437_vm5 = vmmov %vm7436_vm1 }
 0xb55   :  { %v2823_v60 = vsel %vm7437_vm5, %v4764_v58, %v4824_v44  ;;  %vm4427_vm0 = vmpackc.low %vm7438_vm12, %vm7438_vm12  ;;  %v7459_v44 = vld [vmem:[#allocation10_spill] sm:$0xff]  ;;  %v4857_v39 = vpop.permute.xlu0 %4856 }
 0xb56   :  { %vm7439_vm3 = vmmov %vm7436_vm1 }
 0xb57   :  { %v2820_v43 = vsel %vm7439_vm3, %v4823_v16, %v4768_v59  ;;  %vm7440_vm10 = vmmov %vm7436_vm1  ;;  %v4779_v59 = vunpack.i.h.bf16 %v6627_v7  ;;  %vm7452_vm1 = vcmp.ge.s32.totalorder %v7451_v11, 1 }
 0xb58   :  { %v2822_v58 = vsel %vm7440_vm10, %v4763_v5, %v4823_v16  ;;  %vm4430_vm2 = vmpackc.low %vm7442_vm4, %vm7442_vm4  ;;  %v4481_v37 = vpack.c.bf16 %v2821_v30, %v2820_v43  ;;  %v4778_v5 = vunpack.i.l.bf16 %v6627_v7  ;;  %vm7460_vm4 = vnez %v7459_v44 }
 0xb59   :  { %v4426_v4 = vpack.c.bf16 %v2823_v60, %v2822_v58  ;;  %vm4482_vm14 = vmpackc.low %vm7444_vm9, %vm7444_vm9  ;;  %v4784_v16 = vunpack.i.h.bf16 %v6631_v10  ;;  %v4788_v30 = vunpack.i.l.bf16 %v6633_v32  ;;  %v4859_v60 = vunpack.i.h.bf16 %v4857_v39 }
 0xb5a   :  { %vm7446_vm6 = vmmov %vm7445_vm13  ;;  %4483 = vmatpush1.bf16.msk.msra.mxu0 %vm4482_vm14, %v4481_v37  ;;  %vm7462_vm9 = vnez %v7461_v29  ;;  %v4799_v10 = vunpack.i.h.bf16 %v6637_v36  ;;  %v4798_v32 = vunpack.i.l.bf16 %v6637_v36  ;;  %v4844_v58 = vunpack.i.h.bf16 %v6763_v56  ;;  %v7501_v36 = vld [vmem:[#allocation15_spill] sm:$0xff] }
 0xb5b   :  { %v2854_v15 = vsel %vm7446_vm6, %v4773_v20, %v4833_v22  ;;  %4428 = vmatprep.subr.msk.bf16.mxu1 %vm4427_vm0, %v4426_v4  ;;  %vm4433_vm8 = vmpackc.low %vm7448_vm15, %vm7448_vm15  ;;  %vm7463_vm13 = vcmp.lt.s32.totalorder %v5026_v13, 127  ;;  %v4843_v37 = vunpack.i.l.bf16 %v6763_v56  ;;  %v7516_v56 = vld [vmem:[#allocation16_spill] sm:$0xff] }
 0xb5c   :  { %v4432_v7 = vpack.c.bf16 %v2855_v54, %v2854_v15  ;;  %4431 = vmatpush1.bf16.msk.msra.mxu1 %vm4430_vm2, %v4429_v41  ;;  %vm7449_vm7 = vmmov %vm7446_vm6  ;;  %v4793_v41 = vunpack.i.l.bf16 %v6635_v47  ;;  %v2885_v6 = vsel %vm7463_vm13, %v4859_v60, %v4784_v16  ;;  %v7467_v54 = vld [vmem:[#allocation4_spill] sm:$0xff] }
 0xb5d   :  { %v2853_v51 = vsel %vm7449_vm7, %v4834_v26, %v4779_v59  ;;  %vm7450_vm11 = vmmov %vm7446_vm6  ;;  %vm7468_vm7 = vnez %v7467_v54 }
 0xb5e   :  { %v2852_v63 = vsel %vm7450_vm11, %v4833_v22, %v4778_v5  ;;  %vm6820_vm5 = vmpackc.low %vm7452_vm1, %vm7452_vm1  ;;  %4434 = vmatprep.subr.msk.bf16.mxu1 %vm4433_vm8, %v4432_v7  ;;  %v4849_v7 = vunpack.i.h.bf16 %v6837_v34  ;;  %vm7469_vm1 = vcmp.lt.s32.totalorder %v5026_v13, 113 }
 0xb5f   :  { %vm7455_vm12 = vmmov %vm7446_vm6  ;;  %v4487_v43 = vpack.c.bf16 %v2853_v51, %v2852_v63 }
 0xb60   :  { %v2851_v21 = vsel %vm7455_vm12, %v4779_v59, %v4854_v3  ;;  %vm7456_vm0 = vmmov %vm7446_vm6  ;;  %v4867_v59 = vpop.permute.xlu0 %4866 }
 0xb61   :  { %v2850_v12 = vsel %vm7456_vm0, %v4778_v5, %v4853_v61  ;;  %vm7457_vm3 = vmmov %vm7456_vm0  ;;  %v4862_v5 = vpop.permute.xlu1 %4861  ;;  %v4869_v9 = vunpack.i.h.bf16 %v4867_v59  ;;  %v4868_v38 = vunpack.i.l.bf16 %v4867_v59  ;;  %v7499_v59 = vld [vmem:[#allocation12_spill] sm:$0xff] }
 0xb62   :  { %v2856_v14 = vsel %vm7457_vm3, %v4853_v61, %v4773_v20  ;;  %vm7458_vm10 = vmmov %vm7456_vm0  ;;  %v4484_v40 = vpack.c.bf16 %v2851_v21, %v2850_v12  ;;  %v4794_v20 = vunpack.i.h.bf16 %v6635_v47  ;;  %v4863_v15 = vunpack.i.l.bf16 %v4862_v5  ;;  %v7478_v21 = vld [vmem:[#allocation14_spill] sm:$0xff] }
 0xb63   :  { %v2857_v24 = vsel %vm7458_vm10, %v4854_v3, %v4774_v46  ;;  %vm4485_vm2 = vmpackc.low %vm7460_vm4, %vm7460_vm4  ;;  %v4858_v46 = vunpack.i.l.bf16 %v4857_v39  ;;  %v4848_v3 = vunpack.i.l.bf16 %v6837_v34  ;;  %vm7472_vm0 = vcmp.lt.s32.totalorder %v7451_v11, 15  ;;  %v2735_v34 = vld [vmem:[%s7100_s9] sm:$0xff] }
 0xb64   :  { %v4435_v23 = vpack.c.bf16 %v2857_v24, %v2856_v14  ;;  %vm4488_vm14 = vmpackc.low %vm7462_vm9, %vm7462_vm9  ;;  %4486 = vmatprep.subr.msk.bf16.mxu0 %vm4485_vm2, %v4484_v40  ;;  %v2917_v51 = vsel %vm7469_vm1, %v4869_v9, %v4794_v20  ;;  %v4877_v11 = vpop.permute.xlu0 %4876  ;;  %vm7479_vm9 = vnez %v7478_v21  ;;  %v7484_v40 = vld [vmem:[#allocation6_spill] sm:$0xff] }
 0xb65   :  { %vm7464_vm6 = vmmov %vm7463_vm13  ;;  %4489 = vmatpush1.bf16.msk.msra.mxu0 %vm4488_vm14, %v4487_v43  ;;  %v4872_v55 = vpop.permute.xlu1 %4871  ;;  %v4879_v24 = vunpack.i.h.bf16 %v4877_v11  ;;  %v4878_v44 = vunpack.i.l.bf16 %v4877_v11 }
 0xb66   :  { %4437 = vmatpush1.bf16.msk.msra.mxu1 %vm6820_vm5, %v4435_v23  ;;  %v2884_v4 = vsel %vm7464_vm6, %v4858_v46, %v4783_v42  ;;  %vm7465_vm15 = vmmov %vm7464_vm6  ;;  %4491 = vmatprep.subr.bf16.mxu0 %v4490_v62  ;;  %v4873_v23 = vunpack.i.l.bf16 %v4872_v55 }
 0xb67   :  { %4439 = vmatprep.subr.bf16.mxu1 %v4438_v17  ;;  %v2887_v26 = vsel %vm7465_vm15, %v4789_v19, %v4859_v60  ;;  %vm7466_vm8 = vmmov %vm7464_vm6  ;;  %v4442_v31 = vpack.c.bf16 %v2885_v6, %v2884_v4  ;;  %v4864_v17 = vunpack.i.h.bf16 %v4862_v5  ;;  %v7489_v60 = vld [vmem:[#allocation13_spill] sm:$0xff] }
 0xb68   :  { %v2886_v22 = vsel %vm7466_vm8, %v4788_v30, %v4858_v46  ;;  %vm4443_vm11 = vmpackc.low %vm7468_vm7, %vm7468_vm7  ;;  %vm7485_vm7 = vnez %v7484_v40  ;;  %v4887_v4 = vpop.permute.xlu0 %4886 }
 0xb69   :  { %v4445_v61 = vpack.c.bf16 %v2887_v26, %v2886_v22  ;;  %vm7470_vm5 = vmmov %vm7469_vm1  ;;  %4493 = vmatpush1.bf16.msra.mxu0 %v4492_v52  ;;  %v4874_v52 = vunpack.i.h.bf16 %v4872_v55  ;;  %v4882_v26 = vpop.permute.xlu1 %4881 }
 0xb6a   :  { %4441 = vmatpush1.bf16.msra.mxu1 %v4440_v18  ;;  %v2919_v45 = vsel %vm7470_vm5, %v4799_v10, %v4869_v9  ;;  %vm7471_vm12 = vmmov %vm7469_vm1  ;;  %v4883_v54 = vunpack.i.l.bf16 %v4882_v26 }
 0xb6b   :  { %v2916_v27 = vsel %vm7471_vm12, %v4868_v38, %v4793_v41  ;;  %4444 = vmatprep.subr.msk.bf16.mxu1 %vm4443_vm11, %v4442_v31  ;;  %vm6899_vm3 = vmpackc.low %vm7472_vm0, %vm7472_vm0  ;;  %vm7490_vm0 = vnez %v7489_v60  ;;  %v4888_v31 = vunpack.i.l.bf16 %v4887_v4 }
 0xb6c   :  { %vm7475_vm10 = vmmov %vm7469_vm1  ;;  %v4448_v62 = vpack.c.bf16 %v2917_v51, %v2916_v27  ;;  %vm7486_vm1 = vcmp.lt.s32.totalorder %v5026_v13, 112 }
 0xb6d   :  { %v2918_v35 = vsel %vm7475_vm10, %v4798_v32, %v4868_v38  ;;  %vm7476_vm4 = vmmov %vm7464_vm6  ;;  %v2951_v39 = vsel %vm7486_vm1, %v4844_v58, %v4879_v24  ;;  %v4897_v27 = vpop.permute.xlu1 %4896 }
 0xb6e   :  { %v2883_v18 = vsel %vm7476_vm4, %v4784_v16, %v4864_v17  ;;  %vm7477_vm2 = vmmov %vm7476_vm4  ;;  %v7482_v16 = vld [vmem:[#allocation7_spill] sm:$0xff]  ;;  %4447 = vmatpush1.bf16.msk.msra.mxu1 %vm6899_vm3, %v4445_v61  ;;  %vm7492_vm4 = vcmp.lt.s32.totalorder %v5026_v13, 113 }
 0xb6f   :  { %v2889_v63 = vsel %vm7477_vm2, %v4864_v17, %v4789_v19  ;;  %vm4449_vm14 = vmpackc.low %vm7479_vm9, %vm7479_vm9  ;;  %vm7483_vm15 = vnez %v7482_v16  ;;  %v2915_v43 = vsel %vm7492_vm4, %v4794_v20, %v4874_v52  ;;  %vm7494_vm9 = vcmp.lt.s32.totalorder %v5068_v33, 15 }
 0xb70   :  { %vm7480_vm13 = vmmov %vm7477_vm2  ;;  %4450 = vmatprep.subr.msk.bf16.mxu1 %vm4449_vm14, %v4448_v62  ;;  %v4889_v33 = vunpack.i.h.bf16 %v4887_v4  ;;  %v4899_v62 = vunpack.i.h.bf16 %v4897_v27 }
 0xb71   :  { %v2882_v12 = vsel %vm7480_vm13, %v4783_v42, %v4863_v15  ;;  %vm7481_vm6 = vmmov %vm7477_vm2  ;;  %v4451_v42 = vpack.c.bf16 %v2919_v45, %v2918_v35  ;;  %v4892_v45 = vpop.permute.xlu0 %4891 }
 0xb72   :  { %v2888_v14 = vsel %vm7481_vm6, %v4863_v15, %v4788_v30  ;;  %vm4495_vm8 = vmpackc.low %vm7483_vm15, %vm7483_vm15  ;;  %v4497_v2 = vpack.c.bf16 %v2883_v18, %v2882_v12  ;;  %vm7500_vm15 = vnez %v7499_v59  ;;  %v4898_v18 = vunpack.i.l.bf16 %v4897_v27 }
 0xb73   :  { %v4494_v28 = vpack.c.bf16 %v2889_v63, %v2888_v14  ;;  %vm4498_vm11 = vmpackc.low %vm7485_vm7, %vm7485_vm7  ;;  %v7523_v14 = vld [vmem:[#allocation17_spill] sm:$0xff] }
 0xb74   :  { %vm7487_vm5 = vmmov %vm7486_vm1 }
 0xb75   :  { %v2948_v19 = vsel %vm7487_vm5, %v4878_v44, %v4838_v8  ;;  %vm7488_vm12 = vmmov %vm7486_vm1  ;;  %4496 = vmatprep.subr.msk.bf16.mxu0 %vm4495_vm8, %v4494_v28 }
 0xb76   :  { %v2949_v30 = vsel %vm7488_vm12, %v4879_v24, %v4839_v53  ;;  %vm4452_vm3 = vmpackc.low %vm7490_vm0, %vm7490_vm0  ;;  %4499 = vmatpush1.bf16.msk.msra.mxu0 %vm4498_vm11, %v4497_v2  ;;  %vm7503_vm11 = vcmp.lt.s32.totalorder %v5026_v13, 111  ;;  %vm7505_vm12 = vcmp.lt.s32.totalorder %v5092_v48, 15  ;;  %v7525_v24 = vld [vmem:[#allocation19_spill] sm:$0xff]  ;;  %v2997_v13 = vpop.permute.xlu0 %2996 }
 0xb77   :  { %vm7491_vm10 = vmmov %vm7486_vm1  ;;  %v4454_v29 = vpack.c.bf16 %v2949_v30, %v2948_v19  ;;  %4453 = vmatpush1.bf16.msk.msra.mxu1 %vm4452_vm3, %v4451_v42  ;;  %vm7502_vm1 = vnez %v7501_v36  ;;  %v2980_v9 = vsel %vm7503_vm11, %v4888_v31, %v4848_v3  ;;  %v3148_v19 = vld [vmem:[%s7102_s11] sm:$0x1] }
 0xb78   :  { %v2950_v46 = vsel %vm7491_vm10, %v4843_v37, %v4878_v44  ;;  %vm7493_vm2 = vmmov %vm7492_vm4 }
 0xb79   :  { %v2921_v6 = vsel %vm7493_vm2, %v4874_v52, %v4799_v10  ;;  %vm6967_vm14 = vmpackc.low %vm7494_vm9, %vm7494_vm9 }
 0xb7a   :  { %vm7497_vm13 = vmmov %vm7493_vm2  ;;  %4456 = vmatprep.subr.msk.bf16.mxu1 %vm6967_vm14, %v4454_v29  ;;  %v4919_v29 = vmov 1966171168  }
 0xb7b   :  { %v2914_v20 = vsel %vm7497_vm13, %v4793_v41, %v4873_v23  ;;  %vm7498_vm6 = vmmov %vm7493_vm2  ;;  %v4884_v41 = vunpack.i.h.bf16 %v4882_v26  ;;  %vm7512_vm2 = vnez %v7511_v25  ;;  %vm7514_vm13 = vcmp.lt.s32.totalorder %v5096_v50, 15 }
 0xb7c   :  { %v2920_v10 = vsel %vm7498_vm6, %v4873_v23, %v4798_v32  ;;  %vm4501_vm8 = vmpackc.low %vm7500_vm15, %vm7500_vm15  ;;  %v4503_v5 = vpack.c.bf16 %v2915_v43, %v2914_v20  ;;  %v4457_v32 = vpack.c.bf16 %v2951_v39, %v2950_v46  ;;  %vm7515_vm15 = vcmp.lt.s32.totalorder %v5094_v49, 15  ;;  %v3153_v46 = vpop.permute.xlu1 %3152 }
 0xb7d   :  { %v4500_v47 = vpack.c.bf16 %v2921_v6, %v2920_v10  ;;  %vm4504_vm7 = vmpackc.low %vm7502_vm1, %vm7502_vm1  ;;  %v3312_v43 = vunpack.c.l.s4 %v4919_v29  ;;  %v7527_v6 = vsub.s32 0, %v4996_v1 }
 0xb7e   :  { %vm7504_vm5 = vmmov %vm7503_vm11  ;;  %vm7517_vm11 = vnez %v7516_v56 }
 0xb7f   :  { %v2981_v38 = vsel %vm7504_vm5, %v4889_v33, %v4849_v7  ;;  %vm7008_vm0 = vmpackc.low %vm7505_vm12, %vm7505_vm12  ;;  %4502 = vmatprep.subr.msk.bf16.mxu0 %vm4501_vm8, %v4500_v47  ;;  %v3158_v4 = vrot.slane %v3153_v46, %v7527_v6 }
 0xb80   :  { %v4460_v15 = vpack.c.bf16 %v2981_v38, %v2980_v9  ;;  %vm7508_vm3 = vmmov %vm7491_vm10  ;;  %4505 = vmatpush1.bf16.msk.msra.mxu0 %vm4504_vm7, %v4503_v5  ;;  %4459 = vmatpush1.bf16.msk.msra.mxu1 %vm7008_vm0, %v4457_v32  ;;  %v7528_v38 = vlaneseq }
 0xb81   :  { %v2953_v61 = vsel %vm7508_vm3, %v4884_v41, %v4844_v58  ;;  %vm7509_vm10 = vmmov %vm7508_vm3 }
 0xb82   :  { %v2946_v51 = vsel %vm7509_vm10, %v4838_v8, %v4883_v54  ;;  %vm7510_vm4 = vmmov %vm7508_vm3  ;;  %v4893_v8 = vunpack.i.l.bf16 %v4892_v45 }
 0xb83   :  { %v2947_v48 = vsel %vm7510_vm4, %v4839_v53, %v4884_v41  ;;  %vm4461_vm9 = vmpackc.low %vm7512_vm2, %vm7512_vm2  ;;  %v4894_v53 = vunpack.i.h.bf16 %v4892_v45  ;;  %vm7524_vm4 = vnez %v7523_v14 }
 0xb84   :  { %vm7513_vm14 = vmmov %vm7508_vm3  ;;  %v4509_v58 = vpack.c.bf16 %v2947_v48, %v2946_v51  ;;  %4462 = vmatprep.subr.msk.bf16.mxu1 %vm4461_vm9, %v4460_v15  ;;  %vm7526_vm9 = vnez %v7525_v24 }
 0xb85   :  { %v2952_v57 = vsel %vm7513_vm14, %v4883_v54, %v4843_v37  ;;  %vm4507_vm6 = vmpackc.low %vm7514_vm13, %vm7514_vm13  ;;  %v2983_v50 = vsel %vm7504_vm5, %v4894_v53, %v4889_v33  ;;  %vm3159_vm13 = vcmask 64512   ;;  %v3313_v33 = vunpack.c.0.s8 %v3312_v43 }
 0xb86   :  { %v4506_v35 = vpack.c.bf16 %v2953_v61, %v2952_v57  ;;  %vm4510_vm8 = vmpackc.low %vm7515_vm15, %vm7515_vm15 }
 0xb87   :  { %vm4464_vm1 = vmpackc.low %vm7517_vm11, %vm7517_vm11  ;;  %v3316_v41 = vsub.s32 %v3313_v33, %v4996_v1 }
 0xb88   :  { %vm7518_vm7 = vmmov %vm7504_vm5  ;;  %4508 = vmatprep.subr.msk.bf16.mxu0 %vm4507_vm6, %v4506_v35  ;;  %vm3336_vm6 = vcmp.lt.s32.totalorder %v7528_v38, 512 }
 0xb89   :  { %v2982_v37 = vsel %vm7518_vm7, %v4893_v8, %v4888_v31  ;;  %vm7519_vm12 = vmmov %vm7504_vm5  ;;  %4511 = vmatpush1.bf16.msk.msra.mxu0 %vm4510_vm8, %v4509_v58 }
 0xb8a   :  { %v4463_v63 = vpack.c.bf16 %v2983_v50, %v2982_v37  ;;  %v2985_v11 = vsel %vm7519_vm12, %v4899_v62, %v4894_v53  ;;  %vm7520_vm0 = vmmov %vm7504_vm5 }
 0xb8b   :  { %v2978_v49 = vsel %vm7520_vm0, %v4848_v3, %v4898_v18  ;;  %vm7521_vm3 = vmmov %vm7520_vm0 }
 0xb8c   :  { %v2979_v55 = vsel %vm7521_vm3, %v4849_v7, %v4899_v62  ;;  %vm7522_vm10 = vmmov %vm7520_vm0  ;;  %4465 = vmatpush1.bf16.msk.msra.mxu1 %vm4464_vm1, %v4463_v63 }
 0xb8d   :  { %v2984_v21 = vsel %vm7522_vm10, %v4898_v18, %v4893_v8  ;;  %v4515_v12 = vpack.c.bf16 %v2979_v55, %v2978_v49  ;;  %vm4513_vm2 = vmpackc.low %vm7524_vm4, %vm7524_vm4 }
 0xb8e   :  { %vm4516_vm14 = vmpackc.low %vm7526_vm9, %vm7526_vm9  ;;  %v4512_v3 = vpack.c.bf16 %v2985_v11, %v2984_v21 }
 0xb8f   :  { %3067 = vmatmul.mubr.f32.vlgmr.msra.gmra.mrb[26].mxu1 %v2735_v34 }
 0xb90   :  { %4514 = vmatprep.subr.msk.bf16.mxu0 %vm4513_vm2, %v4512_v3  ;;  %3227 = vmatprep.mubr.f32.mxu1 %v7334_v0 }
 0xb91   :  { %4517 = vmatpush1.bf16.msk.msra.mxu0 %vm4516_vm14, %v4515_v12 }
 0xb94   :  { %3138 = vmatmul.mubr.f32.vlgmr.msra.gmra.mrb[28].mxu0 %v2735_v34 }
 0xc62   :  { %v3068_v7 = vpop.f32.mrb[26].mxu1 }
 0xc63   :  { %v3069_v44 = vadd.f32 %v3068_v7, %v2997_v13  ;;  %v3070_v16 = vpop.f32.mrb[27].mxu1 }
 0xc64   :  { %v3071_v28 = vadd.f32 %v3070_v16, %v2997_v13 }
 0xc65   :  { %v3144_v42 = vmax.f32 %v3069_v44, 0.0 }
 0xc66   :  { %v3145_v52 = vmax.f32 %v3071_v28, 0.0 }
 0xc67   :  { %v3139_v2 = vpop.f32.mrb[28].mxu0 }
 0xc68   :  { %v3140_v23 = vadd.f32 %v3139_v2, %v2997_v13  ;;  %v3141_v40 = vpop.f32.mrb[29].mxu0  ;;  %3163 = vmatprep.subr.mxu1 %v3145_v52 }
 0xc69   :  { %v3142_v39 = vadd.f32 %v3141_v40, %v2997_v13  ;;  %3164 = vmatpush1.msra.mxu1 %v3144_v42 }
 0xc6a   :  { %v3146_v60 = vmax.f32 %v3140_v23, 0.0  ;;  %3683 = vmatmul.mubr.msk.f32.vlgmr.msra.gmra.mrb[28].mxu1 %vm3159_vm13, %v3148_v19 }
 0xc6b   :  { %v3147_v30 = vmax.f32 %v3142_v39, 0.0  ;;  %3298 = vmatprep.mubr.f32.mxu1 %v7334_v0 }
 0xc6d   :  { %3234 = vmatprep.subr.mxu1 %v3147_v30 }
 0xc6e   :  { %3235 = vmatpush1.msra.mxu1 %v3146_v60 }
 0xc6f   :  { %3684 = vmatmul.mubr.msk.f32.vlgmr.msra.gmra.mrb[30].mxu1 %vm3159_vm13, %v3148_v19 }
 0xd3d   :  { %v3229_v26 = vpop.f32.mrb[28].mxu1 }
 0xd3e   :  { %v3230_v22 = vadd.f32 %v3229_v26, %v3158_v4  ;;  %v3231_v20 = vpop.f32.mrb[29].mxu1 }
 0xd3f   :  { %v3232_v10 = vadd.f32 %v3231_v20, %v3158_v4 }
 0xd41   :  { %v3309_v31 = vcombine.low %v3230_v22, %v3232_v10 }
 0xd42   :  { %v3300_v59 = vpop.f32.mrb[30].mxu1 }
 0xd43   :  { %v3301_v47 = vadd.f32 %v3300_v59, %v3158_v4  ;;  %v3302_v5 = vpop.f32.mrb[31].mxu1  ;;  %v3317_v36 = vrot.slane %v3309_v31, %v3316_v41 }
 0xd44   :  { %v3303_v0 = vadd.f32 %v3302_v5, %v3158_v4 }
 0xd46   :  { %v3310_v54 = vcombine.low %v3301_v47, %v3303_v0 }
 0xd48   :  { %v3324_v32 = vrot.slane %v3310_v54, %v3316_v41 }
 0xd4a   :  { %v3325_v9 = vcombine.low %v3317_v36, %v3324_v32 }
 0xd4c   :  { %v3332_v17 = vrot.slane %v3325_v9, %v3316_v41 }
 0xd4e   :  { %3338 = vst.msk [vmem:[%s7103_s13] sm:$0xf] %vm3336_vm6, %v3332_v17 }

</bundles_post_ra>
